<compile_context>
chip_gen: v5e
topology: v5e:2x2
jax: 0.10.0
libtpu: 0.0.40
codegen_flags: <defaults>
</compile_context>

<pallas_src>
import functools

import jax
import jax.numpy as jnp
from jax.experimental import pallas as pl
from jax.experimental.pallas import tpu as pltpu

BN_EPS = 1e-5
LANE = 128
VMEM_LIMIT = 32 * 1024 * 1024  # explicit scoped-VMEM budget (safe on v5e/v6e/v7x)


def _round_up(x, m):
    return (x + m - 1) // m * m


def _pick_row_tile(h, w, cin_p, cout_p):
    """Largest divisor th of h whose pass-A working set fits the VMEM budget."""
    budget = VMEM_LIMIT * 3 // 4
    fixed = 2 * (9 * cin_p * cout_p * 2)                    # bf16 weights, 2 bufs
    per_row = ((w + 2) * cin_p * 2 * 2                      # bf16 halo slab, 2 bufs
               + w * cout_p * 4 * 3)                        # f32 y (2 bufs) + acc
    want = max(1, (budget - fixed) // max(per_row, 1))
    want = min(want, max(1, 4096 // max(w, 1)))             # keep th*w <= ~4096 rows
    best = 1
    for t in range(1, h + 1):
        if h % t == 0 and t <= want:
            best = t
    return best


def _pick_m_tile(m, cout_p):
    """Largest divisor of m (multiple of 8) whose pass-B tiles fit the VMEM budget."""
    budget = VMEM_LIMIT // 2
    per_row = cout_p * (4 * 2 + 4 * 2)                      # f32 in x2 + out x2 bufs
    cap = max(8, budget // max(per_row, 1))
    best = None
    t = 8
    while t <= min(m, cap):
        if m % t == 0:
            best = t
        t += 8
    return best if best is not None else m


# ---------------------------------------------------------------------------
# Pass A: conv3x3 + bias + per-tile BN partial statistics
# ---------------------------------------------------------------------------
def _conv_bias_stats_kernel(slab_ref, w_ref, b_ref, y_ref, stats_ref, *, th, ww):
    # slab_ref : (th+2, W+2, Cin_p)    bf16  halo'd input rows for this tile
    # w_ref    : (3, 3, Cin_p, Cout_p) bf16  (VMEM-resident: constant index_map)
    # b_ref    : (1, Cout_p)           f32
    # y_ref    : (th*W, Cout_p)        f32   conv+bias output rows (lane-dense)
    # stats_ref: (2, Cout_p)           f32   per-tile [sum, sum_of_squares]
    rows = th * ww
    cin = slab_ref.shape[-1]
    # Fold the conv bias into the accumulator init (saves one add pass over rows).
    acc = jnp.broadcast_to(b_ref[...], y_ref.shape).astype(jnp.float32)
    for ky in range(3):
        for kx in range(3):
            lhs = slab_ref[pl.ds(ky, th), pl.ds(kx, ww), :]   # (th, W, Cin_p)
            lhs = lhs.reshape(rows, cin)                      # static retile
            acc = acc + jnp.dot(lhs, w_ref[ky, kx],
                                preferred_element_type=jnp.float32)
    y_ref[...] = acc
    s1 = jnp.sum(acc, axis=0, keepdims=True)                  # (1, Cout_p)
    s2 = jnp.sum(acc * acc, axis=0, keepdims=True)            # (1, Cout_p)
    stats_ref[...] = jnp.concatenate([s1, s2], axis=0)        # (2, Cout_p)


# ---------------------------------------------------------------------------
# Pass B: normalize + affine + ReLU (per-channel scale/shift precomputed)
# ---------------------------------------------------------------------------
def _bn_relu_kernel(y_ref, scale_ref, shift_ref, o_ref):
    y = y_ref[...] * scale_ref[...] + shift_ref[...]
    o_ref[...] = jnp.maximum(y, 0.0).astype(o_ref.dtype)


def _conv_block(x_nhwc, w_oihw, b, gamma, beta, *, out_dtype):
    """Conv3x3(pad=1) + BatchNorm2d(batch stats) + ReLU.

    x_nhwc: (N, H, W, Cin_p) with Cin_p % 128 == 0 (zero-padded channels).
    Returns (N, H, W, Cout_p) in out_dtype; channels >= Cout are exactly zero.
    """
    x_nhwc = x_nhwc.astype(jnp.bfloat16)
    n, h, w, cin_p = x_nhwc.shape
    cout, cin, kh, kw = w_oihw.shape
    assert (kh, kw) == (3, 3)
    cout_p = _round_up(cout, LANE)

    # Weight (Cout,Cin,3,3) -> (3,3,Cin_p,Cout_p), zero-padded, bf16.
    w_mat = jnp.transpose(w_oihw, (2, 3, 1, 0))
    w_mat = jnp.pad(w_mat, ((0, 0), (0, 0), (0, cin_p - cin), (0, cout_p - cout)))
    w_mat = w_mat.astype(jnp.bfloat16)
    b_p = jnp.pad(b, (0, cout_p - cout)).astype(jnp.float32).reshape(1, cout_p)
    gamma_p = jnp.pad(gamma, (0, cout_p - cout)).astype(jnp.float32)
    beta_p = jnp.pad(beta, (0, cout_p - cout)).astype(jnp.float32)

    # ---- tiling -----------------------------------------------------------
    th = _pick_row_tile(h, w, cin_p, cout_p)   # image rows per tile (divides H)
    n_ht = h // th
    rows = th * w                              # output rows per grid step
    grid = n * n_ht
    m = n * h * w
    assert rows % 8 == 0 or grid == 1, "row tile must be sublane-aligned"

    # Halo'd slabs: (N*n_ht, th+2, W+2, Cin_p). Only ~2/th row duplication.
    xp = jnp.pad(x_nhwc, ((0, 0), (1, 1), (1, 1), (0, 0)))
    slabs = jnp.stack([xp[:, i * th:i * th + th + 2] for i in range(n_ht)],
                      axis=1).reshape(grid, th + 2, w + 2, cin_p)

    # ---- pass A: conv + bias + partial stats ------------------------------
    kernel = functools.partial(_conv_bias_stats_kernel, th=th, ww=w)
    flops_a = 2 * m * 9 * cin_p * cout_p
    bytes_a = (slabs.size * 2 + w_mat.size * 2 + b_p.size * 4
               + m * cout_p * 4 + grid * 2 * cout_p * 4)
    y, partial = pl.pallas_call(
        kernel,
        out_shape=(jax.ShapeDtypeStruct((m, cout_p), jnp.float32),
                   jax.ShapeDtypeStruct((grid, 2, cout_p), jnp.float32)),
        grid_spec=pltpu.PrefetchScalarGridSpec(
            num_scalar_prefetch=0,
            grid=(grid,),
            in_specs=[
                pl.BlockSpec((None, th + 2, w + 2, cin_p),
                             lambda g: (g, 0, 0, 0)),
                pl.BlockSpec((3, 3, cin_p, cout_p), lambda g: (0, 0, 0, 0)),
                pl.BlockSpec((1, cout_p), lambda g: (0, 0)),
            ],
            out_specs=[
                pl.BlockSpec((rows, cout_p), lambda g: (g, 0)),
                pl.BlockSpec((None, 2, cout_p), lambda g: (g, 0, 0)),
            ],
        ),
        compiler_params=pltpu.CompilerParams(
            dimension_semantics=("parallel",),
            vmem_limit_bytes=VMEM_LIMIT),
        cost_estimate=pl.CostEstimate(flops=flops_a, transcendentals=0,
                                      bytes_accessed=bytes_a),
    )(slabs, w_mat, b_p)

    # ---- tiny glue: global batch statistics -> per-channel scale/shift ----
    stats = jnp.sum(partial, axis=0)                            # (2, Cout_p)
    inv_count = jnp.float32(1.0 / m)
    mean = stats[0] * inv_count
    var = jnp.maximum(stats[1] * inv_count - mean * mean, 0.0)  # cancellation guard
    scale = gamma_p * jax.lax.rsqrt(var + BN_EPS)
    shift = beta_p - mean * scale
    scale = scale.reshape(1, cout_p)
    shift = shift.reshape(1, cout_p)

    # ---- pass B: normalize + affine + ReLU --------------------------------
    tm = _pick_m_tile(m, cout_p)
    out_bytes = jnp.dtype(out_dtype).itemsize
    bytes_b = m * cout_p * (4 + out_bytes) + 2 * cout_p * 4
    out = pl.pallas_call(
        _bn_relu_kernel,
        out_shape=jax.ShapeDtypeStruct((m, cout_p), out_dtype),
        grid_spec=pltpu.PrefetchScalarGridSpec(
            num_scalar_prefetch=0,
            grid=(m // tm,),
            in_specs=[
                pl.BlockSpec((tm, cout_p), lambda i: (i, 0)),
                pl.BlockSpec((1, cout_p), lambda i: (0, 0)),
                pl.BlockSpec((1, cout_p), lambda i: (0, 0)),
            ],
            out_specs=pl.BlockSpec((tm, cout_p), lambda i: (i, 0)),
        ),
        compiler_params=pltpu.CompilerParams(
            dimension_semantics=("parallel",),
            vmem_limit_bytes=VMEM_LIMIT),
        cost_estimate=pl.CostEstimate(flops=3 * m * cout_p, transcendentals=0,
                                      bytes_accessed=bytes_b),
    )(y, scale, shift)

    return out.reshape(n, h, w, cout_p)


def double_conv(x_nchw, params):
    (w1, b1, g1, be1, w2, b2, g2, be2) = params
    n, cin, h, wd = x_nchw.shape
    cout = w1.shape[0]
    cin_p = _round_up(cin, LANE)

    x = jnp.transpose(x_nchw, (0, 2, 3, 1))                        # NCHW -> NHWC
    x = jnp.pad(x, ((0, 0), (0, 0), (0, 0), (0, cin_p - cin)))     # lane-dense C
    x = x.astype(jnp.bfloat16)                                     # MXU input dtype

    h1 = _conv_block(x, w1, b1, g1, be1, out_dtype=jnp.bfloat16)   # (N,H,W,Cp)
    h2 = _conv_block(h1, w2, b2, g2, be2, out_dtype=jnp.float32)   # (N,H,W,Cp)

    h2 = h2[..., :cout]                                            # drop channel pad
    return jnp.transpose(h2, (0, 3, 1, 2))                         # NHWC -> NCHW


# ---------------------------------------------------------------------------
# Pure-JAX reference (same semantics & dtype policy: bf16 matmul, f32 elsewhere)
# ---------------------------------------------------------------------------
def ref_double_conv(x_nchw, params):
    (w1, b1, g1, be1, w2, b2, g2, be2) = params

    def block(x, w, b, g, be):
        y = jax.lax.conv_general_dilated(
            x.astype(jnp.bfloat16), w.astype(jnp.bfloat16),
            window_strides=(1, 1), padding=((1, 1), (1, 1)),
            dimension_numbers=("NCHW", "OIHW", "NCHW"),
            preferred_element_type=jnp.float32)
        y = y + b[None, :, None, None]
        mean = jnp.mean(y, axis=(0, 2, 3), keepdims=True)
        var = jnp.mean((y - mean) ** 2, axis=(0, 2, 3), keepdims=True)
        y = (y - mean) * jax.lax.rsqrt(var + BN_EPS)
        y = y * g[None, :, None, None] + be[None, :, None, None]
        return jnp.maximum(y, 0.0)

    hmid = block(x_nchw, w1, b1, g1, be1)
    return block(hmid, w2, b2, g2, be2)


if __name__ == "__main__":
    key = jax.random.PRNGKey(0)
    n, cin, cout, h, w = 2, 4, 8, 16, 16

    k = jax.random.split(key, 5)
    x = jax.random.normal(k[0], (n, cin, h, w), jnp.float32)

    w1 = jax.random.normal(k[1], (cout, cin, 3, 3), jnp.float32) * 0.1
    b1 = jax.random.normal(k[2], (cout,), jnp.float32) * 0.1
    g1 = jnp.ones((cout,), jnp.float32)      # BatchNorm weight (default init)
    be1 = jnp.zeros((cout,), jnp.float32)    # BatchNorm bias   (default init)

    w2 = jax.random.normal(k[3], (cout, cout, 3, 3), jnp.float32) * 0.1
    b2 = jax.random.normal(k[4], (cout,), jnp.float32) * 0.1
    g2 = jnp.ones((cout,), jnp.float32)
    be2 = jnp.zeros((cout,), jnp.float32)

    params = (w1, b1, g1, be1, w2, b2, g2, be2)

    out = jax.block_until_ready(jax.jit(double_conv)(x, params))
    ref = jax.block_until_ready(ref_double_conv(x, params))

    assert out.shape == (n, cout, h, w), out.shape
    max_err = float(jnp.max(jnp.abs(out - ref)))
    assert jnp.allclose(out, ref, atol=2e-3, rtol=2e-3), max_err
    print("KERNEL_OK")
</pallas_src>

<mosaic_0001>
module attributes {stable_mosaic.version = 11 : i64} {
  func.func @_conv_bias_stats_kernel(%arg0: i32, %arg1: memref<1x18x18x128xbf16, #tpu.memory_space<vmem>>, %arg2: memref<3x3x128x128xbf16, #tpu.memory_space<vmem>>, %arg3: memref<1x128xf32, #tpu.memory_space<vmem>>, %arg4: memref<256x128xf32, #tpu.memory_space<vmem>>, %arg5: memref<1x2x128xf32, #tpu.memory_space<vmem>>) attributes {dimension_semantics = [#tpu.dimension_semantics<parallel>], iteration_bounds = array<i64: 2>, scalar_prefetch = 0 : i64, scratch_operands = 0 : i64, tpu.core_type = #tpu.core_type<tc>, window_params = [{transform_indices = @transform_0, window_bounds = array<i64: 1, 18, 18, 128>}, {pipeline_mode = #tpu.pipeline_mode<synchronous>, transform_indices = @transform_1, window_bounds = array<i64: 3, 3, 128, 128>}, {pipeline_mode = #tpu.pipeline_mode<synchronous>, transform_indices = @transform_2, window_bounds = array<i64: 1, 128>}, {transform_indices = @transform_3, window_bounds = array<i64: 256, 128>}, {transform_indices = @transform_4, window_bounds = array<i64: 1, 2, 128>}]} {
    %c0 = arith.constant 0 : index
    %c0_0 = arith.constant 0 : index
    %0 = vector.load %arg3[%c0, %c0_0] : memref<1x128xf32, #tpu.memory_space<vmem>>, vector<1x128xf32>
    %1 = vector.shape_cast %0 : vector<1x128xf32> to vector<1x128xf32>
    %2 = vector.broadcast %1 : vector<1x128xf32> to vector<256x128xf32>
    %c0_1 = arith.constant 0 : index
    %c0_2 = arith.constant 0 : index
    %c0_3 = arith.constant 0 : index
    %c0_4 = arith.constant 0 : index
    %3 = vector.load %arg1[%c0_1, %c0_2, %c0_3, %c0_4] : memref<1x18x18x128xbf16, #tpu.memory_space<vmem>>, vector<1x16x16x128xbf16>
    %4 = vector.shape_cast %3 : vector<1x16x16x128xbf16> to vector<16x16x128xbf16>
    %5 = vector.shape_cast %4 : vector<16x16x128xbf16> to vector<256x128xbf16>
    %c0_5 = arith.constant 0 : index
    %c0_6 = arith.constant 0 : index
    %c0_7 = arith.constant 0 : index
    %c0_8 = arith.constant 0 : index
    %6 = vector.load %arg2[%c0_5, %c0_6, %c0_7, %c0_8] : memref<3x3x128x128xbf16, #tpu.memory_space<vmem>>, vector<1x1x128x128xbf16>
    %7 = vector.shape_cast %6 : vector<1x1x128x128xbf16> to vector<128x128xbf16>
    %cst = arith.constant dense<0.000000e+00> : vector<256x128xf32>
    %8 = tpu.matmul %5, %7, %cst {dimension_numbers = #tpu.dot_dimension_numbers<[1], [0], [0], [1], [0, 0, 1, 1], [], []>} : vector<256x128xbf16>, vector<128x128xbf16>, vector<256x128xf32> -> vector<256x128xf32>
    %9 = arith.addf %2, %8 : vector<256x128xf32>
    %c0_9 = arith.constant 0 : index
    %c0_10 = arith.constant 0 : index
    %c1 = arith.constant 1 : index
    %c0_11 = arith.constant 0 : index
    %10 = vector.load %arg1[%c0_9, %c0_10, %c1, %c0_11] : memref<1x18x18x128xbf16, #tpu.memory_space<vmem>>, vector<1x16x16x128xbf16>
    %11 = vector.shape_cast %10 : vector<1x16x16x128xbf16> to vector<16x16x128xbf16>
    %12 = vector.shape_cast %11 : vector<16x16x128xbf16> to vector<256x128xbf16>
    %c0_12 = arith.constant 0 : index
    %c1_13 = arith.constant 1 : index
    %c0_14 = arith.constant 0 : index
    %c0_15 = arith.constant 0 : index
    %13 = vector.load %arg2[%c0_12, %c1_13, %c0_14, %c0_15] : memref<3x3x128x128xbf16, #tpu.memory_space<vmem>>, vector<1x1x128x128xbf16>
    %14 = vector.shape_cast %13 : vector<1x1x128x128xbf16> to vector<128x128xbf16>
    %cst_16 = arith.constant dense<0.000000e+00> : vector<256x128xf32>
    %15 = tpu.matmul %12, %14, %cst_16 {dimension_numbers = #tpu.dot_dimension_numbers<[1], [0], [0], [1], [0, 0, 1, 1], [], []>} : vector<256x128xbf16>, vector<128x128xbf16>, vector<256x128xf32> -> vector<256x128xf32>
    %16 = arith.addf %9, %15 : vector<256x128xf32>
    %c0_17 = arith.constant 0 : index
    %c0_18 = arith.constant 0 : index
    %c2 = arith.constant 2 : index
    %c0_19 = arith.constant 0 : index
    %17 = vector.load %arg1[%c0_17, %c0_18, %c2, %c0_19] : memref<1x18x18x128xbf16, #tpu.memory_space<vmem>>, vector<1x16x16x128xbf16>
    %18 = vector.shape_cast %17 : vector<1x16x16x128xbf16> to vector<16x16x128xbf16>
    %19 = vector.shape_cast %18 : vector<16x16x128xbf16> to vector<256x128xbf16>
    %c0_20 = arith.constant 0 : index
    %c2_21 = arith.constant 2 : index
    %c0_22 = arith.constant 0 : index
    %c0_23 = arith.constant 0 : index
    %20 = vector.load %arg2[%c0_20, %c2_21, %c0_22, %c0_23] : memref<3x3x128x128xbf16, #tpu.memory_space<vmem>>, vector<1x1x128x128xbf16>
    %21 = vector.shape_cast %20 : vector<1x1x128x128xbf16> to vector<128x128xbf16>
    %cst_24 = arith.constant dense<0.000000e+00> : vector<256x128xf32>
    %22 = tpu.matmul %19, %21, %cst_24 {dimension_numbers = #tpu.dot_dimension_numbers<[1], [0], [0], [1], [0, 0, 1, 1], [], []>} : vector<256x128xbf16>, vector<128x128xbf16>, vector<256x128xf32> -> vector<256x128xf32>
    %23 = arith.addf %16, %22 : vector<256x128xf32>
    %c0_25 = arith.constant 0 : index
    %c1_26 = arith.constant 1 : index
    %c0_27 = arith.constant 0 : index
    %c0_28 = arith.constant 0 : index
    %24 = vector.load %arg1[%c0_25, %c1_26, %c0_27, %c0_28] : memref<1x18x18x128xbf16, #tpu.memory_space<vmem>>, vector<1x16x16x128xbf16>
    %25 = vector.shape_cast %24 : vector<1x16x16x128xbf16> to vector<16x16x128xbf16>
    %26 = vector.shape_cast %25 : vector<16x16x128xbf16> to vector<256x128xbf16>
    %c1_29 = arith.constant 1 : index
    %c0_30 = arith.constant 0 : index
    %c0_31 = arith.constant 0 : index
    %c0_32 = arith.constant 0 : index
    %27 = vector.load %arg2[%c1_29, %c0_30, %c0_31, %c0_32] : memref<3x3x128x128xbf16, #tpu.memory_space<vmem>>, vector<1x1x128x128xbf16>
    %28 = vector.shape_cast %27 : vector<1x1x128x128xbf16> to vector<128x128xbf16>
    %cst_33 = arith.constant dense<0.000000e+00> : vector<256x128xf32>
    %29 = tpu.matmul %26, %28, %cst_33 {dimension_numbers = #tpu.dot_dimension_numbers<[1], [0], [0], [1], [0, 0, 1, 1], [], []>} : vector<256x128xbf16>, vector<128x128xbf16>, vector<256x128xf32> -> vector<256x128xf32>
    %30 = arith.addf %23, %29 : vector<256x128xf32>
    %c0_34 = arith.constant 0 : index
    %c1_35 = arith.constant 1 : index
    %c1_36 = arith.constant 1 : index
    %c0_37 = arith.constant 0 : index
    %31 = vector.load %arg1[%c0_34, %c1_35, %c1_36, %c0_37] : memref<1x18x18x128xbf16, #tpu.memory_space<vmem>>, vector<1x16x16x128xbf16>
    %32 = vector.shape_cast %31 : vector<1x16x16x128xbf16> to vector<16x16x128xbf16>
    %33 = vector.shape_cast %32 : vector<16x16x128xbf16> to vector<256x128xbf16>
    %c1_38 = arith.constant 1 : index
    %c1_39 = arith.constant 1 : index
    %c0_40 = arith.constant 0 : index
    %c0_41 = arith.constant 0 : index
    %34 = vector.load %arg2[%c1_38, %c1_39, %c0_40, %c0_41] : memref<3x3x128x128xbf16, #tpu.memory_space<vmem>>, vector<1x1x128x128xbf16>
    %35 = vector.shape_cast %34 : vector<1x1x128x128xbf16> to vector<128x128xbf16>
    %cst_42 = arith.constant dense<0.000000e+00> : vector<256x128xf32>
    %36 = tpu.matmul %33, %35, %cst_42 {dimension_numbers = #tpu.dot_dimension_numbers<[1], [0], [0], [1], [0, 0, 1, 1], [], []>} : vector<256x128xbf16>, vector<128x128xbf16>, vector<256x128xf32> -> vector<256x128xf32>
    %37 = arith.addf %30, %36 : vector<256x128xf32>
    %c0_43 = arith.constant 0 : index
    %c1_44 = arith.constant 1 : index
    %c2_45 = arith.constant 2 : index
    %c0_46 = arith.constant 0 : index
    %38 = vector.load %arg1[%c0_43, %c1_44, %c2_45, %c0_46] : memref<1x18x18x128xbf16, #tpu.memory_space<vmem>>, vector<1x16x16x128xbf16>
    %39 = vector.shape_cast %38 : vector<1x16x16x128xbf16> to vector<16x16x128xbf16>
    %40 = vector.shape_cast %39 : vector<16x16x128xbf16> to vector<256x128xbf16>
    %c1_47 = arith.constant 1 : index
    %c2_48 = arith.constant 2 : index
    %c0_49 = arith.constant 0 : index
    %c0_50 = arith.constant 0 : index
    %41 = vector.load %arg2[%c1_47, %c2_48, %c0_49, %c0_50] : memref<3x3x128x128xbf16, #tpu.memory_space<vmem>>, vector<1x1x128x128xbf16>
    %42 = vector.shape_cast %41 : vector<1x1x128x128xbf16> to vector<128x128xbf16>
    %cst_51 = arith.constant dense<0.000000e+00> : vector<256x128xf32>
    %43 = tpu.matmul %40, %42, %cst_51 {dimension_numbers = #tpu.dot_dimension_numbers<[1], [0], [0], [1], [0, 0, 1, 1], [], []>} : vector<256x128xbf16>, vector<128x128xbf16>, vector<256x128xf32> -> vector<256x128xf32>
    %44 = arith.addf %37, %43 : vector<256x128xf32>
    %c0_52 = arith.constant 0 : index
    %c2_53 = arith.constant 2 : index
    %c0_54 = arith.constant 0 : index
    %c0_55 = arith.constant 0 : index
    %45 = vector.load %arg1[%c0_52, %c2_53, %c0_54, %c0_55] : memref<1x18x18x128xbf16, #tpu.memory_space<vmem>>, vector<1x16x16x128xbf16>
    %46 = vector.shape_cast %45 : vector<1x16x16x128xbf16> to vector<16x16x128xbf16>
    %47 = vector.shape_cast %46 : vector<16x16x128xbf16> to vector<256x128xbf16>
    %c2_56 = arith.constant 2 : index
    %c0_57 = arith.constant 0 : index
    %c0_58 = arith.constant 0 : index
    %c0_59 = arith.constant 0 : index
    %48 = vector.load %arg2[%c2_56, %c0_57, %c0_58, %c0_59] : memref<3x3x128x128xbf16, #tpu.memory_space<vmem>>, vector<1x1x128x128xbf16>
    %49 = vector.shape_cast %48 : vector<1x1x128x128xbf16> to vector<128x128xbf16>
    %cst_60 = arith.constant dense<0.000000e+00> : vector<256x128xf32>
    %50 = tpu.matmul %47, %49, %cst_60 {dimension_numbers = #tpu.dot_dimension_numbers<[1], [0], [0], [1], [0, 0, 1, 1], [], []>} : vector<256x128xbf16>, vector<128x128xbf16>, vector<256x128xf32> -> vector<256x128xf32>
    %51 = arith.addf %44, %50 : vector<256x128xf32>
    %c0_61 = arith.constant 0 : index
    %c2_62 = arith.constant 2 : index
    %c1_63 = arith.constant 1 : index
    %c0_64 = arith.constant 0 : index
    %52 = vector.load %arg1[%c0_61, %c2_62, %c1_63, %c0_64] : memref<1x18x18x128xbf16, #tpu.memory_space<vmem>>, vector<1x16x16x128xbf16>
    %53 = vector.shape_cast %52 : vector<1x16x16x128xbf16> to vector<16x16x128xbf16>
    %54 = vector.shape_cast %53 : vector<16x16x128xbf16> to vector<256x128xbf16>
    %c2_65 = arith.constant 2 : index
    %c1_66 = arith.constant 1 : index
    %c0_67 = arith.constant 0 : index
    %c0_68 = arith.constant 0 : index
    %55 = vector.load %arg2[%c2_65, %c1_66, %c0_67, %c0_68] : memref<3x3x128x128xbf16, #tpu.memory_space<vmem>>, vector<1x1x128x128xbf16>
    %56 = vector.shape_cast %55 : vector<1x1x128x128xbf16> to vector<128x128xbf16>
    %cst_69 = arith.constant dense<0.000000e+00> : vector<256x128xf32>
    %57 = tpu.matmul %54, %56, %cst_69 {dimension_numbers = #tpu.dot_dimension_numbers<[1], [0], [0], [1], [0, 0, 1, 1], [], []>} : vector<256x128xbf16>, vector<128x128xbf16>, vector<256x128xf32> -> vector<256x128xf32>
    %58 = arith.addf %51, %57 : vector<256x128xf32>
    %c0_70 = arith.constant 0 : index
    %c2_71 = arith.constant 2 : index
    %c2_72 = arith.constant 2 : index
    %c0_73 = arith.constant 0 : index
    %59 = vector.load %arg1[%c0_70, %c2_71, %c2_72, %c0_73] : memref<1x18x18x128xbf16, #tpu.memory_space<vmem>>, vector<1x16x16x128xbf16>
    %60 = vector.shape_cast %59 : vector<1x16x16x128xbf16> to vector<16x16x128xbf16>
    %61 = vector.shape_cast %60 : vector<16x16x128xbf16> to vector<256x128xbf16>
    %c2_74 = arith.constant 2 : index
    %c2_75 = arith.constant 2 : index
    %c0_76 = arith.constant 0 : index
    %c0_77 = arith.constant 0 : index
    %62 = vector.load %arg2[%c2_74, %c2_75, %c0_76, %c0_77] : memref<3x3x128x128xbf16, #tpu.memory_space<vmem>>, vector<1x1x128x128xbf16>
    %63 = vector.shape_cast %62 : vector<1x1x128x128xbf16> to vector<128x128xbf16>
    %cst_78 = arith.constant dense<0.000000e+00> : vector<256x128xf32>
    %64 = tpu.matmul %61, %63, %cst_78 {dimension_numbers = #tpu.dot_dimension_numbers<[1], [0], [0], [1], [0, 0, 1, 1], [], []>} : vector<256x128xbf16>, vector<128x128xbf16>, vector<256x128xf32> -> vector<256x128xf32>
    %65 = arith.addf %58, %64 : vector<256x128xf32>
    %c0_79 = arith.constant 0 : index
    %c0_80 = arith.constant 0 : index
    %66 = vector.load %arg4[%c0_79, %c0_80] : memref<256x128xf32, #tpu.memory_space<vmem>>, vector<256x128xf32>
    tpu.vector_store %arg4[%c0_79, %c0_80], %65 {strides = array<i32>} : memref<256x128xf32, #tpu.memory_space<vmem>>, vector<256x128xf32>,
    %cst_81 = arith.constant dense<0.000000e+00> : vector<128xf32>
    %67 = vector.multi_reduction <add>, %65, %cst_81 [0] : vector<256x128xf32> to vector<128xf32>
    %68 = vector.shape_cast %67 : vector<128xf32> to vector<1x128xf32>
    %69 = arith.mulf %65, %65 : vector<256x128xf32>
    %cst_82 = arith.constant dense<0.000000e+00> : vector<128xf32>
    %70 = vector.multi_reduction <add>, %69, %cst_82 [0] : vector<256x128xf32> to vector<128xf32>
    %71 = vector.shape_cast %70 : vector<128xf32> to vector<1x128xf32>
    %72 = tpu.concatenate %68, %71 in 0 : vector<1x128xf32>, vector<1x128xf32> -> vector<2x128xf32>
    %c0_83 = arith.constant 0 : index
    %c0_84 = arith.constant 0 : index
    %c0_85 = arith.constant 0 : index
    %73 = vector.load %arg5[%c0_83, %c0_84, %c0_85] : memref<1x2x128xf32, #tpu.memory_space<vmem>>, vector<1x2x128xf32>
    %74 = vector.shape_cast %73 : vector<1x2x128xf32> to vector<2x128xf32>
    %75 = vector.shape_cast %72 : vector<2x128xf32> to vector<1x2x128xf32>
    tpu.vector_store %arg5[%c0_83, %c0_84, %c0_85], %75 {strides = array<i32>} : memref<1x2x128xf32, #tpu.memory_space<vmem>>, vector<1x2x128xf32>,
    return
  }
  func.func @transform_0(%arg0: i32) -> (i32, i32, i32, i32) {
    %c0_i32 = arith.constant 0 : i32
    %c0_i32_0 = arith.constant 0 : i32
    %c0_i32_1 = arith.constant 0 : i32
    %c0_i32_2 = arith.constant 0 : i32
    return %arg0, %c0_i32, %c0_i32_0, %c0_i32_1 : i32, i32, i32, i32
  }
  func.func @transform_1(%arg0: i32) -> (i32, i32, i32, i32) {
    %c0_i32 = arith.constant 0 : i32
    %c0_i32_0 = arith.constant 0 : i32
    %c0_i32_1 = arith.constant 0 : i32
    %c0_i32_2 = arith.constant 0 : i32
    %c0_i32_3 = arith.constant 0 : i32
    return %c0_i32, %c0_i32_0, %c0_i32_1, %c0_i32_2 : i32, i32, i32, i32
  }
  func.func @transform_2(%arg0: i32) -> (i32, i32) {
    %c0_i32 = arith.constant 0 : i32
    %c0_i32_0 = arith.constant 0 : i32
    %c0_i32_1 = arith.constant 0 : i32
    return %c0_i32, %c0_i32_0 : i32, i32
  }
  func.func @transform_3(%arg0: i32) -> (i32, i32) {
    %c0_i32 = arith.constant 0 : i32
    %c0_i32_0 = arith.constant 0 : i32
    return %arg0, %c0_i32 : i32, i32
  }
  func.func @transform_4(%arg0: i32) -> (i32, i32, i32) {
    %c0_i32 = arith.constant 0 : i32
    %c0_i32_0 = arith.constant 0 : i32
    %c0_i32_1 = arith.constant 0 : i32
    return %arg0, %c0_i32, %c0_i32_0 : i32, i32, i32
  }
}

module attributes {stable_mosaic.version = 11 : i64} {
  func.func @_bn_relu_kernel(%arg0: i32, %arg1: memref<512x128xf32, #tpu.memory_space<vmem>>, %arg2: memref<1x128xf32, #tpu.memory_space<vmem>>, %arg3: memref<1x128xf32, #tpu.memory_space<vmem>>, %arg4: memref<512x128xbf16, #tpu.memory_space<vmem>>) attributes {dimension_semantics = [#tpu.dimension_semantics<parallel>], iteration_bounds = array<i64: 1>, scalar_prefetch = 0 : i64, scratch_operands = 0 : i64, tpu.core_type = #tpu.core_type<tc>, window_params = [{transform_indices = @transform_0, window_bounds = array<i64: 512, 128>}, {pipeline_mode = #tpu.pipeline_mode<synchronous>, transform_indices = @transform_1, window_bounds = array<i64: 1, 128>}, {pipeline_mode = #tpu.pipeline_mode<synchronous>, transform_indices = @transform_2, window_bounds = array<i64: 1, 128>}, {transform_indices = @transform_3, window_bounds = array<i64: 512, 128>}]} {
    %c0 = arith.constant 0 : index
    %c0_0 = arith.constant 0 : index
    %0 = vector.load %arg1[%c0, %c0_0] : memref<512x128xf32, #tpu.memory_space<vmem>>, vector<512x128xf32>
    %c0_1 = arith.constant 0 : index
    %c0_2 = arith.constant 0 : index
    %1 = vector.load %arg2[%c0_1, %c0_2] : memref<1x128xf32, #tpu.memory_space<vmem>>, vector<1x128xf32>
    %2 = vector.broadcast %1 : vector<1x128xf32> to vector<512x128xf32>
    %3 = arith.mulf %0, %2 : vector<512x128xf32>
    %c0_3 = arith.constant 0 : index
    %c0_4 = arith.constant 0 : index
    %4 = vector.load %arg3[%c0_3, %c0_4] : memref<1x128xf32, #tpu.memory_space<vmem>>, vector<1x128xf32>
    %5 = vector.broadcast %4 : vector<1x128xf32> to vector<512x128xf32>
    %6 = arith.addf %3, %5 : vector<512x128xf32>
    %cst = arith.constant 0.000000e+00 : f32
    %7 = vector.broadcast %cst : f32 to vector<512x128xf32>
    %8 = arith.maximumf %6, %7 : vector<512x128xf32>
    %9 = arith.truncf %8 : vector<512x128xf32> to vector<512x128xbf16>
    %c0_5 = arith.constant 0 : index
    %c0_6 = arith.constant 0 : index
    %10 = vector.load %arg4[%c0_5, %c0_6] : memref<512x128xbf16, #tpu.memory_space<vmem>>, vector<512x128xbf16>
    tpu.vector_store %arg4[%c0_5, %c0_6], %9 {strides = array<i32>} : memref<512x128xbf16, #tpu.memory_space<vmem>>, vector<512x128xbf16>,
    return
  }
  func.func @transform_0(%arg0: i32) -> (i32, i32) {
    %c0_i32 = arith.constant 0 : i32
    %c0_i32_0 = arith.constant 0 : i32
    return %arg0, %c0_i32 : i32, i32
  }
  func.func @transform_1(%arg0: i32) -> (i32, i32) {
    %c0_i32 = arith.constant 0 : i32
    %c0_i32_0 = arith.constant 0 : i32
    %c0_i32_1 = arith.constant 0 : i32
    return %c0_i32, %c0_i32_0 : i32, i32
  }
  func.func @transform_2(%arg0: i32) -> (i32, i32) {
    %c0_i32 = arith.constant 0 : i32
    %c0_i32_0 = arith.constant 0 : i32
    %c0_i32_1 = arith.constant 0 : i32
    return %c0_i32, %c0_i32_0 : i32, i32
  }
  func.func @transform_3(%arg0: i32) -> (i32, i32) {
    %c0_i32 = arith.constant 0 : i32
    %c0_i32_0 = arith.constant 0 : i32
    return %arg0, %c0_i32 : i32, i32
  }
}

module attributes {stable_mosaic.version = 11 : i64} {
  func.func @_bn_relu_kernel(%arg0: i32, %arg1: memref<512x128xf32, #tpu.memory_space<vmem>>, %arg2: memref<1x128xf32, #tpu.memory_space<vmem>>, %arg3: memref<1x128xf32, #tpu.memory_space<vmem>>, %arg4: memref<512x128xf32, #tpu.memory_space<vmem>>) attributes {dimension_semantics = [#tpu.dimension_semantics<parallel>], iteration_bounds = array<i64: 1>, scalar_prefetch = 0 : i64, scratch_operands = 0 : i64, tpu.core_type = #tpu.core_type<tc>, window_params = [{transform_indices = @transform_0, window_bounds = array<i64: 512, 128>}, {pipeline_mode = #tpu.pipeline_mode<synchronous>, transform_indices = @transform_1, window_bounds = array<i64: 1, 128>}, {pipeline_mode = #tpu.pipeline_mode<synchronous>, transform_indices = @transform_2, window_bounds = array<i64: 1, 128>}, {transform_indices = @transform_3, window_bounds = array<i64: 512, 128>}]} {
    %c0 = arith.constant 0 : index
    %c0_0 = arith.constant 0 : index
    %0 = vector.load %arg1[%c0, %c0_0] : memref<512x128xf32, #tpu.memory_space<vmem>>, vector<512x128xf32>
    %c0_1 = arith.constant 0 : index
    %c0_2 = arith.constant 0 : index
    %1 = vector.load %arg2[%c0_1, %c0_2] : memref<1x128xf32, #tpu.memory_space<vmem>>, vector<1x128xf32>
    %2 = vector.broadcast %1 : vector<1x128xf32> to vector<512x128xf32>
    %3 = arith.mulf %0, %2 : vector<512x128xf32>
    %c0_3 = arith.constant 0 : index
    %c0_4 = arith.constant 0 : index
    %4 = vector.load %arg3[%c0_3, %c0_4] : memref<1x128xf32, #tpu.memory_space<vmem>>, vector<1x128xf32>
    %5 = vector.broadcast %4 : vector<1x128xf32> to vector<512x128xf32>
    %6 = arith.addf %3, %5 : vector<512x128xf32>
    %cst = arith.constant 0.000000e+00 : f32
    %7 = vector.broadcast %cst : f32 to vector<512x128xf32>
    %8 = arith.maximumf %6, %7 : vector<512x128xf32>
    %c0_5 = arith.constant 0 : index
    %c0_6 = arith.constant 0 : index
    %9 = vector.load %arg4[%c0_5, %c0_6] : memref<512x128xf32, #tpu.memory_space<vmem>>, vector<512x128xf32>
    tpu.vector_store %arg4[%c0_5, %c0_6], %8 {strides = array<i32>} : memref<512x128xf32, #tpu.memory_space<vmem>>, vector<512x128xf32>,
    return
  }
  func.func @transform_0(%arg0: i32) -> (i32, i32) {
    %c0_i32 = arith.constant 0 : i32
    %c0_i32_0 = arith.constant 0 : i32
    return %arg0, %c0_i32 : i32, i32
  }
  func.func @transform_1(%arg0: i32) -> (i32, i32) {
    %c0_i32 = arith.constant 0 : i32
    %c0_i32_0 = arith.constant 0 : i32
    %c0_i32_1 = arith.constant 0 : i32
    return %c0_i32, %c0_i32_0 : i32, i32
  }
  func.func @transform_2(%arg0: i32) -> (i32, i32) {
    %c0_i32 = arith.constant 0 : i32
    %c0_i32_0 = arith.constant 0 : i32
    %c0_i32_1 = arith.constant 0 : i32
    return %c0_i32, %c0_i32_0 : i32, i32
  }
  func.func @transform_3(%arg0: i32) -> (i32, i32) {
    %c0_i32 = arith.constant 0 : i32
    %c0_i32_0 = arith.constant 0 : i32
    return %arg0, %c0_i32 : i32, i32
  }
}

</mosaic_0001>

<bundles_post_ra>
// kernel: double_conv.7
= control target key start
LH: loop header
LB: loop body
LE: loop exit
PB: predicated region body
PF: predicated region fallthrough
CT: control target
= control target key end

     0   :  { %s893_s0 = inlined_call_operand.vmem [shape: f32[512,128], index: 0, kind: input, shape index: {}]   ;;  %s894_s1 = inlined_call_operand.vmem [shape: f32[1,128], index: 1, kind: input, shape index: {}]   ;;  %s895_s2 = inlined_call_operand.vmem [shape: f32[1,128], index: 2, kind: input, shape index: {}]   ;;  %s896_s3 = inlined_call_operand.vmem [shape: f32[512,128], index: 3, kind: output, shape index: {}]  }
   0x1   :  { %v14_v0 = vld [vmem:[%s893_s0] sm:$0xff]  ;;  %v15_v3 = vld [vmem:[%s893_s0 + $0x8] sm:$0xff]  ;;  %v16_v6 = vld [vmem:[%s893_s0 + $0x10] sm:$0xff] }
   0x2   :  { %v374_v1 = vld [vmem:[%s894_s1] ss:$0 sm:$0xff]  ;;  %v17_v7 = vld [vmem:[%s893_s0 + $0x18] sm:$0xff]  ;;  %v19_v12 = vld [vmem:[%s893_s0 + $0x28] sm:$0xff] }
   0x3   :  { %v379_v2 = vld [vmem:[%s895_s2] ss:$0 sm:$0xff]  ;;  %v82_v4 = vmul.f32 %v374_v1, %v14_v0  ;;  %v83_v5 = vmul.f32 %v374_v1, %v15_v3  ;;  %v84_v9 = vmul.f32 %v374_v1, %v16_v6  ;;  %v85_v10 = vmul.f32 %v374_v1, %v17_v7  ;;  %v20_v13 = vld [vmem:[%s893_s0 + $0x30] sm:$0xff]  ;;  %v21_v14 = vld [vmem:[%s893_s0 + $0x38] sm:$0xff] }
   0x4   :  { %v18_v8 = vld [vmem:[%s893_s0 + $0x20] sm:$0xff]  ;;  %v87_v17 = vmul.f32 %v374_v1, %v19_v12  ;;  %v88_v18 = vmul.f32 %v374_v1, %v20_v13  ;;  %v89_v22 = vmul.f32 %v374_v1, %v21_v14  ;;  %v23_v24 = vld [vmem:[%s893_s0 + $0x48] sm:$0xff]  ;;  %v24_v29 = vld [vmem:[%s893_s0 + $0x50] sm:$0xff] }
   0x5   :  { %v86_v11 = vmul.f32 %v374_v1, %v18_v8  ;;  %v150_v15 = vadd.f32 %v379_v2, %v82_v4  ;;  %v151_v16 = vadd.f32 %v379_v2, %v83_v5  ;;  %v152_v19 = vadd.f32 %v379_v2, %v84_v9  ;;  %v22_v23 = vld [vmem:[%s893_s0 + $0x40] sm:$0xff]  ;;  %v25_v30 = vld [vmem:[%s893_s0 + $0x58] sm:$0xff]  ;;  %v27_v35 = vld [vmem:[%s893_s0 + $0x68] sm:$0xff] }
   0x6   :  { %v153_v20 = vadd.f32 %v379_v2, %v85_v10  ;;  %v155_v27 = vadd.f32 %v379_v2, %v87_v17  ;;  %v156_v28 = vadd.f32 %v379_v2, %v88_v18  ;;  %v26_v31 = vld [vmem:[%s893_s0 + $0x60] sm:$0xff]  ;;  %v157_v34 = vadd.f32 %v379_v2, %v89_v22  ;;  %v28_v36 = vld [vmem:[%s893_s0 + $0x70] sm:$0xff]  ;;  %v29_v41 = vld [vmem:[%s893_s0 + $0x78] sm:$0xff] }
   0x7   :  { %v154_v21 = vadd.f32 %v379_v2, %v86_v11  ;;  %v214_v25 = vmax.f32 %v150_v15, 0.0  ;;  %v215_v26 = vmax.f32 %v151_v16, 0.0  ;;  %v216_v32 = vmax.f32 %v152_v19, 0.0  ;;  %v30_v54 = vld [vmem:[%s893_s0 + $0x80] sm:$0xff]  ;;  %v31_v55 = vld [vmem:[%s893_s0 + $0x88] sm:$0xff]  ;;  %v32_v58 = vld [vmem:[%s893_s0 + $0x90] sm:$0xff] }
   0x8   :  { %v217_v33 = vmax.f32 %v153_v20, 0.0  ;;  %v219_v38 = vmax.f32 %v155_v27, 0.0  ;;  %v90_v39 = vmul.f32 %v374_v1, %v22_v23  ;;  %v91_v40 = vmul.f32 %v374_v1, %v23_v24  ;;  %v33_v59 = vld [vmem:[%s893_s0 + $0x98] sm:$0xff]  ;;  %v34_v62 = vld [vmem:[%s893_s0 + $0xa0] sm:$0xff]  ;;  %v35_v5 = vld [vmem:[%s893_s0 + $0xa8] sm:$0xff] }
   0x9   :  { %278 = vst [vmem:[%s896_s3] sm:$0xff] %v214_v25  ;;  %v218_v37 = vmax.f32 %v154_v21, 0.0  ;;  %v220_v42 = vmax.f32 %v156_v28, 0.0  ;;  %v92_v43 = vmul.f32 %v374_v1, %v24_v29  ;;  %v93_v44 = vmul.f32 %v374_v1, %v25_v30  ;;  %v36_v10 = vld [vmem:[%s893_s0 + $0xb0] sm:$0xff]  ;;  %v37_v14 = vld [vmem:[%s893_s0 + $0xb8] sm:$0xff]  ;;  %v38_v18 = vld [vmem:[%s893_s0 + $0xc0] sm:$0xff] }
   0xa   :  { %279 = vst [vmem:[%s896_s3 + $0x8] sm:$0xff] %v215_v26  ;;  %v94_v45 = vmul.f32 %v374_v1, %v26_v31  ;;  %v158_v46 = vadd.f32 %v379_v2, %v90_v39  ;;  %v159_v47 = vadd.f32 %v379_v2, %v91_v40  ;;  %v95_v48 = vmul.f32 %v374_v1, %v27_v35  ;;  %v39_v22 = vld [vmem:[%s893_s0 + $0xc8] sm:$0xff]  ;;  %v40_v26 = vld [vmem:[%s893_s0 + $0xd0] sm:$0xff]  ;;  %v41_v30 = vld [vmem:[%s893_s0 + $0xd8] sm:$0xff] }
   0xb   :  { %280 = vst [vmem:[%s896_s3 + $0x10] sm:$0xff] %v216_v32  ;;  %v96_v49 = vmul.f32 %v374_v1, %v28_v36  ;;  %v221_v50 = vmax.f32 %v157_v34, 0.0  ;;  %v160_v51 = vadd.f32 %v379_v2, %v92_v43  ;;  %v161_v52 = vadd.f32 %v379_v2, %v93_v44  ;;  %v42_v34 = vld [vmem:[%s893_s0 + $0xe0] sm:$0xff] }
   0xc   :  { %281 = vst [vmem:[%s896_s3 + $0x18] sm:$0xff] %v217_v33  ;;  %v97_v53 = vmul.f32 %v374_v1, %v29_v41  ;;  %v222_v56 = vmax.f32 %v158_v46, 0.0  ;;  %v162_v57 = vadd.f32 %v379_v2, %v94_v45  ;;  %v223_v60 = vmax.f32 %v159_v47, 0.0  ;;  %v45_v46 = vld [vmem:[%s893_s0 + $0xf8] sm:$0xff] }
   0xd   :  { %282 = vst [vmem:[%s896_s3 + $0x20] sm:$0xff] %v218_v37  ;;  %v163_v61 = vadd.f32 %v379_v2, %v95_v48  ;;  %v224_v63 = vmax.f32 %v160_v51, 0.0  ;;  %v164_v0 = vadd.f32 %v379_v2, %v96_v49  ;;  %v98_v3 = vmul.f32 %v374_v1, %v30_v54  ;;  %v47_v54 = vld [vmem:[%s893_s0 + $0x108] sm:$0xff] }
   0xe   :  { %283 = vst [vmem:[%s896_s3 + $0x28] sm:$0xff] %v219_v38  ;;  %v99_v4 = vmul.f32 %v374_v1, %v31_v55  ;;  %v225_v6 = vmax.f32 %v161_v52, 0.0  ;;  %v165_v7 = vadd.f32 %v379_v2, %v97_v53  ;;  %v100_v8 = vmul.f32 %v374_v1, %v32_v58  ;;  %v43_v38 = vld [vmem:[%s893_s0 + $0xe8] sm:$0xff]  ;;  %v48_v58 = vld [vmem:[%s893_s0 + $0x110] sm:$0xff] }
   0xf   :  { %284 = vst [vmem:[%s896_s3 + $0x30] sm:$0xff] %v220_v42  ;;  %v101_v9 = vmul.f32 %v374_v1, %v33_v59  ;;  %v226_v11 = vmax.f32 %v162_v57, 0.0  ;;  %v166_v12 = vadd.f32 %v379_v2, %v98_v3  ;;  %v102_v13 = vmul.f32 %v374_v1, %v34_v62  ;;  %v44_v42 = vld [vmem:[%s893_s0 + $0xf0] sm:$0xff]  ;;  %v49_v62 = vld [vmem:[%s893_s0 + $0x118] sm:$0xff] }
  0x10   :  { %285 = vst [vmem:[%s896_s3 + $0x38] sm:$0xff] %v221_v50  ;;  %v227_v15 = vmax.f32 %v163_v61, 0.0  ;;  %v167_v16 = vadd.f32 %v379_v2, %v99_v4  ;;  %v103_v17 = vmul.f32 %v374_v1, %v35_v5  ;;  %v228_v19 = vmax.f32 %v164_v0, 0.0  ;;  %v46_v50 = vld [vmem:[%s893_s0 + $0x100] sm:$0xff] }
  0x11   :  { %286 = vst [vmem:[%s896_s3 + $0x40] sm:$0xff] %v222_v56  ;;  %v168_v20 = vadd.f32 %v379_v2, %v100_v8  ;;  %v104_v21 = vmul.f32 %v374_v1, %v36_v10  ;;  %v229_v23 = vmax.f32 %v165_v7, 0.0  ;;  %v169_v24 = vadd.f32 %v379_v2, %v101_v9  ;;  %v50_v4 = vld [vmem:[%s893_s0 + $0x120] sm:$0xff]  ;;  %v51_v8 = vld [vmem:[%s893_s0 + $0x128] sm:$0xff] }
  0x12   :  { %287 = vst [vmem:[%s896_s3 + $0x48] sm:$0xff] %v223_v60  ;;  %v105_v25 = vmul.f32 %v374_v1, %v37_v14  ;;  %v230_v27 = vmax.f32 %v166_v12, 0.0  ;;  %v170_v28 = vadd.f32 %v379_v2, %v102_v13  ;;  %v106_v29 = vmul.f32 %v374_v1, %v38_v18  ;;  %v52_v12 = vld [vmem:[%s893_s0 + $0x130] sm:$0xff] }
  0x13   :  { %288 = vst [vmem:[%s896_s3 + $0x50] sm:$0xff] %v224_v63  ;;  %v231_v31 = vmax.f32 %v167_v16, 0.0  ;;  %v171_v32 = vadd.f32 %v379_v2, %v103_v17  ;;  %v107_v33 = vmul.f32 %v374_v1, %v39_v22  ;;  %v232_v35 = vmax.f32 %v168_v20, 0.0  ;;  %v53_v16 = vld [vmem:[%s893_s0 + $0x138] sm:$0xff]  ;;  %v54_v20 = vld [vmem:[%s893_s0 + $0x140] sm:$0xff] }
  0x14   :  { %289 = vst [vmem:[%s896_s3 + $0x58] sm:$0xff] %v225_v6  ;;  %v172_v36 = vadd.f32 %v379_v2, %v104_v21  ;;  %v108_v37 = vmul.f32 %v374_v1, %v40_v26  ;;  %v233_v39 = vmax.f32 %v169_v24, 0.0  ;;  %v173_v40 = vadd.f32 %v379_v2, %v105_v25  ;;  %v55_v24 = vld [vmem:[%s893_s0 + $0x148] sm:$0xff] }
  0x15   :  { %290 = vst [vmem:[%s896_s3 + $0x60] sm:$0xff] %v226_v11  ;;  %v109_v41 = vmul.f32 %v374_v1, %v41_v30  ;;  %v234_v43 = vmax.f32 %v170_v28, 0.0  ;;  %v174_v44 = vadd.f32 %v379_v2, %v106_v29  ;;  %v110_v45 = vmul.f32 %v374_v1, %v42_v34  ;;  %v56_v28 = vld [vmem:[%s893_s0 + $0x150] sm:$0xff] }
  0x16   :  { %291 = vst [vmem:[%s896_s3 + $0x68] sm:$0xff] %v227_v15  ;;  %v235_v47 = vmax.f32 %v171_v32, 0.0  ;;  %v175_v48 = vadd.f32 %v379_v2, %v107_v33  ;;  %v111_v49 = vmul.f32 %v374_v1, %v43_v38  ;;  %v236_v51 = vmax.f32 %v172_v36, 0.0  ;;  %v57_v32 = vld [vmem:[%s893_s0 + $0x158] sm:$0xff]  ;;  %v58_v36 = vld [vmem:[%s893_s0 + $0x160] sm:$0xff] }
  0x17   :  { %292 = vst [vmem:[%s896_s3 + $0x70] sm:$0xff] %v228_v19  ;;  %v176_v52 = vadd.f32 %v379_v2, %v108_v37  ;;  %v112_v53 = vmul.f32 %v374_v1, %v44_v42  ;;  %v237_v55 = vmax.f32 %v173_v40, 0.0  ;;  %v177_v56 = vadd.f32 %v379_v2, %v109_v41  ;;  %v59_v40 = vld [vmem:[%s893_s0 + $0x168] sm:$0xff] }
  0x18   :  { %293 = vst [vmem:[%s896_s3 + $0x78] sm:$0xff] %v229_v23  ;;  %v113_v57 = vmul.f32 %v374_v1, %v45_v46  ;;  %v238_v59 = vmax.f32 %v174_v44, 0.0  ;;  %v178_v60 = vadd.f32 %v379_v2, %v110_v45  ;;  %v114_v61 = vmul.f32 %v374_v1, %v46_v50  ;;  %v60_v44 = vld [vmem:[%s893_s0 + $0x170] sm:$0xff] }
  0x19   :  { %294 = vst [vmem:[%s896_s3 + $0x80] sm:$0xff] %v230_v27  ;;  %v239_v63 = vmax.f32 %v175_v48, 0.0  ;;  %v179_v0 = vadd.f32 %v379_v2, %v111_v49  ;;  %v115_v3 = vmul.f32 %v374_v1, %v47_v54  ;;  %v240_v5 = vmax.f32 %v176_v52, 0.0  ;;  %v61_v48 = vld [vmem:[%s893_s0 + $0x178] sm:$0xff]  ;;  %v62_v52 = vld [vmem:[%s893_s0 + $0x180] sm:$0xff] }
  0x1a   :  { %295 = vst [vmem:[%s896_s3 + $0x88] sm:$0xff] %v231_v31  ;;  %v180_v6 = vadd.f32 %v379_v2, %v112_v53  ;;  %v116_v7 = vmul.f32 %v374_v1, %v48_v58  ;;  %v241_v9 = vmax.f32 %v177_v56, 0.0  ;;  %v181_v10 = vadd.f32 %v379_v2, %v113_v57  ;;  %v63_v56 = vld [vmem:[%s893_s0 + $0x188] sm:$0xff] }
  0x1b   :  { %296 = vst [vmem:[%s896_s3 + $0x90] sm:$0xff] %v232_v35  ;;  %v117_v11 = vmul.f32 %v374_v1, %v49_v62  ;;  %v242_v13 = vmax.f32 %v178_v60, 0.0  ;;  %v182_v14 = vadd.f32 %v379_v2, %v114_v61  ;;  %v118_v15 = vmul.f32 %v374_v1, %v50_v4  ;;  %v64_v60 = vld [vmem:[%s893_s0 + $0x190] sm:$0xff] }
  0x1c   :  { %297 = vst [vmem:[%s896_s3 + $0x98] sm:$0xff] %v233_v39  ;;  %v243_v17 = vmax.f32 %v179_v0, 0.0  ;;  %v183_v18 = vadd.f32 %v379_v2, %v115_v3  ;;  %v119_v19 = vmul.f32 %v374_v1, %v51_v8  ;;  %v244_v21 = vmax.f32 %v180_v6, 0.0  ;;  %v65_v0 = vld [vmem:[%s893_s0 + $0x198] sm:$0xff] }
  0x1d   :  { %298 = vst [vmem:[%s896_s3 + $0xa0] sm:$0xff] %v234_v43  ;;  %v184_v22 = vadd.f32 %v379_v2, %v116_v7  ;;  %v120_v23 = vmul.f32 %v374_v1, %v52_v12  ;;  %v245_v25 = vmax.f32 %v181_v10, 0.0  ;;  %v185_v26 = vadd.f32 %v379_v2, %v117_v11  ;;  %v77_v3 = vld [vmem:[%s893_s0 + $0x1f8] sm:$0xff]  ;;  %v66_v7 = vld [vmem:[%s893_s0 + $0x1a0] sm:$0xff]  ;;  %v67_v11 = vld [vmem:[%s893_s0 + $0x1a8] sm:$0xff] }
  0x1e   :  { %299 = vst [vmem:[%s896_s3 + $0xa8] sm:$0xff] %v235_v47  ;;  %v121_v27 = vmul.f32 %v374_v1, %v53_v16  ;;  %v246_v29 = vmax.f32 %v182_v14, 0.0  ;;  %v186_v30 = vadd.f32 %v379_v2, %v118_v15  ;;  %v122_v31 = vmul.f32 %v374_v1, %v54_v20  ;;  %v68_v15 = vld [vmem:[%s893_s0 + $0x1b0] sm:$0xff]  ;;  %v69_v20 = vld [vmem:[%s893_s0 + $0x1b8] sm:$0xff] }
  0x1f   :  { %300 = vst [vmem:[%s896_s3 + $0xb0] sm:$0xff] %v236_v51  ;;  %v247_v33 = vmax.f32 %v183_v18, 0.0  ;;  %v187_v34 = vadd.f32 %v379_v2, %v119_v19  ;;  %v123_v35 = vmul.f32 %v374_v1, %v55_v24  ;;  %v248_v37 = vmax.f32 %v184_v22, 0.0  ;;  %v70_v24 = vld [vmem:[%s893_s0 + $0x1c0] sm:$0xff] }
  0x20   :  { %301 = vst [vmem:[%s896_s3 + $0xb8] sm:$0xff] %v237_v55  ;;  %v188_v38 = vadd.f32 %v379_v2, %v120_v23  ;;  %v124_v39 = vmul.f32 %v374_v1, %v56_v28  ;;  %v249_v41 = vmax.f32 %v185_v26, 0.0  ;;  %v189_v42 = vadd.f32 %v379_v2, %v121_v27 }
  0x21   :  { %302 = vst [vmem:[%s896_s3 + $0xc0] sm:$0xff] %v238_v59  ;;  %v125_v43 = vmul.f32 %v374_v1, %v57_v32  ;;  %v250_v45 = vmax.f32 %v186_v30, 0.0  ;;  %v190_v46 = vadd.f32 %v379_v2, %v122_v31  ;;  %v126_v47 = vmul.f32 %v374_v1, %v58_v36 }
  0x22   :  { %303 = vst [vmem:[%s896_s3 + $0xc8] sm:$0xff] %v239_v63  ;;  %v251_v49 = vmax.f32 %v187_v34, 0.0  ;;  %v191_v50 = vadd.f32 %v379_v2, %v123_v35  ;;  %v127_v51 = vmul.f32 %v374_v1, %v59_v40  ;;  %v252_v53 = vmax.f32 %v188_v38, 0.0 }
  0x23   :  { %304 = vst [vmem:[%s896_s3 + $0xd0] sm:$0xff] %v240_v5  ;;  %v192_v54 = vadd.f32 %v379_v2, %v124_v39  ;;  %v128_v55 = vmul.f32 %v374_v1, %v60_v44  ;;  %v253_v57 = vmax.f32 %v189_v42, 0.0  ;;  %v193_v58 = vadd.f32 %v379_v2, %v125_v43 }
  0x24   :  { %305 = vst [vmem:[%s896_s3 + $0xd8] sm:$0xff] %v241_v9  ;;  %v129_v59 = vmul.f32 %v374_v1, %v61_v48  ;;  %v254_v61 = vmax.f32 %v190_v46, 0.0  ;;  %v194_v62 = vadd.f32 %v379_v2, %v126_v47  ;;  %v130_v63 = vmul.f32 %v374_v1, %v62_v52 }
  0x25   :  { %306 = vst [vmem:[%s896_s3 + $0xe0] sm:$0xff] %v242_v13  ;;  %v255_v4 = vmax.f32 %v191_v50, 0.0  ;;  %v195_v5 = vadd.f32 %v379_v2, %v127_v51  ;;  %v131_v6 = vmul.f32 %v374_v1, %v63_v56  ;;  %v256_v8 = vmax.f32 %v192_v54, 0.0 }
  0x26   :  { %307 = vst [vmem:[%s896_s3 + $0xe8] sm:$0xff] %v243_v17  ;;  %v196_v9 = vadd.f32 %v379_v2, %v128_v55  ;;  %v132_v10 = vmul.f32 %v374_v1, %v64_v60  ;;  %v257_v12 = vmax.f32 %v193_v58, 0.0  ;;  %v197_v13 = vadd.f32 %v379_v2, %v129_v59 }
  0x27   :  { %308 = vst [vmem:[%s896_s3 + $0xf0] sm:$0xff] %v244_v21  ;;  %v133_v14 = vmul.f32 %v374_v1, %v65_v0  ;;  %v145_v16 = vmul.f32 %v374_v1, %v77_v3  ;;  %v258_v17 = vmax.f32 %v194_v62, 0.0  ;;  %v198_v18 = vadd.f32 %v379_v2, %v130_v63 }
  0x28   :  { %309 = vst [vmem:[%s896_s3 + $0xf8] sm:$0xff] %v245_v25  ;;  %v134_v19 = vmul.f32 %v374_v1, %v66_v7  ;;  %v259_v21 = vmax.f32 %v195_v5, 0.0  ;;  %v199_v22 = vadd.f32 %v379_v2, %v131_v6  ;;  %v135_v23 = vmul.f32 %v374_v1, %v67_v11 }
  0x29   :  { %310 = vst [vmem:[%s896_s3 + $0x100] sm:$0xff] %v246_v29  ;;  %v784_v25 = vadd.f32 %v379_v2, %v145_v16  ;;  %v260_v26 = vmax.f32 %v196_v9, 0.0  ;;  %v200_v27 = vadd.f32 %v379_v2, %v132_v10  ;;  %v136_v28 = vmul.f32 %v374_v1, %v68_v15  ;;  %v71_v29 = vld [vmem:[%s893_s0 + $0x1c8] sm:$0xff] }
  0x2a   :  { %311 = vst [vmem:[%s896_s3 + $0x108] sm:$0xff] %v247_v33  ;;  %v261_v30 = vmax.f32 %v197_v13, 0.0  ;;  %v201_v31 = vadd.f32 %v379_v2, %v133_v14  ;;  %v137_v32 = vmul.f32 %v374_v1, %v69_v20  ;;  %v72_v33 = vld [vmem:[%s893_s0 + $0x1d0] sm:$0xff]  ;;  %v262_v34 = vmax.f32 %v198_v18, 0.0 }
  0x2b   :  { %312 = vst [vmem:[%s896_s3 + $0x110] sm:$0xff] %v248_v37  ;;  %v202_v35 = vadd.f32 %v379_v2, %v134_v19  ;;  %v138_v36 = vmul.f32 %v374_v1, %v70_v24  ;;  %v73_v37 = vld [vmem:[%s893_s0 + $0x1d8] sm:$0xff]  ;;  %v263_v38 = vmax.f32 %v199_v22, 0.0  ;;  %v203_v39 = vadd.f32 %v379_v2, %v135_v23 }
  0x2c   :  { %313 = vst [vmem:[%s896_s3 + $0x118] sm:$0xff] %v249_v41  ;;  %v139_v40 = vmul.f32 %v374_v1, %v71_v29  ;;  %v74_v41 = vld [vmem:[%s893_s0 + $0x1e0] sm:$0xff]  ;;  %v264_v42 = vmax.f32 %v200_v27, 0.0  ;;  %v204_v43 = vadd.f32 %v379_v2, %v136_v28  ;;  %v140_v44 = vmul.f32 %v374_v1, %v72_v33 }
  0x2d   :  { %314 = vst [vmem:[%s896_s3 + $0x120] sm:$0xff] %v250_v45  ;;  %v75_v45 = vld [vmem:[%s893_s0 + $0x1e8] sm:$0xff]  ;;  %v265_v46 = vmax.f32 %v201_v31, 0.0  ;;  %v205_v47 = vadd.f32 %v379_v2, %v137_v32  ;;  %v141_v48 = vmul.f32 %v374_v1, %v73_v37  ;;  %v266_v50 = vmax.f32 %v202_v35, 0.0 }
  0x2e   :  { %315 = vst [vmem:[%s896_s3 + $0x128] sm:$0xff] %v251_v49  ;;  %v76_v49 = vld [vmem:[%s893_s0 + $0x1f0] sm:$0xff]  ;;  %v206_v51 = vadd.f32 %v379_v2, %v138_v36  ;;  %v142_v52 = vmul.f32 %v374_v1, %v74_v41  ;;  %v207_v54 = vadd.f32 %v379_v2, %v139_v40  ;;  %v143_v55 = vmul.f32 %v374_v1, %v75_v45 }
  0x2f   :  { %316 = vst [vmem:[%s896_s3 + $0x130] sm:$0xff] %v252_v53  ;;  %v267_v53 = vmax.f32 %v203_v39, 0.0  ;;  %v268_v56 = vmax.f32 %v204_v43, 0.0  ;;  %v144_v58 = vmul.f32 %v374_v1, %v76_v49  ;;  %v269_v59 = vmax.f32 %v205_v47, 0.0 }
  0x30   :  { %317 = vst [vmem:[%s896_s3 + $0x138] sm:$0xff] %v253_v57  ;;  %v208_v57 = vadd.f32 %v379_v2, %v140_v44  ;;  %v209_v60 = vadd.f32 %v379_v2, %v141_v48  ;;  %v210_v62 = vadd.f32 %v379_v2, %v142_v52  ;;  %v271_v63 = vmax.f32 %v207_v54, 0.0 }
  0x31   :  { %318 = vst [vmem:[%s896_s3 + $0x140] sm:$0xff] %v254_v61  ;;  %v270_v61 = vmax.f32 %v206_v51, 0.0  ;;  %v211_v1 = vadd.f32 %v379_v2, %v143_v55  ;;  %v212_v3 = vadd.f32 %v379_v2, %v144_v58  ;;  %v277_v7 = vmax.f32 %v784_v25, 0.0 }
  0x32   :  { %319 = vst [vmem:[%s896_s3 + $0x148] sm:$0xff] %v255_v4  ;;  %v272_v0 = vmax.f32 %v208_v57, 0.0  ;;  %v273_v4 = vmax.f32 %v209_v60, 0.0  ;;  %v274_v5 = vmax.f32 %v210_v62, 0.0 }
  0x33   :  { %320 = vst [vmem:[%s896_s3 + $0x150] sm:$0xff] %v256_v8  ;;  %v275_v6 = vmax.f32 %v211_v1, 0.0  ;;  %v276_v2 = vmax.f32 %v212_v3, 0.0 }
  0x34   :  { %321 = vst [vmem:[%s896_s3 + $0x158] sm:$0xff] %v257_v12 }
  0x35   :  { %322 = vst [vmem:[%s896_s3 + $0x160] sm:$0xff] %v258_v17 }
  0x36   :  { %323 = vst [vmem:[%s896_s3 + $0x168] sm:$0xff] %v259_v21 }
  0x37   :  { %324 = vst [vmem:[%s896_s3 + $0x170] sm:$0xff] %v260_v26 }
  0x38   :  { %325 = vst [vmem:[%s896_s3 + $0x178] sm:$0xff] %v261_v30 }
  0x39   :  { %326 = vst [vmem:[%s896_s3 + $0x180] sm:$0xff] %v262_v34 }
  0x3a   :  { %327 = vst [vmem:[%s896_s3 + $0x188] sm:$0xff] %v263_v38 }
  0x3b   :  { %328 = vst [vmem:[%s896_s3 + $0x190] sm:$0xff] %v264_v42 }
  0x3c   :  { %329 = vst [vmem:[%s896_s3 + $0x198] sm:$0xff] %v265_v46 }
  0x3d   :  { %330 = vst [vmem:[%s896_s3 + $0x1a0] sm:$0xff] %v266_v50 }
  0x3e   :  { %331 = vst [vmem:[%s896_s3 + $0x1a8] sm:$0xff] %v267_v53 }
  0x3f   :  { %332 = vst [vmem:[%s896_s3 + $0x1b0] sm:$0xff] %v268_v56 }
  0x40   :  { %333 = vst [vmem:[%s896_s3 + $0x1b8] sm:$0xff] %v269_v59 }
  0x41   :  { %334 = vst [vmem:[%s896_s3 + $0x1c0] sm:$0xff] %v270_v61 }
  0x42   :  { %335 = vst [vmem:[%s896_s3 + $0x1c8] sm:$0xff] %v271_v63 }
  0x43   :  { %336 = vst [vmem:[%s896_s3 + $0x1d0] sm:$0xff] %v272_v0 }
  0x44   :  { %337 = vst [vmem:[%s896_s3 + $0x1d8] sm:$0xff] %v273_v4 }
  0x45   :  { %338 = vst [vmem:[%s896_s3 + $0x1e0] sm:$0xff] %v274_v5 }
  0x46   :  { %339 = vst [vmem:[%s896_s3 + $0x1e8] sm:$0xff] %v275_v6 }
  0x47   :  { %340 = vst [vmem:[%s896_s3 + $0x1f0] sm:$0xff] %v276_v2 }
  0x48   :  { %341 = vst [vmem:[%s896_s3 + $0x1f8] sm:$0xff] %v277_v7 }

// kernel: double_conv.5
= control target key start
LH: loop header
LB: loop body
LE: loop exit
PB: predicated region body
PF: predicated region fallthrough
CT: control target
= control target key end

     0   :  { %s1049_s0 = inlined_call_operand.vmem [shape: f32[512,128], index: 0, kind: input, shape index: {}]   ;;  %s1050_s1 = inlined_call_operand.vmem [shape: f32[1,128], index: 1, kind: input, shape index: {}]   ;;  %s1051_s2 = inlined_call_operand.vmem [shape: f32[1,128], index: 2, kind: input, shape index: {}]   ;;  %s1052_s3 = inlined_call_operand.vmem [shape: bf16[512,128], index: 3, kind: output, shape index: {}]  }
   0x1   :  { %v14_v0 = vld [vmem:[%s1049_s0] sm:$0xff]  ;;  %v15_v1 = vld [vmem:[%s1049_s0 + $0x8] sm:$0xff]  ;;  %v16_v4 = vld [vmem:[%s1049_s0 + $0x10] sm:$0xff] }
   0x2   :  { %v632_v2 = vld [vmem:[%s1050_s1] ss:$0 sm:$0xff]  ;;  %v17_v5 = vld [vmem:[%s1049_s0 + $0x18] sm:$0xff]  ;;  %v19_v11 = vld [vmem:[%s1049_s0 + $0x28] sm:$0xff] }
   0x3   :  { %v637_v3 = vld [vmem:[%s1051_s2] ss:$0 sm:$0xff]  ;;  %v82_v7 = vmul.f32 %v632_v2, %v14_v0  ;;  %v83_v8 = vmul.f32 %v632_v2, %v15_v1  ;;  %v84_v9 = vmul.f32 %v632_v2, %v16_v4  ;;  %v85_v10 = vmul.f32 %v632_v2, %v17_v5  ;;  %v20_v12 = vld [vmem:[%s1049_s0 + $0x30] sm:$0xff]  ;;  %v21_v13 = vld [vmem:[%s1049_s0 + $0x38] sm:$0xff] }
   0x4   :  { %v18_v6 = vld [vmem:[%s1049_s0 + $0x20] sm:$0xff]  ;;  %v87_v15 = vmul.f32 %v632_v2, %v19_v11  ;;  %v88_v16 = vmul.f32 %v632_v2, %v20_v12  ;;  %v89_v17 = vmul.f32 %v632_v2, %v21_v13  ;;  %v23_v27 = vld [vmem:[%s1049_s0 + $0x48] sm:$0xff]  ;;  %v24_v32 = vld [vmem:[%s1049_s0 + $0x50] sm:$0xff] }
   0x5   :  { %v86_v14 = vmul.f32 %v632_v2, %v18_v6  ;;  %v150_v18 = vadd.f32 %v637_v3, %v82_v7  ;;  %v151_v19 = vadd.f32 %v637_v3, %v83_v8  ;;  %v152_v20 = vadd.f32 %v637_v3, %v84_v9  ;;  %v22_v26 = vld [vmem:[%s1049_s0 + $0x40] sm:$0xff]  ;;  %v25_v33 = vld [vmem:[%s1049_s0 + $0x58] sm:$0xff]  ;;  %v27_v39 = vld [vmem:[%s1049_s0 + $0x68] sm:$0xff] }
   0x6   :  { %v153_v21 = vadd.f32 %v637_v3, %v85_v10  ;;  %v155_v23 = vadd.f32 %v637_v3, %v87_v15  ;;  %v156_v24 = vadd.f32 %v637_v3, %v88_v16  ;;  %v157_v25 = vadd.f32 %v637_v3, %v89_v17  ;;  %v26_v38 = vld [vmem:[%s1049_s0 + $0x60] sm:$0xff]  ;;  %v28_v44 = vld [vmem:[%s1049_s0 + $0x70] sm:$0xff]  ;;  %v29_v45 = vld [vmem:[%s1049_s0 + $0x78] sm:$0xff] }
   0x7   :  { %v154_v22 = vadd.f32 %v637_v3, %v86_v14  ;;  %v214_v28 = vmax.f32 %v150_v18, 0.0  ;;  %v215_v29 = vmax.f32 %v151_v19, 0.0  ;;  %v216_v30 = vmax.f32 %v152_v20, 0.0  ;;  %v30_v58 = vld [vmem:[%s1049_s0 + $0x80] sm:$0xff]  ;;  %v31_v63 = vld [vmem:[%s1049_s0 + $0x88] sm:$0xff]  ;;  %v32_v6 = vld [vmem:[%s1049_s0 + $0x90] sm:$0xff] }
   0x8   :  { %v217_v31 = vmax.f32 %v153_v21, 0.0  ;;  %v219_v35 = vmax.f32 %v155_v23, 0.0  ;;  %v220_v36 = vmax.f32 %v156_v24, 0.0  ;;  %v221_v37 = vmax.f32 %v157_v25, 0.0  ;;  %v33_v7 = vld [vmem:[%s1049_s0 + $0x98] sm:$0xff]  ;;  %v34_v12 = vld [vmem:[%s1049_s0 + $0xa0] sm:$0xff] }
   0x9   :  { %v218_v34 = vmax.f32 %v154_v22, 0.0  ;;  %v413_v40 = vpack.c.bf16 %v215_v29, %v214_v28  ;;  %v90_v42 = vmul.f32 %v632_v2, %v22_v26  ;;  %v91_v43 = vmul.f32 %v632_v2, %v23_v27  ;;  %v35_v13 = vld [vmem:[%s1049_s0 + $0xa8] sm:$0xff]  ;;  %v36_v18 = vld [vmem:[%s1049_s0 + $0xb0] sm:$0xff]  ;;  %v37_v23 = vld [vmem:[%s1049_s0 + $0xb8] sm:$0xff] }
   0xa   :  { %v418_v41 = vpack.c.bf16 %v217_v31, %v216_v30  ;;  %v428_v47 = vpack.c.bf16 %v221_v37, %v220_v36  ;;  %v92_v48 = vmul.f32 %v632_v2, %v24_v32  ;;  %v93_v49 = vmul.f32 %v632_v2, %v25_v33  ;;  %v38_v28 = vld [vmem:[%s1049_s0 + $0xc0] sm:$0xff]  ;;  %v39_v37 = vld [vmem:[%s1049_s0 + $0xc8] sm:$0xff] }
   0xb   :  { %v423_v46 = vpack.c.bf16 %v219_v35, %v218_v34  ;;  %414 = vst [vmem:[%s1052_s3] sm:$0xff] %v413_v40   ;;  %v158_v50 = vadd.f32 %v637_v3, %v90_v42  ;;  %v159_v51 = vadd.f32 %v637_v3, %v91_v43  ;;  %v94_v52 = vmul.f32 %v632_v2, %v26_v38  ;;  %v40_v42 = vld [vmem:[%s1049_s0 + $0xd0] sm:$0xff]  ;;  %v41_v43 = vld [vmem:[%s1049_s0 + $0xd8] sm:$0xff] }
   0xc   :  { %v95_v53 = vmul.f32 %v632_v2, %v27_v39  ;;  %570 = vst [vmem:[%s1052_s3 + $0x8] sm:$0xff] %v418_v41   ;;  %v160_v54 = vadd.f32 %v637_v3, %v92_v48  ;;  %v161_v55 = vadd.f32 %v637_v3, %v93_v49  ;;  %v96_v56 = vmul.f32 %v632_v2, %v28_v44  ;;  %v42_v48 = vld [vmem:[%s1049_s0 + $0xe0] sm:$0xff]  ;;  %v43_v49 = vld [vmem:[%s1049_s0 + $0xe8] sm:$0xff] }
   0xd   :  { %v97_v57 = vmul.f32 %v632_v2, %v29_v45  ;;  %571 = vst [vmem:[%s1052_s3 + $0x10] sm:$0xff] %v423_v46   ;;  %v222_v59 = vmax.f32 %v158_v50, 0.0  ;;  %v223_v60 = vmax.f32 %v159_v51, 0.0  ;;  %v162_v61 = vadd.f32 %v637_v3, %v94_v52 }
   0xe   :  { %v163_v62 = vadd.f32 %v637_v3, %v95_v53  ;;  %572 = vst [vmem:[%s1052_s3 + $0x18] sm:$0xff] %v428_v47   ;;  %v224_v0 = vmax.f32 %v160_v54, 0.0  ;;  %v225_v1 = vmax.f32 %v161_v55, 0.0  ;;  %v164_v4 = vadd.f32 %v637_v3, %v96_v56  ;;  %v44_v54 = vld [vmem:[%s1049_s0 + $0xf0] sm:$0xff] }
   0xf   :  { %v165_v5 = vadd.f32 %v637_v3, %v97_v57  ;;  %v433_v8 = vpack.c.bf16 %v223_v60, %v222_v59  ;;  %v226_v9 = vmax.f32 %v162_v61, 0.0  ;;  %v98_v11 = vmul.f32 %v632_v2, %v30_v58  ;;  %v45_v59 = vld [vmem:[%s1049_s0 + $0xf8] sm:$0xff] }
  0x10   :  { %v227_v10 = vmax.f32 %v163_v62, 0.0  ;;  %v438_v14 = vpack.c.bf16 %v225_v1, %v224_v0  ;;  %v228_v15 = vmax.f32 %v164_v4, 0.0  ;;  %v99_v17 = vmul.f32 %v632_v2, %v31_v63  ;;  %v46_v0 = vld [vmem:[%s1049_s0 + $0x100] sm:$0xff] }
  0x11   :  { %v229_v16 = vmax.f32 %v165_v5, 0.0  ;;  %573 = vst [vmem:[%s1052_s3 + $0x20] sm:$0xff] %v433_v8   ;;  %v166_v20 = vadd.f32 %v637_v3, %v98_v11  ;;  %v100_v21 = vmul.f32 %v632_v2, %v32_v6  ;;  %v101_v22 = vmul.f32 %v632_v2, %v33_v7  ;;  %v47_v11 = vld [vmem:[%s1049_s0 + $0x108] sm:$0xff] }
  0x12   :  { %v443_v19 = vpack.c.bf16 %v227_v10, %v226_v9  ;;  %574 = vst [vmem:[%s1052_s3 + $0x28] sm:$0xff] %v438_v14   ;;  %v167_v25 = vadd.f32 %v637_v3, %v99_v17  ;;  %v102_v26 = vmul.f32 %v632_v2, %v34_v12  ;;  %v103_v27 = vmul.f32 %v632_v2, %v35_v13  ;;  %v49_v17 = vld [vmem:[%s1049_s0 + $0x118] sm:$0xff] }
  0x13   :  { %v448_v24 = vpack.c.bf16 %v229_v16, %v228_v15  ;;  %v230_v29 = vmax.f32 %v166_v20, 0.0  ;;  %v168_v30 = vadd.f32 %v637_v3, %v100_v21  ;;  %v169_v31 = vadd.f32 %v637_v3, %v101_v22  ;;  %v48_v16 = vld [vmem:[%s1049_s0 + $0x110] sm:$0xff]  ;;  %v50_v22 = vld [vmem:[%s1049_s0 + $0x120] sm:$0xff] }
  0x14   :  { %575 = vst [vmem:[%s1052_s3 + $0x30] sm:$0xff] %v443_v19   ;;  %v104_v32 = vmul.f32 %v632_v2, %v36_v18  ;;  %v231_v33 = vmax.f32 %v167_v25, 0.0  ;;  %v170_v34 = vadd.f32 %v637_v3, %v102_v26  ;;  %v171_v35 = vadd.f32 %v637_v3, %v103_v27 }
  0x15   :  { %576 = vst [vmem:[%s1052_s3 + $0x38] sm:$0xff] %v448_v24   ;;  %v105_v36 = vmul.f32 %v632_v2, %v37_v23  ;;  %v232_v38 = vmax.f32 %v168_v30, 0.0  ;;  %v233_v39 = vmax.f32 %v169_v31, 0.0  ;;  %v106_v41 = vmul.f32 %v632_v2, %v38_v28  ;;  %v51_v23 = vld [vmem:[%s1049_s0 + $0x128] sm:$0xff]  ;;  %v52_v28 = vld [vmem:[%s1049_s0 + $0x130] sm:$0xff] }
  0x16   :  { %v172_v40 = vadd.f32 %v637_v3, %v104_v32  ;;  %v453_v44 = vpack.c.bf16 %v231_v33, %v230_v29  ;;  %v234_v45 = vmax.f32 %v170_v34, 0.0  ;;  %v235_v46 = vmax.f32 %v171_v35, 0.0  ;;  %v53_v33 = vld [vmem:[%s1049_s0 + $0x138] sm:$0xff] }
  0x17   :  { %v173_v47 = vadd.f32 %v637_v3, %v105_v36  ;;  %v458_v50 = vpack.c.bf16 %v233_v39, %v232_v38  ;;  %v107_v52 = vmul.f32 %v632_v2, %v39_v37  ;;  %v174_v53 = vadd.f32 %v637_v3, %v106_v41  ;;  %v54_v38 = vld [vmem:[%s1049_s0 + $0x140] sm:$0xff] }
  0x18   :  { %v236_v51 = vmax.f32 %v172_v40, 0.0  ;;  %577 = vst [vmem:[%s1052_s3 + $0x40] sm:$0xff] %v453_v44   ;;  %v463_v55 = vpack.c.bf16 %v235_v46, %v234_v45  ;;  %v108_v57 = vmul.f32 %v632_v2, %v40_v42  ;;  %v109_v58 = vmul.f32 %v632_v2, %v41_v43 }
  0x19   :  { %v237_v56 = vmax.f32 %v173_v47, 0.0  ;;  %578 = vst [vmem:[%s1052_s3 + $0x48] sm:$0xff] %v458_v50   ;;  %v175_v60 = vadd.f32 %v637_v3, %v107_v52  ;;  %v238_v61 = vmax.f32 %v174_v53, 0.0  ;;  %v110_v62 = vmul.f32 %v632_v2, %v42_v48  ;;  %v55_v47 = vld [vmem:[%s1049_s0 + $0x148] sm:$0xff]  ;;  %v56_v52 = vld [vmem:[%s1049_s0 + $0x150] sm:$0xff]  ;;  %v57_v53 = vld [vmem:[%s1049_s0 + $0x158] sm:$0xff] }
  0x1a   :  { %v111_v63 = vmul.f32 %v632_v2, %v43_v49  ;;  %579 = vst [vmem:[%s1052_s3 + $0x50] sm:$0xff] %v463_v55   ;;  %v176_v4 = vadd.f32 %v637_v3, %v108_v57  ;;  %v177_v5 = vadd.f32 %v637_v3, %v109_v58  ;;  %v112_v6 = vmul.f32 %v632_v2, %v44_v54  ;;  %v58_v58 = vld [vmem:[%s1049_s0 + $0x160] sm:$0xff] }
  0x1b   :  { %v468_v1 = vpack.c.bf16 %v237_v56, %v236_v51  ;;  %v239_v7 = vmax.f32 %v175_v60, 0.0  ;;  %v178_v8 = vadd.f32 %v637_v3, %v110_v62  ;;  %v113_v10 = vmul.f32 %v632_v2, %v45_v59  ;;  %v59_v59 = vld [vmem:[%s1049_s0 + $0x168] sm:$0xff] }
  0x1c   :  { %v179_v9 = vadd.f32 %v637_v3, %v111_v63  ;;  %v240_v12 = vmax.f32 %v176_v4, 0.0  ;;  %v241_v13 = vmax.f32 %v177_v5, 0.0  ;;  %v180_v14 = vadd.f32 %v637_v3, %v112_v6 }
  0x1d   :  { %580 = vst [vmem:[%s1052_s3 + $0x58] sm:$0xff] %v468_v1   ;;  %v114_v15 = vmul.f32 %v632_v2, %v46_v0  ;;  %v473_v18 = vpack.c.bf16 %v239_v7, %v238_v61  ;;  %v242_v19 = vmax.f32 %v178_v8, 0.0  ;;  %v181_v21 = vadd.f32 %v637_v3, %v113_v10  ;;  %v60_v0 = vld [vmem:[%s1049_s0 + $0x170] sm:$0xff]  ;;  %v61_v7 = vld [vmem:[%s1049_s0 + $0x178] sm:$0xff] }
  0x1e   :  { %v243_v20 = vmax.f32 %v179_v9, 0.0  ;;  %v478_v24 = vpack.c.bf16 %v241_v13, %v240_v12  ;;  %v244_v25 = vmax.f32 %v180_v14, 0.0  ;;  %v115_v26 = vmul.f32 %v632_v2, %v47_v11  ;;  %v62_v12 = vld [vmem:[%s1049_s0 + $0x180] sm:$0xff] }
  0x1f   :  { %v182_v27 = vadd.f32 %v637_v3, %v114_v15  ;;  %581 = vst [vmem:[%s1052_s3 + $0x60] sm:$0xff] %v473_v18   ;;  %v245_v30 = vmax.f32 %v181_v21, 0.0  ;;  %v116_v31 = vmul.f32 %v632_v2, %v48_v16  ;;  %v117_v32 = vmul.f32 %v632_v2, %v49_v17  ;;  %v63_v21 = vld [vmem:[%s1049_s0 + $0x188] sm:$0xff] }
  0x20   :  { %v483_v29 = vpack.c.bf16 %v243_v20, %v242_v19  ;;  %582 = vst [vmem:[%s1052_s3 + $0x68] sm:$0xff] %v478_v24   ;;  %v183_v34 = vadd.f32 %v637_v3, %v115_v26  ;;  %v118_v36 = vmul.f32 %v632_v2, %v50_v22  ;;  %v119_v37 = vmul.f32 %v632_v2, %v51_v23  ;;  %v64_v26 = vld [vmem:[%s1049_s0 + $0x190] sm:$0xff] }
  0x21   :  { %v246_v35 = vmax.f32 %v182_v27, 0.0  ;;  %v488_v39 = vpack.c.bf16 %v245_v30, %v244_v25  ;;  %v184_v40 = vadd.f32 %v637_v3, %v116_v31  ;;  %v185_v41 = vadd.f32 %v637_v3, %v117_v32  ;;  %v65_v27 = vld [vmem:[%s1049_s0 + $0x198] sm:$0xff]  ;;  %v66_v32 = vld [vmem:[%s1049_s0 + $0x1a0] sm:$0xff] }
  0x22   :  { %583 = vst [vmem:[%s1052_s3 + $0x70] sm:$0xff] %v483_v29   ;;  %v120_v42 = vmul.f32 %v632_v2, %v52_v28  ;;  %v247_v43 = vmax.f32 %v183_v34, 0.0  ;;  %v186_v44 = vadd.f32 %v637_v3, %v118_v36  ;;  %v187_v45 = vadd.f32 %v637_v3, %v119_v37 }
  0x23   :  { %v121_v46 = vmul.f32 %v632_v2, %v53_v33  ;;  %584 = vst [vmem:[%s1052_s3 + $0x78] sm:$0xff] %v488_v39   ;;  %v248_v48 = vmax.f32 %v184_v40, 0.0  ;;  %v249_v49 = vmax.f32 %v185_v41, 0.0  ;;  %v122_v51 = vmul.f32 %v632_v2, %v54_v38  ;;  %v67_v33 = vld [vmem:[%s1049_s0 + $0x1a8] sm:$0xff]  ;;  %v68_v38 = vld [vmem:[%s1049_s0 + $0x1b0] sm:$0xff] }
  0x24   :  { %v188_v50 = vadd.f32 %v637_v3, %v120_v42  ;;  %v493_v54 = vpack.c.bf16 %v247_v43, %v246_v35  ;;  %v250_v55 = vmax.f32 %v186_v44, 0.0  ;;  %v251_v56 = vmax.f32 %v187_v45, 0.0  ;;  %v69_v43 = vld [vmem:[%s1049_s0 + $0x1b8] sm:$0xff] }
  0x25   :  { %v189_v57 = vadd.f32 %v637_v3, %v121_v46  ;;  %v498_v60 = vpack.c.bf16 %v249_v49, %v248_v48  ;;  %v123_v62 = vmul.f32 %v632_v2, %v55_v47  ;;  %v190_v63 = vadd.f32 %v637_v3, %v122_v51  ;;  %v70_v48 = vld [vmem:[%s1049_s0 + $0x1c0] sm:$0xff] }
  0x26   :  { %v252_v61 = vmax.f32 %v188_v50, 0.0  ;;  %585 = vst [vmem:[%s1052_s3 + $0x80] sm:$0xff] %v493_v54   ;;  %v503_v1 = vpack.c.bf16 %v251_v56, %v250_v55  ;;  %v124_v5 = vmul.f32 %v632_v2, %v56_v52  ;;  %v125_v6 = vmul.f32 %v632_v2, %v57_v53 }
  0x27   :  { %v253_v4 = vmax.f32 %v189_v57, 0.0  ;;  %586 = vst [vmem:[%s1052_s3 + $0x88] sm:$0xff] %v498_v60   ;;  %v191_v8 = vadd.f32 %v637_v3, %v123_v62  ;;  %v254_v9 = vmax.f32 %v190_v63, 0.0  ;;  %v126_v10 = vmul.f32 %v632_v2, %v58_v58  ;;  %v71_v57 = vld [vmem:[%s1049_s0 + $0x1c8] sm:$0xff]  ;;  %v72_v62 = vld [vmem:[%s1049_s0 + $0x1d0] sm:$0xff]  ;;  %v73_v63 = vld [vmem:[%s1049_s0 + $0x1d8] sm:$0xff] }
  0x28   :  { %v127_v11 = vmul.f32 %v632_v2, %v59_v59  ;;  %587 = vst [vmem:[%s1052_s3 + $0x90] sm:$0xff] %v503_v1   ;;  %v192_v14 = vadd.f32 %v637_v3, %v124_v5  ;;  %v193_v15 = vadd.f32 %v637_v3, %v125_v6  ;;  %v128_v16 = vmul.f32 %v632_v2, %v60_v0  ;;  %v74_v6 = vld [vmem:[%s1049_s0 + $0x1e0] sm:$0xff] }
  0x29   :  { %v508_v13 = vpack.c.bf16 %v253_v4, %v252_v61  ;;  %v255_v17 = vmax.f32 %v191_v8, 0.0  ;;  %v194_v18 = vadd.f32 %v637_v3, %v126_v10  ;;  %v129_v20 = vmul.f32 %v632_v2, %v61_v7  ;;  %v75_v7 = vld [vmem:[%s1049_s0 + $0x1e8] sm:$0xff] }
  0x2a   :  { %v195_v19 = vadd.f32 %v637_v3, %v127_v11  ;;  %v256_v22 = vmax.f32 %v192_v14, 0.0  ;;  %v257_v23 = vmax.f32 %v193_v15, 0.0  ;;  %v196_v24 = vadd.f32 %v637_v3, %v128_v16 }
  0x2b   :  { %588 = vst [vmem:[%s1052_s3 + $0x98] sm:$0xff] %v508_v13   ;;  %v130_v25 = vmul.f32 %v632_v2, %v62_v12  ;;  %v513_v28 = vpack.c.bf16 %v255_v17, %v254_v9  ;;  %v258_v29 = vmax.f32 %v194_v18, 0.0  ;;  %v197_v31 = vadd.f32 %v637_v3, %v129_v20  ;;  %v76_v12 = vld [vmem:[%s1049_s0 + $0x1f0] sm:$0xff]  ;;  %v77_v17 = vld [vmem:[%s1049_s0 + $0x1f8] sm:$0xff] }
  0x2c   :  { %v259_v30 = vmax.f32 %v195_v19, 0.0  ;;  %v518_v34 = vpack.c.bf16 %v257_v23, %v256_v22  ;;  %v260_v35 = vmax.f32 %v196_v24, 0.0  ;;  %v131_v36 = vmul.f32 %v632_v2, %v63_v21 }
  0x2d   :  { %v198_v37 = vadd.f32 %v637_v3, %v130_v25  ;;  %589 = vst [vmem:[%s1052_s3 + $0xa0] sm:$0xff] %v513_v28   ;;  %v261_v40 = vmax.f32 %v197_v31, 0.0  ;;  %v132_v41 = vmul.f32 %v632_v2, %v64_v26  ;;  %v133_v42 = vmul.f32 %v632_v2, %v65_v27 }
  0x2e   :  { %v523_v39 = vpack.c.bf16 %v259_v30, %v258_v29  ;;  %590 = vst [vmem:[%s1052_s3 + $0xa8] sm:$0xff] %v518_v34   ;;  %v199_v44 = vadd.f32 %v637_v3, %v131_v36  ;;  %v134_v46 = vmul.f32 %v632_v2, %v66_v32  ;;  %v135_v47 = vmul.f32 %v632_v2, %v67_v33 }
  0x2f   :  { %v262_v45 = vmax.f32 %v198_v37, 0.0  ;;  %v528_v49 = vpack.c.bf16 %v261_v40, %v260_v35  ;;  %v200_v50 = vadd.f32 %v637_v3, %v132_v41  ;;  %v201_v51 = vadd.f32 %v637_v3, %v133_v42 }
  0x30   :  { %591 = vst [vmem:[%s1052_s3 + $0xb0] sm:$0xff] %v523_v39   ;;  %v136_v52 = vmul.f32 %v632_v2, %v68_v38  ;;  %v263_v53 = vmax.f32 %v199_v44, 0.0  ;;  %v202_v54 = vadd.f32 %v637_v3, %v134_v46  ;;  %v203_v55 = vadd.f32 %v637_v3, %v135_v47 }
  0x31   :  { %v137_v56 = vmul.f32 %v632_v2, %v69_v43  ;;  %592 = vst [vmem:[%s1052_s3 + $0xb8] sm:$0xff] %v528_v49   ;;  %v264_v58 = vmax.f32 %v200_v50, 0.0  ;;  %v265_v59 = vmax.f32 %v201_v51, 0.0  ;;  %v138_v61 = vmul.f32 %v632_v2, %v70_v48 }
  0x32   :  { %v204_v60 = vadd.f32 %v637_v3, %v136_v52  ;;  %v533_v0 = vpack.c.bf16 %v263_v53, %v262_v45  ;;  %v266_v1 = vmax.f32 %v202_v54, 0.0  ;;  %v267_v4 = vmax.f32 %v203_v55, 0.0 }
  0x33   :  { %v205_v5 = vadd.f32 %v637_v3, %v137_v56  ;;  %v538_v8 = vpack.c.bf16 %v265_v59, %v264_v58  ;;  %v139_v10 = vmul.f32 %v632_v2, %v71_v57  ;;  %v206_v11 = vadd.f32 %v637_v3, %v138_v61 }
  0x34   :  { %v268_v9 = vmax.f32 %v204_v60, 0.0  ;;  %593 = vst [vmem:[%s1052_s3 + $0xc0] sm:$0xff] %v533_v0   ;;  %v543_v13 = vpack.c.bf16 %v267_v4, %v266_v1  ;;  %v140_v15 = vmul.f32 %v632_v2, %v72_v62  ;;  %v141_v16 = vmul.f32 %v632_v2, %v73_v63 }
  0x35   :  { %v269_v14 = vmax.f32 %v205_v5, 0.0  ;;  %594 = vst [vmem:[%s1052_s3 + $0xc8] sm:$0xff] %v538_v8   ;;  %v207_v18 = vadd.f32 %v637_v3, %v139_v10  ;;  %v270_v19 = vmax.f32 %v206_v11, 0.0  ;;  %v142_v20 = vmul.f32 %v632_v2, %v74_v6 }
  0x36   :  { %v143_v21 = vmul.f32 %v632_v2, %v75_v7  ;;  %595 = vst [vmem:[%s1052_s3 + $0xd0] sm:$0xff] %v543_v13   ;;  %v208_v23 = vadd.f32 %v637_v3, %v140_v15  ;;  %v209_v24 = vadd.f32 %v637_v3, %v141_v16  ;;  %v144_v25 = vmul.f32 %v632_v2, %v76_v12 }
  0x37   :  { %v548_v22 = vpack.c.bf16 %v269_v14, %v268_v9  ;;  %v271_v26 = vmax.f32 %v207_v18, 0.0  ;;  %v210_v27 = vadd.f32 %v637_v3, %v142_v20  ;;  %v145_v29 = vmul.f32 %v632_v2, %v77_v17 }
  0x38   :  { %v211_v28 = vadd.f32 %v637_v3, %v143_v21  ;;  %v272_v30 = vmax.f32 %v208_v23, 0.0  ;;  %v273_v31 = vmax.f32 %v209_v24, 0.0  ;;  %v212_v32 = vadd.f32 %v637_v3, %v144_v25 }
  0x39   :  { %596 = vst [vmem:[%s1052_s3 + $0xd8] sm:$0xff] %v548_v22   ;;  %v553_v33 = vpack.c.bf16 %v271_v26, %v270_v19  ;;  %v274_v34 = vmax.f32 %v210_v27, 0.0  ;;  %v213_v36 = vadd.f32 %v637_v3, %v145_v29 }
  0x3a   :  { %v275_v35 = vmax.f32 %v211_v28, 0.0  ;;  %v558_v37 = vpack.c.bf16 %v273_v31, %v272_v30  ;;  %v276_v38 = vmax.f32 %v212_v32, 0.0 }
  0x3b   :  { %597 = vst [vmem:[%s1052_s3 + $0xe0] sm:$0xff] %v553_v33   ;;  %v277_v39 = vmax.f32 %v213_v36, 0.0 }
  0x3c   :  { %v563_v2 = vpack.c.bf16 %v275_v35, %v274_v34  ;;  %598 = vst [vmem:[%s1052_s3 + $0xe8] sm:$0xff] %v558_v37  }
  0x3d   :  { %v568_v40 = vpack.c.bf16 %v277_v39, %v276_v38 }
  0x3e   :  { %599 = vst [vmem:[%s1052_s3 + $0xf0] sm:$0xff] %v563_v2  }
  0x3f   :  { %600 = vst [vmem:[%s1052_s3 + $0xf8] sm:$0xff] %v568_v40  }

// kernel: double_conv.4
= control target key start
LH: loop header
LB: loop body
LE: loop exit
PB: predicated region body
PF: predicated region fallthrough
CT: control target
= control target key end

     0   :  { %s5794_s15 = smov 0   ;;  %s7344_s0 = inlined_call_operand.vmem [shape: bf16[2,18,18,128], index: 0, kind: input, shape index: {}]   ;;  %s7345_s1 = inlined_call_operand.vmem [shape: bf16[3,3,128,128], index: 1, kind: input, shape index: {}]   ;;  %s7346_s2 = inlined_call_operand.vmem [shape: f32[1,128], index: 2, kind: input, shape index: {}]   ;;  %s7347_s3 = inlined_call_operand.vmem [shape: f32[512,128], index: 3, kind: output, shape index: {0}]   ;;  %s7348_s4 = inlined_call_operand.vmem [shape: f32[2,2,128], index: 4, kind: output, shape index: {1}]  }
   0x1 LB: > { %s5800_s16 = sadd.s32 4294967295, %s5767_s15   ;;  %p4719_p0 = scmp.ge.s32.totalorder %s5767_s15, 1  ;;  %s5767_s15 = sphi %s5794_s15, %s15_s15  }
   0x2   : > { %p165_p1 = scmp.lt.s32.totalorder %s5767_s15, 3 }
   0x4   : > { %p166_p2 = pnand %p4719_p0, %p165_p1 }
   0x6   : > { %169 = sbr.rel (%p166_p2) target bundleno = 767 (0x2ff), region = 32 }
   0xb   : > { %v5597_v0 = vld [vmem:[%s7345_s1 + $0x38] sm:$0xff]  ;;  %v5596_v1 = vld [vmem:[%s7345_s1 + $0x30] sm:$0xff]  ;;  %v5595_v2 = vld [vmem:[%s7345_s1 + $0x28] sm:$0xff]  ;;  %p195_p3 = scmp.lt.s32.totalorder %s5800_s16, 1  ;;  %vm575_vm0 = vsmask.f32 3328 }
   0xc   : > { %5694 = vmatpush.bf16.msra.mxu1 %v5597_v0  ;;  %5695 = vmatpush.bf16.msra.mxu2 %v5597_v0  ;;  %v5594_v3 = vld [vmem:[%s7345_s1 + $0x20] sm:$0xff]  ;;  %v5593_v4 = vld [vmem:[%s7345_s1 + $0x18] sm:$0xff]  ;;  %v5592_v5 = vld [vmem:[%s7345_s1 + $0x10] sm:$0xff]  ;;  %vm576_vm1 = vsmask.f32 7440  ;;  %vm1276_vm2 = vcmask 1042432  }
   0xd   : > { %5696 = vmatpush.bf16.msra.mxu3 %v5597_v0  ;;  %406 = vmatpush.bf16.msra.mxu0 %v5597_v0  ;;  %s5824_s29 = scalar_select %p195_p3, %s5800_s16, 1  ;;  %v5591_v6 = vld [vmem:[%s7345_s1 + $0x8] sm:$0xff]  ;;  %v5590_v7 = vld [vmem:[%s7345_s1] sm:$0xff]  ;;  %v5613_v8 = vld [vmem:[%s7345_s1 + $0xb8] sm:$0xff]  ;;  %vm1277_vm3 = vcmask 1046532   ;;  %vm4625_vm6 = vcmask 1040384  }
   0xe   : > { %v5637_v9 = vld [vmem:[%s7345_s1 + $0xf8] sm:$0xff]  ;;  %v5612_v16 = vld [vmem:[%s7345_s1 + $0xb0] sm:$0xff]  ;;  %v5611_v20 = vld [vmem:[%s7345_s1 + $0xa8] sm:$0xff]  ;;  %s4721_s12 = sshll.u32 %s5800_s16, 5 }
   0xf   : > { %s5718_s6 = smul.u32 216, %s5824_s29  ;;  %v5605_v14 = vld [vmem:[%s7345_s1 + $0x78] sm:$0xff]  ;;  %v5636_v17 = vld [vmem:[%s7345_s1 + $0xf0] sm:$0xff]  ;;  %v5635_v21 = vld [vmem:[%s7345_s1 + $0xe8] sm:$0xff]  ;;  %p7067_p4 = scmp.lt.s32.totalorder %s4721_s12, 63 }
  0x10   : > { %5697 = vmatpush.bf16.msra.mxu1 %v5596_v1  ;;  %5698 = vmatpush.bf16.msra.mxu2 %v5596_v1  ;;  %v5645_v15 = vld [vmem:[%s7345_s1 + $0x138] sm:$0xff]  ;;  %v5604_v18 = vld [vmem:[%s7345_s1 + $0x70] sm:$0xff]  ;;  %v5603_v22 = vld [vmem:[%s7345_s1 + $0x68] sm:$0xff] }
  0x11   : > { %5699 = vmatpush.bf16.msra.mxu3 %v5596_v1  ;;  %407 = vmatpush.bf16.msra.mxu0 %v5596_v1  ;;  %s5836_s11 = scalar_lea.vmem %s7344_s0, %s5718_s6  ;;  %v5644_v19 = vld [vmem:[%s7345_s1 + $0x130] sm:$0xff]  ;;  %v5643_v23 = vld [vmem:[%s7345_s1 + $0x128] sm:$0xff]  ;;  %v5610_v24 = vld [vmem:[%s7345_s1 + $0xa0] sm:$0xff]  ;;  %s7373_s12 = smov (!%p7067_p4, %s4721_s12), 63 }
  0x12   : > { %v5578_v10 = vld [vmem:[%s5836_s11 + $0x30] sm:$0xff]  ;;  %v5582_v11 = vld [vmem:[%s5836_s11 + $0x60] sm:$0xff]  ;;  %v5609_v28 = vld [vmem:[%s7345_s1 + $0x98] sm:$0xff]  ;;  %s4722_s16 = sshll.u32 %s7373_s12, 3 }
  0x13   : > { %v5586_v12 = vld [vmem:[%s5836_s11 + $0x90] sm:$0xff]  ;;  %v5574_v13 = vld [vmem:[%s5836_s11] sm:$0xff]  ;;  %v5633_v29 = vld [vmem:[%s7345_s1 + $0xd8] sm:$0xff]  ;;  %s7107_s18 = scalar_lea.vmem %s7347_s3, %s4722_s16 }
  0x14   : > { %5700 = vmatpush.bf16.msra.mxu1 %v5595_v2  ;;  %5701 = vmatpush.bf16.msra.mxu2 %v5595_v2  ;;  %v5634_v25 = vld [vmem:[%s7345_s1 + $0xe0] sm:$0xff]  ;;  %v5583_v31 = vld [vmem:[%s5836_s11 + $0x6c] sm:$0xff]  ;;  %v5601_v34 = vld [vmem:[%s7345_s1 + $0x58] sm:$0xff] }
  0x15   : > { %5702 = vmatpush.bf16.msra.mxu3 %v5595_v2  ;;  %408 = vmatpush.bf16.msra.mxu0 %v5595_v2  ;;  %v5602_v26 = vld [vmem:[%s7345_s1 + $0x60] sm:$0xff]  ;;  %v5575_v33 = vld [vmem:[%s5836_s11 + $0xc] sm:$0xff]  ;;  %v5641_v35 = vld [vmem:[%s7345_s1 + $0x118] sm:$0xff] }
  0x16   : > { %v5642_v27 = vld [vmem:[%s7345_s1 + $0x120] sm:$0xff]  ;;  %v5608_v36 = vld [vmem:[%s7345_s1 + $0x90] sm:$0xff]  ;;  %v5607_v40 = vld [vmem:[%s7345_s1 + $0x88] sm:$0xff] }
  0x17   : > { %v5579_v30 = vld [vmem:[%s5836_s11 + $0x3c] sm:$0xff]  ;;  %v5632_v37 = vld [vmem:[%s7345_s1 + $0xd0] sm:$0xff]  ;;  %v5631_v41 = vld [vmem:[%s7345_s1 + $0xc8] sm:$0xff] }
  0x18   : > { %5703 = vmatpush.bf16.msra.mxu1 %v5594_v3  ;;  %5704 = vmatpush.bf16.msra.mxu2 %v5594_v3  ;;  %v5587_v32 = vld [vmem:[%s5836_s11 + $0x9c] sm:$0xff]  ;;  %v5600_v38 = vld [vmem:[%s7345_s1 + $0x50] sm:$0xff]  ;;  %v5599_v42 = vld [vmem:[%s7345_s1 + $0x48] sm:$0xff] }
  0x19   : > { %5705 = vmatpush.bf16.msra.mxu3 %v5594_v3  ;;  %409 = vmatpush.bf16.msra.mxu0 %v5594_v3  ;;  %v5640_v39 = vld [vmem:[%s7345_s1 + $0x110] sm:$0xff]  ;;  %v5639_v43 = vld [vmem:[%s7345_s1 + $0x108] sm:$0xff]  ;;  %v5606_v44 = vld [vmem:[%s7345_s1 + $0x80] sm:$0xff] }
  0x1a   : > { %v5630_v45 = vld [vmem:[%s7345_s1 + $0xc0] sm:$0xff]  ;;  %v5580_v48 = vld [vmem:[%s5836_s11 + $0x48] sm:$0xff]  ;;  %v5584_v49 = vld [vmem:[%s5836_s11 + $0x78] sm:$0xff] }
  0x1b   : > { %v5598_v46 = vld [vmem:[%s7345_s1 + $0x40] sm:$0xff]  ;;  %v5588_v50 = vld [vmem:[%s5836_s11 + $0xa8] sm:$0xff]  ;;  %v5576_v51 = vld [vmem:[%s5836_s11 + $0x18] sm:$0xff] }
  0x1c   : > { %5706 = vmatpush.bf16.msra.mxu1 %v5593_v4  ;;  %5707 = vmatpush.bf16.msra.mxu2 %v5593_v4  ;;  %v5638_v47 = vld [vmem:[%s7345_s1 + $0x100] sm:$0xff]  ;;  %v5677_v56 = vld [vmem:[%s7345_s1 + $0x1b8] sm:$0xff]  ;;  %v5076_v58 = vld [vmem:[%s5836_s11 + $0xc] sm:$0xf] }
  0x1d   : > { %5708 = vmatpush.bf16.msra.mxu3 %v5593_v4  ;;  %410 = vmatpush.bf16.msra.mxu0 %v5593_v4  ;;  %v527_v52 = vld [vmem:[%s5836_s11] sm:$0xf]  ;;  %v5948_v53 = vld [vmem:[%s5836_s11 + $0x4] sm:$0xf]  ;;  %v5685_v57 = vld [vmem:[%s7345_s1 + $0x1f8] sm:$0xff]  ;;  %v2005_v2 = vshrl.u32 %v5076_v58, 16 }
  0x1e   : > { %v579_v54 = vshrl.u32 %v527_v52, 16  ;;  %v582_v55 = vshll.u32 %v527_v52, 16  ;;  %v5653_v59 = vld [vmem:[%s7345_s1 + $0x178] sm:$0xff]  ;;  %v588_v61 = vshll.u32 %v5948_v53, 16  ;;  %v592_v62 = vshrl.u32 %v5948_v53, 16  ;;  %vm5976_vm4 = vmor %vm575_vm0, %vm576_vm1 }
  0x1f   : > { %v5693_v60 = vld [vmem:[%s7345_s1 + $0x238] sm:$0xff]  ;;  %v5077_v63 = vld [vmem:[%s5836_s11 + $0x10] sm:$0xf]  ;;  %v2008_v3 = vshll.u32 %v5076_v58, 16  ;;  %vm5980_vm5 = vmor %vm1276_vm2, %vm1277_vm3 }
  0x20   : > { %5709 = vmatpush.bf16.msra.mxu1 %v5592_v5  ;;  %5710 = vmatpush.bf16.msra.mxu2 %v5592_v5  ;;  %v581_v0 = vrot.slane %v579_v54, 4  ;;  %v584_v1 = vrot.slane %v582_v55, 5  ;;  %v2014_v4 = vshll.u32 %v5077_v63, 16 }
  0x21   : > { %5711 = vmatpush.bf16.msra.mxu3 %v5592_v5  ;;  %411 = vmatpush.bf16.msra.mxu0 %v5592_v5  ;;  %v2018_v5 = vshrl.u32 %v5077_v63, 16 }
  0x24   : > { %5712 = vmatpush.bf16.msra.mxu1 %v5591_v6  ;;  %5713 = vmatpush.bf16.msra.mxu2 %v5591_v6 }
  0x25   : > { %5714 = vmatpush.bf16.msra.mxu3 %v5591_v6  ;;  %412 = vmatpush.bf16.msra.mxu0 %v5591_v6  ;;  %v529_v6 = vld [vmem:[%s5836_s11 + $0x8] sm:$0x1] }
  0x28   : > { %5715 = vmatpush.bf16.msra.mxu1 %v5590_v7  ;;  %5716 = vmatpush.bf16.msra.mxu2 %v5590_v7 }
  0x29   : > { %5717 = vmatpush.bf16.msra.mxu3 %v5590_v7  ;;  %413 = vmatpush.bf16.msra.mxu0 %v5590_v7  ;;  %v590_v7 = vrot.slane %v588_v61, 5  ;;  %v532_v61 = vld [vmem:[%s5836_s11 + $0x14] sm:$0x1] }
  0x2b   : > { %434 = vmatmul.bf16.vlgmr.msra.gmra.mxu1 %v5578_v10  ;;  %454 = vmatmul.bf16.vlgmr.msra.gmra.mxu2 %v5582_v11  ;;  %v2007_v10 = vrot.slane %v2005_v2, 4  ;;  %v2010_v11 = vrot.slane %v2008_v3, 5 }
  0x2c   : > { %1520 = vmatpush.bf16.msrb.mxu2 %v5613_v8  ;;  %474 = vmatmul.bf16.vlgmr.msra.gmra.mxu3 %v5586_v12  ;;  %v594_v8 = vrot.slane %v592_v62, 4  ;;  %v598_v12 = vshll.u32 %v529_v6, 16 }
  0x2d   : > { %1835 = vmatpush.bf16.msrb.mxu3 %v5637_v9  ;;  %414 = vmatmul.bf16.vlgmr.msra.gmra.mxu0 %v5574_v13  ;;  %v585_v9 = vor.u32 %v584_v1, %v581_v0  ;;  %v1212_v13 = vld [vmem:[%s5836_s11] sm:$0xe] }
  0x2e   : > { %1091 = vmatpush.bf16.msrb.mxu1 %v5605_v14  ;;  %2517 = vmatpush.bf16.msrb.mxu0 %v5645_v15  ;;  %v2016_v14 = vrot.slane %v2014_v4, 5  ;;  %v2020_v15 = vrot.slane %v2018_v5, 4 }
  0x30   : > { %1521 = vmatpush.bf16.msrb.mxu2 %v5612_v16  ;;  %v595_v16 = vor.u32 %v594_v8, %v590_v7  ;;  %v622_v8 = vshll.u32 %v532_v61, 16 }
  0x31   : > { %1836 = vmatpush.bf16.msrb.mxu3 %v5636_v17  ;;  %v1281_v17 = vrot.slane %v5948_v53, 5 }
  0x32   : > { %1092 = vmatpush.bf16.msrb.mxu1 %v5604_v18  ;;  %2518 = vmatpush.bf16.msrb.mxu0 %v5644_v19  ;;  %v5078_v18 = vld [vmem:[%s5836_s11 + $0x14] sm:$0x1] }
  0x33   : > { %v5581_v19 = vld [vmem:[%s5836_s11 + $0x54] sm:$0xff] }
  0x34   : > { %1522 = vmatpush.bf16.msrb.mxu2 %v5611_v20  ;;  %v5585_v20 = vld [vmem:[%s5836_s11 + $0x84] sm:$0xff] }
  0x35   : > { %1837 = vmatpush.bf16.msrb.mxu3 %v5635_v21  ;;  %v5589_v21 = vld [vmem:[%s5836_s11 + $0xb4] sm:$0xff] }
  0x36   : > { %1093 = vmatpush.bf16.msrb.mxu1 %v5603_v22  ;;  %2519 = vmatpush.bf16.msrb.mxu0 %v5643_v23  ;;  %v5577_v22 = vld [vmem:[%s5836_s11 + $0x24] sm:$0xff] }
  0x38   : > { %1523 = vmatpush.bf16.msrb.mxu2 %v5610_v24  ;;  %v586_v24 = vrot.slane %v585_v9, 4 }
  0x39   : > { %1838 = vmatpush.bf16.msrb.mxu3 %v5634_v25  ;;  %v4868_v25 = vrot.slane %v1212_v13, 9  ;;  %v1213_v13 = vld [vmem:[%s5836_s11 + $0xc] sm:$0xe] }
  0x3a   : > { %1094 = vmatpush.bf16.msrb.mxu1 %v5602_v26  ;;  %2520 = vmatpush.bf16.msrb.mxu0 %v5642_v27  ;;  %v2011_v26 = vor.u32 %v2010_v11, %v2007_v10 }
  0x3b   : > { %439 = vmatmul.bf16.gmra.mxu1 %v5579_v30  ;;  %459 = vmatmul.bf16.gmra.mxu2 %v5583_v31  ;;  %v596_v30 = vrot.slane %v595_v16, 4  ;;  %v600_v31 = vrot.slane %v598_v12, 5 }
  0x3c   : > { %1524 = vmatpush.bf16.msrb.mxu2 %v5609_v28  ;;  %479 = vmatmul.bf16.gmra.mxu3 %v5587_v32  ;;  %v2021_v28 = vor.u32 %v2020_v15, %v2016_v14  ;;  %v1283_v32 = vrot.slane %v1281_v17, 4 }
  0x3d   : > { %1839 = vmatpush.bf16.msrb.mxu3 %v5633_v29  ;;  %419 = vmatmul.bf16.gmra.mxu0 %v5575_v33  ;;  %v2024_v29 = vshll.u32 %v5078_v18, 16  ;;  %v1284_v33 = vrot.slane %v529_v6, 5  ;;  %v5081_v6 = vld [vmem:[%s5836_s11 + $0x20] sm:$0x1] }
  0x3e   : > { %1095 = vmatpush.bf16.msrb.mxu1 %v5601_v34  ;;  %2521 = vmatpush.bf16.msrb.mxu0 %v5641_v35  ;;  %v530_v34 = vld [vmem:[%s5836_s11 + $0xc] sm:$0xf]  ;;  %v5986_v35 = vld [vmem:[%s5836_s11 + $0x10] sm:$0xf]  ;;  %v2048_v16 = vshll.u32 %v5081_v6, 16 }
  0x3f   : > { %v1288_v11 = vrot.slane %v5986_v35, 5  ;;  %v5084_v6 = vld [vmem:[%s5836_s11 + $0x2c] sm:$0x1] }
  0x40   : > { %1525 = vmatpush.bf16.msrb.mxu2 %v5608_v36  ;;  %v591_v36 = vsel %vm5976_vm4, %v586_v24, %v590_v7 }
  0x41   : > { %1840 = vmatpush.bf16.msrb.mxu3 %v5632_v37  ;;  %v1282_v37 = vsel %vm5980_vm5, %v4868_v25, %v1281_v17  ;;  %v979_v53 = vunpack.c.l.b16 %v591_v36  ;;  %v5614_v17 = vld [vmem:[%s5836_s11 + $0xc] sm:$0xff]  ;;  %v4869_v25 = vrot.slane %v1213_v13, 9 }
  0x42   : > { %1096 = vmatpush.bf16.msrb.mxu1 %v5600_v38  ;;  %2522 = vmatpush.bf16.msrb.mxu0 %v5640_v39  ;;  %v2012_v38 = vrot.slane %v2011_v26, 4  ;;  %v5079_v39 = vld [vmem:[%s5836_s11 + $0x18] sm:$0xf]  ;;  %v1408_v54 = vunpack.c.l.b16 %v1282_v37  ;;  %v1290_v26 = vrot.slane %v1288_v11, 4  ;;  %v5676_v36 = vld [vmem:[%s7345_s1 + $0x1b0] sm:$0xff] }
  0x43   : > { %v5684_v37 = vld [vmem:[%s7345_s1 + $0x1f0] sm:$0xff] }
  0x44   : > { %1526 = vmatpush.bf16.msrb.mxu2 %v5607_v40  ;;  %v5080_v40 = vld [vmem:[%s5836_s11 + $0x1c] sm:$0xf]  ;;  %v2017_v55 = vsel %vm5976_vm4, %v2012_v38, %v2016_v14  ;;  %v5652_v38 = vld [vmem:[%s7345_s1 + $0x170] sm:$0xff] }
  0x45   : > { %1841 = vmatpush.bf16.msrb.mxu3 %v5631_v41  ;;  %v2022_v41 = vrot.slane %v2021_v28, 4  ;;  %v2042_v52 = vshrl.u32 %v5080_v40, 16  ;;  %v2405_v4 = vunpack.c.l.b16 %v2017_v55  ;;  %v1291_v28 = vrot.slane %v532_v61, 5 }
  0x46   : > { %1097 = vmatpush.bf16.msrb.mxu1 %v5599_v42  ;;  %2523 = vmatpush.bf16.msrb.mxu0 %v5639_v43  ;;  %v2026_v42 = vrot.slane %v2024_v29, 5  ;;  %v603_v43 = vshrl.u32 %v530_v34, 16 }
  0x47   : > { %v2044_v3 = vrot.slane %v2042_v52, 4  ;;  %v535_v52 = vld [vmem:[%s5836_s11 + $0x20] sm:$0x1] }
  0x48   : > { %1527 = vmatpush.bf16.msrb.mxu2 %v5606_v44  ;;  %v606_v44 = vshll.u32 %v530_v34, 16 }
  0x49   : > { %1842 = vmatpush.bf16.msrb.mxu3 %v5630_v45  ;;  %v601_v45 = vsel %vm5976_vm4, %v596_v30, %v600_v31  ;;  %v2050_v31 = vrot.slane %v2048_v16, 5 }
  0x4a   : > { %1098 = vmatpush.bf16.msrb.mxu1 %v5598_v46  ;;  %2524 = vmatpush.bf16.msrb.mxu0 %v5638_v47  ;;  %v1285_v46 = vsel %vm5980_vm5, %v1283_v32, %v1284_v33  ;;  %v612_v47 = vshll.u32 %v5986_v35, 16  ;;  %v608_v58 = vrot.slane %v606_v44, 5  ;;  %v5083_v44 = vld [vmem:[%s5836_s11 + $0x28] sm:$0xf] }
  0x4b   : > { %444 = vmatmul.bf16.gmra.mxu1 %v5580_v48  ;;  %464 = vmatmul.bf16.gmra.mxu2 %v5584_v49  ;;  %v616_v48 = vshrl.u32 %v5986_v35, 16  ;;  %v2029_v49 = vshrl.u32 %v5079_v39, 16  ;;  %v2062_v55 = vshll.u32 %v5083_v44, 16 }
  0x4c   : > { %484 = vmatmul.bf16.gmra.mxu3 %v5588_v50  ;;  %3258 = vmatpush.bf16.msra.mxu2 %v5677_v56  ;;  %v2032_v50 = vshll.u32 %v5079_v39, 16  ;;  %v2027_v56 = vsel %vm5976_vm4, %v2022_v41, %v2026_v42  ;;  %v6005_v62 = vrot.slane %v612_v47, 5  ;;  %v5692_v39 = vld [vmem:[%s7345_s1 + $0x230] sm:$0xff]  ;;  %v1289_v42 = vsel %vm5980_vm5, %v4869_v25, %v1288_v11 }
  0x4d   : > { %424 = vmatmul.bf16.gmra.mxu0 %v5576_v51  ;;  %3940 = vmatpush.bf16.msra.mxu3 %v5685_v57  ;;  %v2038_v51 = vshll.u32 %v5080_v40, 16  ;;  %v605_v57 = vrot.slane %v603_v43, 4  ;;  %v618_v63 = vrot.slane %v616_v48, 4  ;;  %v2031_v0 = vrot.slane %v2029_v49, 4  ;;  %v5082_v43 = vld [vmem:[%s5836_s11 + $0x24] sm:$0xf] }
  0x4e   : > { %2943 = vmatpush.bf16.msra.mxu1 %v5653_v59  ;;  %4366 = vmatpush.bf16.msra.mxu0 %v5693_v60  ;;  %v980_v59 = vunpack.c.l.b16 %v601_v45  ;;  %v1409_v60 = vunpack.c.l.b16 %v1285_v46  ;;  %v2034_v1 = vrot.slane %v2032_v50, 5  ;;  %v2406_v5 = vunpack.c.l.b16 %v2027_v56 }
  0x4f   : > { %v6007_v2 = vrot.slane %v2038_v51, 5  ;;  %v609_v7 = vor.u32 %v608_v58, %v605_v57  ;;  %v619_v10 = vor.u32 %v618_v63, %v6005_v62  ;;  %v1292_v45 = vsel %vm5980_vm5, %v1290_v26, %v1291_v28  ;;  %v5085_v26 = vld [vmem:[%s5836_s11 + $0x30] sm:$0xf] }
  0x50   : > { %v1011_v9 = vpack.c.b16 %v980_v59, %v979_v53  ;;  %v1440_v12 = vpack.c.b16 %v1409_v60, %v1408_v54  ;;  %v2035_v14 = vor.u32 %v2034_v1, %v2031_v0  ;;  %v2437_v18 = vpack.c.b16 %v2406_v5, %v2405_v4  ;;  %3259 = vmatpush.bf16.msra.mxu2 %v5676_v36 }
  0x51   : > { %v2045_v15 = vor.u32 %v2044_v3, %v6007_v2  ;;  %v620_v24 = vrot.slane %v619_v10, 4  ;;  %3941 = vmatpush.bf16.msra.mxu3 %v5684_v37  ;;  %v2053_v53 = vshrl.u32 %v5082_v43, 16  ;;  %v2056_v54 = vshll.u32 %v5082_v43, 16 }
  0x52   : > { %v2036_v29 = vrot.slane %v2035_v14, 4  ;;  %2944 = vmatpush.bf16.msra.mxu1 %v5652_v38  ;;  %4367 = vmatpush.bf16.msra.mxu0 %v5692_v39  ;;  %v2066_v56 = vshrl.u32 %v5083_v44, 16  ;;  %v1410_v59 = vunpack.c.l.b16 %v1289_v42  ;;  %v1411_v60 = vunpack.c.l.b16 %v1292_v45 }
  0x53   : > { %v2046_v30 = vrot.slane %v2045_v15, 4  ;;  %v646_v1 = vshll.u32 %v535_v52, 16  ;;  %v2058_v3 = vrot.slane %v2056_v54, 5  ;;  %v2064_v4 = vrot.slane %v2062_v55, 5  ;;  %v1214_v15 = vld [vmem:[%s5836_s11 + $0x18] sm:$0xe] }
  0x54   : > { %v2041_v46 = vsel %vm5976_vm4, %v2036_v29, %v6007_v2  ;;  %v2055_v2 = vrot.slane %v2053_v53, 4  ;;  %v2068_v5 = vrot.slane %v2066_v56, 4  ;;  %v2077_v37 = vshrl.u32 %v5085_v26, 16 }
  0x55   : > { %v2051_v47 = vsel %vm5976_vm4, %v2046_v30, %v2050_v31  ;;  %v2407_v61 = vunpack.c.l.b16 %v2041_v46  ;;  %v2080_v38 = vshll.u32 %v5085_v26, 16 }
  0x56   : > { %v2059_v16 = vor.u32 %v2058_v3, %v2055_v2  ;;  %v2079_v54 = vrot.slane %v2077_v37, 4 }
  0x57   : > { %v2082_v55 = vrot.slane %v2080_v38, 5 }
  0x58   : > { %v2060_v29 = vrot.slane %v2059_v16, 4 }
  0x59   : > { %v2083_v3 = vor.u32 %v2082_v55, %v2079_v54 }
  0x5a   : > { %v2065_v45 = vsel %vm5976_vm4, %v2060_v29, %v2064_v4 }
  0x5b   : > { %449 = vmatmul.bf16.gmra.mxu1 %v5581_v19  ;;  %469 = vmatmul.bf16.gmra.mxu2 %v5585_v20  ;;  %v533_v19 = vld [vmem:[%s5836_s11 + $0x18] sm:$0xf]  ;;  %v610_v20 = vrot.slane %v609_v7, 4  ;;  %v2409_v56 = vunpack.c.l.b16 %v2065_v45 }
  0x5c   : > { %489 = vmatmul.bf16.gmra.mxu3 %v5589_v21  ;;  %v624_v21 = vrot.slane %v622_v8, 5  ;;  %v627_v32 = vshrl.u32 %v533_v19, 16  ;;  %v630_v33 = vshll.u32 %v533_v19, 16  ;;  %v1441_v8 = vpack.c.b16 %v1411_v60, %v1410_v59  ;;  %v536_v19 = vld [vmem:[%s5836_s11 + $0x24] sm:$0xf] }
  0x5d   : > { %429 = vmatmul.bf16.gmra.mxu0 %v5577_v22  ;;  %v6017_v22 = vld [vmem:[%s5836_s11 + $0x1c] sm:$0xf]  ;;  %v615_v40 = vsel %vm5976_vm4, %v610_v20, %v6005_v62  ;;  %v2408_v62 = vunpack.c.l.b16 %v2051_v47  ;;  %v6056_v20 = vld [vmem:[%s5836_s11 + $0x28] sm:$0xf]  ;;  %v538_v47 = vld [vmem:[%s5836_s11 + $0x2c] sm:$0x1] }
  0x5e   : > { %v636_v34 = vshll.u32 %v6017_v22, 16  ;;  %v640_v35 = vshrl.u32 %v6017_v22, 16  ;;  %v625_v41 = vsel %vm5976_vm4, %v620_v24, %v624_v21  ;;  %v629_v48 = vrot.slane %v627_v32, 4  ;;  %v5086_v32 = vld [vmem:[%s5836_s11 + $0x34] sm:$0xf] }
  0x5f   : > { %v632_v49 = vrot.slane %v630_v33, 5  ;;  %v981_v57 = vunpack.c.l.b16 %v615_v40  ;;  %v982_v58 = vunpack.c.l.b16 %v625_v41  ;;  %v2438_v10 = vpack.c.b16 %v2408_v62, %v2407_v61  ;;  %v5087_v61 = vld [vmem:[%s5836_s11 + $0x38] sm:$0x1] }
  0x60   : > { %v638_v50 = vrot.slane %v636_v34, 5  ;;  %v642_v51 = vrot.slane %v640_v35, 4  ;;  %v1295_v13 = vrot.slane %v6017_v22, 5  ;;  %v4870_v24 = vrot.slane %v1214_v15, 9 }
  0x61   : > { %v633_v63 = vor.u32 %v632_v49, %v629_v48  ;;  %v1012_v7 = vpack.c.b16 %v982_v58, %v981_v57  ;;  %v1298_v22 = vrot.slane %v535_v52, 5  ;;  %v651_v33 = vshrl.u32 %v536_v19, 16 }
  0x62   : > { %v643_v0 = vor.u32 %v642_v51, %v638_v50  ;;  %v1297_v25 = vrot.slane %v1295_v13, 4  ;;  %v654_v34 = vshll.u32 %v536_v19, 16  ;;  %v660_v35 = vshll.u32 %v6056_v20, 16 }
  0x63   : > { %v634_v11 = vrot.slane %v633_v63, 4  ;;  %v664_v36 = vshrl.u32 %v6056_v20, 16  ;;  %v1296_v39 = vsel %vm5980_vm5, %v4870_v24, %v1295_v13  ;;  %v2086_v41 = vshll.u32 %v5086_v32, 16  ;;  %v6087_v13 = vld [vmem:[%s5836_s11 + $0x34] sm:$0xf] }
  0x64   : > { %v644_v14 = vrot.slane %v643_v0, 4  ;;  %v1299_v40 = vsel %vm5980_vm5, %v1297_v25, %v1298_v22  ;;  %v2090_v42 = vshrl.u32 %v5086_v32, 16  ;;  %v653_v48 = vrot.slane %v651_v33, 4  ;;  %v5089_v24 = vld [vmem:[%s5836_s11 + $0x40] sm:$0xf]  ;;  %v5683_v25 = vld [vmem:[%s7345_s1 + $0x1e8] sm:$0xff] }
  0x65   : > { %v639_v21 = vsel %vm5976_vm4, %v634_v11, %v638_v50  ;;  %v656_v49 = vrot.slane %v654_v34, 5  ;;  %v6075_v50 = vrot.slane %v660_v35, 5  ;;  %v666_v51 = vrot.slane %v664_v36, 4  ;;  %3942 = vmatpush.bf16.msra.mxu3 %v5683_v25 }
  0x66   : > { %v983_v43 = vunpack.c.l.b16 %v639_v21  ;;  %v1412_v52 = vunpack.c.l.b16 %v1296_v39  ;;  %v1413_v53 = vunpack.c.l.b16 %v1299_v40  ;;  %v6077_v58 = vrot.slane %v2086_v41, 5  ;;  %v5675_v21 = vld [vmem:[%s7345_s1 + $0x1a8] sm:$0xff] }
  0x67   : > { %v2092_v59 = vrot.slane %v2090_v42, 4  ;;  %v670_v60 = vshll.u32 %v538_v47, 16  ;;  %v657_v62 = vor.u32 %v656_v49, %v653_v48  ;;  %v667_v63 = vor.u32 %v666_v51, %v6075_v50  ;;  %3260 = vmatpush.bf16.msra.mxu2 %v5675_v21  ;;  %v5651_v40 = vld [vmem:[%s7345_s1 + $0x168] sm:$0xff] }
  0x68   : > { %v1302_v2 = vrot.slane %v6056_v20, 5  ;;  %v1305_v16 = vrot.slane %v538_v47, 5  ;;  %v688_v29 = vshrl.u32 %v6087_v13, 16  ;;  %v2110_v34 = vshll.u32 %v5089_v24, 16  ;;  %v541_v47 = vld [vmem:[%s5836_s11 + $0x38] sm:$0x1]  ;;  %2945 = vmatpush.bf16.msra.mxu1 %v5651_v40 }
  0x69   : > { %v668_v11 = vrot.slane %v667_v63, 4  ;;  %v2114_v35 = vshrl.u32 %v5089_v24, 16  ;;  %v5091_v21 = vld [vmem:[%s5836_s11 + $0x48] sm:$0xf] }
  0x6a   : > { %v1304_v15 = vrot.slane %v1302_v2, 4 }
  0x6b   : > { %1099 = vmatmul.bf16.vlgmr.msrb.gmra.mxu1 %v1011_v9  ;;  %1528 = vmatmul.bf16.vlgmr.msrb.gmra.mxu2 %v1440_v12  ;;  %v5615_v9 = vld [vmem:[%s5836_s11 + $0x18] sm:$0xff]  ;;  %v648_v12 = vrot.slane %v646_v1, 5  ;;  %v1442_v1 = vpack.c.b16 %v1413_v53, %v1412_v52  ;;  %v2112_v53 = vrot.slane %v2110_v34, 5  ;;  %v2116_v54 = vrot.slane %v2114_v35, 4 }
  0x6c   : > { %1843 = vmatmul.bf16.vlgmr.msrb.gmra.mxu3 %v5614_v17  ;;  %v2069_v17 = vor.u32 %v2068_v5, %v2064_v4  ;;  %v5616_v4 = vld [vmem:[%s5836_s11 + $0x24] sm:$0xff]  ;;  %v1306_v37 = vsel %vm5980_vm5, %v1304_v15, %v1305_v16  ;;  %v2125_v35 = vshrl.u32 %v5091_v21, 16 }
  0x6d   : > { %2525 = vmatmul.bf16.vlgmr.msrb.gmra.mxu0 %v2437_v18  ;;  %v2072_v18 = vshll.u32 %v5084_v6, 16  ;;  %v649_v28 = vsel %vm5976_vm4, %v644_v14, %v648_v12  ;;  %v1215_v6 = vld [vmem:[%s5836_s11 + $0x24] sm:$0xe]  ;;  %v539_v12 = vld [vmem:[%s5836_s11 + $0x30] sm:$0xf]  ;;  %v1415_v52 = vunpack.c.l.b16 %v1306_v37 }
  0x6e   : > { %v2070_v30 = vrot.slane %v2069_v17, 4  ;;  %v984_v44 = vunpack.c.l.b16 %v649_v28  ;;  %v4871_v14 = vrot.slane %v1215_v6, 9  ;;  %v2084_v17 = vrot.slane %v2083_v3, 4  ;;  %v542_v6 = vld [vmem:[%s5836_s11 + $0x3c] sm:$0xf] }
  0x6f   : > { %v2074_v31 = vrot.slane %v2072_v18, 5  ;;  %v5088_v18 = vld [vmem:[%s5836_s11 + $0x3c] sm:$0xf]  ;;  %v675_v22 = vshrl.u32 %v539_v12, 16  ;;  %v678_v26 = vshll.u32 %v539_v12, 16  ;;  %v684_v28 = vshll.u32 %v6087_v13, 16 }
  0x70   : > { %v1013_v0 = vpack.c.b16 %v984_v44, %v983_v43  ;;  %v1303_v36 = vsel %vm5980_vm5, %v4871_v14, %v1302_v2  ;;  %v2089_v38 = vsel %vm5976_vm4, %v2084_v17, %v6077_v58  ;;  %v690_v44 = vrot.slane %v688_v29, 4  ;;  %v6151_v37 = vld [vmem:[%s5836_s11 + $0x44] sm:$0x1] }
  0x71   : > { %v2075_v46 = vsel %vm5976_vm4, %v2070_v30, %v2074_v31  ;;  %v2101_v30 = vshrl.u32 %v5088_v18, 16  ;;  %v2104_v31 = vshll.u32 %v5088_v18, 16  ;;  %v677_v41 = vrot.slane %v675_v22, 4 }
  0x72   : > { %v2410_v57 = vunpack.c.l.b16 %v2075_v46  ;;  %v680_v42 = vrot.slane %v678_v26, 5  ;;  %v6116_v43 = vrot.slane %v684_v28, 5  ;;  %v1414_v51 = vunpack.c.l.b16 %v1303_v36  ;;  %v5092_v28 = vld [vmem:[%s5836_s11 + $0x4c] sm:$0xf] }
  0x73   : > { %v2103_v48 = vrot.slane %v2101_v30, 4  ;;  %v2106_v49 = vrot.slane %v2104_v31, 5  ;;  %v2411_v55 = vunpack.c.l.b16 %v2089_v38  ;;  %v2117_v2 = vor.u32 %v2116_v54, %v2112_v53 }
  0x74   : > { %v2439_v5 = vpack.c.b16 %v2410_v57, %v2409_v56  ;;  %v5090_v57 = vld [vmem:[%s5836_s11 + $0x44] sm:$0x1]  ;;  %v1312_v14 = vrot.slane %v541_v47, 5  ;;  %v699_v17 = vshrl.u32 %v542_v6, 16  ;;  %v702_v18 = vshll.u32 %v542_v6, 16 }
  0x75   : > { %v2120_v3 = vshll.u32 %v5090_v57, 16  ;;  %v2128_v36 = vshll.u32 %v5091_v21, 16  ;;  %v2134_v38 = vshll.u32 %v5092_v28, 16 }
  0x76   : > { %v701_v31 = vrot.slane %v699_v17, 4 }
  0x77   : > { %v2122_v16 = vrot.slane %v2120_v3, 5 }
  0x7b   : > { %1104 = vmatmul.bf16.gmra.mxu1 %v1012_v7  ;;  %1533 = vmatmul.bf16.gmra.mxu2 %v1441_v8  ;;  %v2093_v7 = vor.u32 %v2092_v59, %v6077_v58  ;;  %v2096_v8 = vshll.u32 %v5087_v61, 16  ;;  %v681_v58 = vor.u32 %v680_v42, %v677_v41  ;;  %v691_v59 = vor.u32 %v690_v44, %v6116_v43 }
  0x7c   : > { %1848 = vmatmul.bf16.gmra.mxu3 %v5615_v9  ;;  %v672_v9 = vrot.slane %v670_v60, 5  ;;  %v694_v60 = vshll.u32 %v541_v47, 16  ;;  %v1309_v61 = vrot.slane %v6087_v13, 5  ;;  %v2118_v13 = vrot.slane %v2117_v2, 4  ;;  %v545_v2 = vld [vmem:[%s5836_s11 + $0x48] sm:$0xf] }
  0x7d   : > { %2530 = vmatmul.bf16.gmra.mxu0 %v2438_v10  ;;  %v658_v10 = vrot.slane %v657_v62, 4  ;;  %v2094_v19 = vrot.slane %v2093_v7, 4  ;;  %v2098_v20 = vrot.slane %v2096_v8, 5  ;;  %v2107_v62 = vor.u32 %v2106_v49, %v2103_v48 }
  0x7e   : > { %v673_v33 = vsel %vm5976_vm4, %v668_v11, %v672_v9  ;;  %v682_v7 = vrot.slane %v681_v58, 4  ;;  %v692_v8 = vrot.slane %v691_v59, 4  ;;  %v696_v9 = vrot.slane %v694_v60, 5  ;;  %v1217_v59 = vld [vmem:[%s5836_s11 + $0x3c] sm:$0xe] }
  0x7f   : > { %v663_v32 = vsel %vm5976_vm4, %v658_v10, %v6075_v50  ;;  %v2099_v39 = vsel %vm5976_vm4, %v2094_v19, %v2098_v20  ;;  %v986_v46 = vunpack.c.l.b16 %v673_v33  ;;  %v5691_v50 = vld [vmem:[%s7345_s1 + $0x228] sm:$0xff]  ;;  %v6129_v10 = vld [vmem:[%s5836_s11 + $0x40] sm:$0xf]  ;;  %v1311_v12 = vrot.slane %v1309_v61, 4 }
  0x80   : > { %v985_v45 = vunpack.c.l.b16 %v663_v32  ;;  %v2412_v56 = vunpack.c.l.b16 %v2099_v39  ;;  %4368 = vmatpush.bf16.msra.mxu0 %v5691_v50  ;;  %v2108_v15 = vrot.slane %v2107_v62, 4  ;;  %v708_v19 = vshll.u32 %v6129_v10, 16 }
  0x81   : > { %v712_v20 = vshrl.u32 %v6129_v10, 16  ;;  %v687_v24 = vsel %vm5976_vm4, %v682_v7, %v6116_v43  ;;  %v697_v25 = vsel %vm5976_vm4, %v692_v8, %v696_v9  ;;  %v1313_v26 = vsel %vm5980_vm5, %v1311_v12, %v1312_v14  ;;  %v6174_v9 = vld [vmem:[%s5836_s11 + $0x4c] sm:$0xf]  ;;  %v5094_v12 = vld [vmem:[%s5836_s11 + $0x54] sm:$0xf] }
  0x82   : > { %v1014_v63 = vpack.c.b16 %v986_v46, %v985_v45  ;;  %v2113_v29 = vsel %vm5976_vm4, %v2108_v15, %v2112_v53  ;;  %v2123_v30 = vsel %vm5976_vm4, %v2118_v13, %v2122_v16  ;;  %v704_v32 = vrot.slane %v702_v18, 5  ;;  %v5095_v14 = vld [vmem:[%s5836_s11 + $0x58] sm:$0xf]  ;;  %v5674_v18 = vld [vmem:[%s7345_s1 + $0x1a0] sm:$0xff] }
  0x83   : > { %v6148_v33 = vrot.slane %v708_v19, 5  ;;  %v714_v34 = vrot.slane %v712_v20, 4  ;;  %v2138_v39 = vshrl.u32 %v5092_v28, 16  ;;  %v987_v40 = vunpack.c.l.b16 %v687_v24  ;;  %v5682_v19 = vld [vmem:[%s7345_s1 + $0x1e0] sm:$0xff]  ;;  %3261 = vmatpush.bf16.msra.mxu2 %v5674_v18  ;;  %v6234_v18 = vld [vmem:[%s5836_s11 + $0x58] sm:$0xf] }
  0x84   : > { %v988_v41 = vunpack.c.l.b16 %v697_v25  ;;  %v1417_v43 = vunpack.c.l.b16 %v1313_v26  ;;  %v2413_v44 = vunpack.c.l.b16 %v2113_v29  ;;  %v2414_v45 = vunpack.c.l.b16 %v2123_v30  ;;  %3943 = vmatpush.bf16.msra.mxu3 %v5682_v19 }
  0x85   : > { %v705_v46 = vor.u32 %v704_v32, %v701_v31  ;;  %v715_v47 = vor.u32 %v714_v34, %v6148_v33  ;;  %v718_v48 = vshll.u32 %v6151_v37, 16  ;;  %v2127_v49 = vrot.slane %v2125_v35, 4 }
  0x86   : > { %v2130_v50 = vrot.slane %v2128_v36, 5  ;;  %v2140_v53 = vrot.slane %v2138_v39, 4  ;;  %v1316_v54 = vrot.slane %v6129_v10, 5  ;;  %v2441_v58 = vpack.c.b16 %v2414_v45, %v2413_v44  ;;  %v547_v45 = vld [vmem:[%s5836_s11 + $0x50] sm:$0x1] }
  0x87   : > { %v706_v62 = vrot.slane %v705_v46, 4  ;;  %v4873_v7 = vrot.slane %v1217_v59, 9  ;;  %v723_v10 = vshrl.u32 %v545_v2, 16  ;;  %v1319_v16 = vrot.slane %v6151_v37, 5 }
  0x88   : > { %v1318_v8 = vrot.slane %v1316_v54, 4  ;;  %v732_v24 = vshll.u32 %v6174_v9, 16  ;;  %v736_v25 = vshrl.u32 %v6174_v9, 16  ;;  %v2149_v26 = vshrl.u32 %v5094_v12, 16 }
  0x89   : > { %v711_v15 = vsel %vm5976_vm4, %v706_v62, %v6148_v33  ;;  %v2152_v28 = vshll.u32 %v5094_v12, 16  ;;  %v2158_v29 = vshll.u32 %v5095_v14, 16  ;;  %v2162_v30 = vshrl.u32 %v5095_v14, 16 }
  0x8a   : > { %v1317_v33 = vsel %vm5980_vm5, %v4873_v7, %v1316_v54  ;;  %v725_v34 = vrot.slane %v723_v10, 4  ;;  %v1320_v39 = vsel %vm5980_vm5, %v1318_v8, %v1319_v16  ;;  %v734_v46 = vrot.slane %v732_v24, 5 }
  0x8b   : > { %1109 = vmatmul.bf16.gmra.mxu1 %v1013_v0  ;;  %1538 = vmatmul.bf16.gmra.mxu2 %v1442_v1  ;;  %v1443_v0 = vpack.c.b16 %v1415_v52, %v1414_v51  ;;  %v1216_v1 = vld [vmem:[%s5836_s11 + $0x30] sm:$0xe]  ;;  %v6158_v51 = vld [vmem:[%s7346_s2] ss:$0 sm:$0xff]  ;;  %v6160_v52 = vrot.slane %v2134_v38, 5  ;;  %v989_v38 = vunpack.c.l.b16 %v711_v15 }
  0x8c   : > { %1853 = vmatmul.bf16.gmra.mxu3 %v5616_v4  ;;  %v5617_v4 = vld [vmem:[%s5836_s11 + $0x30] sm:$0xff]  ;;  %v4872_v11 = vrot.slane %v1216_v1, 9  ;;  %v2131_v1 = vor.u32 %v2130_v50, %v2127_v49  ;;  %v2154_v49 = vrot.slane %v2152_v28, 5  ;;  %v6216_v50 = vrot.slane %v2158_v29, 5 }
  0x8d   : > { %2535 = vmatmul.bf16.gmra.mxu0 %v2439_v5  ;;  %v2440_v5 = vpack.c.b16 %v2412_v56, %v2411_v55  ;;  %v5093_v55 = vld [vmem:[%s5836_s11 + $0x50] sm:$0x1]  ;;  %v1015_v56 = vpack.c.b16 %v988_v41, %v987_v40  ;;  %v5650_v41 = vld [vmem:[%s7345_s1 + $0x160] sm:$0xff] }
  0x8e   : > { %v1310_v22 = vsel %vm5980_vm5, %v4872_v11, %v1309_v61  ;;  %v5618_v61 = vld [vmem:[%s5836_s11 + $0x3c] sm:$0xff]  ;;  %v2144_v6 = vshll.u32 %v5093_v55, 16  ;;  %v726_v11 = vshll.u32 %v545_v2, 16  ;;  %v2132_v17 = vrot.slane %v2131_v1, 4  ;;  %2946 = vmatpush.bf16.msra.mxu1 %v5650_v41  ;;  %v1218_v1 = vld [vmem:[%s5836_s11 + $0x48] sm:$0xe] }
  0x8f   : > { %v1416_v42 = vunpack.c.l.b16 %v1310_v22  ;;  %v1418_v55 = vunpack.c.l.b16 %v1317_v33  ;;  %v4874_v24 = vrot.slane %v1218_v1, 9 }
  0x90   : > { %v2146_v21 = vrot.slane %v2144_v6, 5  ;;  %v728_v35 = vrot.slane %v726_v11, 5  ;;  %v2137_v40 = vsel %vm5976_vm4, %v2132_v17, %v6160_v52  ;;  %v548_v17 = vld [vmem:[%s5836_s11 + $0x54] sm:$0xf] }
  0x91   : > { %v1444_v57 = vpack.c.b16 %v1417_v43, %v1416_v42  ;;  %v2415_v59 = vunpack.c.l.b16 %v2137_v40  ;;  %v750_v33 = vshll.u32 %v548_v17, 16 }
  0x9b   : > { %1114 = vmatmul.bf16.gmra.mxu1 %v1014_v63  ;;  %1543 = vmatmul.bf16.gmra.mxu2 %v1443_v0  ;;  %v716_v63 = vrot.slane %v715_v47, 4  ;;  %v720_v0 = vrot.slane %v718_v48, 5  ;;  %v738_v47 = vrot.slane %v736_v25, 4  ;;  %v2151_v48 = vrot.slane %v2149_v26, 4 }
  0x9c   : > { %1858 = vmatmul.bf16.gmra.mxu3 %v5617_v4 }
  0x9d   : > { %2540 = vmatmul.bf16.gmra.mxu0 %v2440_v5  ;;  %v2141_v5 = vor.u32 %v2140_v53, %v6160_v52  ;;  %v721_v13 = vsel %vm5976_vm4, %v716_v63, %v720_v0  ;;  %v2164_v52 = vrot.slane %v2162_v30, 4  ;;  %v5690_v53 = vld [vmem:[%s7345_s1 + $0x220] sm:$0xff]  ;;  %v739_v62 = vor.u32 %v738_v47, %v734_v46 }
  0x9e   : > { %v990_v54 = vunpack.c.l.b16 %v721_v13  ;;  %4369 = vmatpush.bf16.msra.mxu0 %v5690_v53  ;;  %v1323_v63 = vrot.slane %v6174_v9, 5  ;;  %v2155_v2 = vor.u32 %v2154_v49, %v2151_v48  ;;  %v5619_v9 = vld [vmem:[%s5836_s11 + $0x48] sm:$0xff]  ;;  %v5098_v47 = vld [vmem:[%s5836_s11 + $0x64] sm:$0xf]  ;;  %v752_v53 = vrot.slane %v750_v33, 5 }
  0x9f   : > { %v2142_v20 = vrot.slane %v2141_v5, 4  ;;  %v2165_v5 = vor.u32 %v2164_v52, %v6216_v50 }
  0xa0   : > { %v1016_v10 = vpack.c.b16 %v990_v54, %v989_v38  ;;  %v1325_v25 = vrot.slane %v1323_v63, 4  ;;  %v2156_v26 = vrot.slane %v2155_v2, 4  ;;  %v1324_v38 = vsel %vm5980_vm5, %v4874_v24, %v1323_v63 }
  0xa1   : > { %v2147_v44 = vsel %vm5976_vm4, %v2142_v20, %v2146_v21  ;;  %v740_v21 = vrot.slane %v739_v62, 4  ;;  %v2166_v28 = vrot.slane %v2165_v5, 4  ;;  %v1420_v62 = vunpack.c.l.b16 %v1324_v38 }
  0xa2   : > { %v2182_v63 = vshll.u32 %v5098_v47, 16 }
  0xa8   : > { %v435_v60 = vpop.f32.mrf.mxu1 }
  0xa9   : > { %v6168_v3 = vadd.f32 %v6158_v51, %v435_v60  ;;  %v2416_v60 = vunpack.c.l.b16 %v2147_v44 }
  0xaa   : > { %v6170_v4 = vpop.f32.mrf.mxu0 }
  0xab   : > { %1119 = vmatmul.bf16.gmra.mxu1 %v1015_v56  ;;  %1548 = vmatmul.bf16.gmra.mxu2 %v1444_v57  ;;  %v1419_v56 = vunpack.c.l.b16 %v1320_v39  ;;  %v729_v57 = vor.u32 %v728_v35, %v725_v34  ;;  %v2442_v13 = vpack.c.b16 %v2416_v60, %v2415_v59  ;;  %v756_v34 = vshll.u32 %v6234_v18, 16  ;;  %v5097_v39 = vld [vmem:[%s5836_s11 + $0x60] sm:$0xf] }
  0xac   : > { %1863 = vmatmul.bf16.gmra.mxu3 %v5618_v61  ;;  %v742_v61 = vshll.u32 %v547_v45, 16  ;;  %v760_v35 = vshrl.u32 %v6234_v18, 16  ;;  %v2176_v59 = vshll.u32 %v5097_v39, 16 }
  0xad   : > { %2545 = vmatmul.bf16.gmra.mxu0 %v2441_v58  ;;  %v5096_v58 = vld [vmem:[%s5836_s11 + $0x5c] sm:$0x1]  ;;  %v1445_v11 = vpack.c.b16 %v1419_v56, %v1418_v55  ;;  %v730_v12 = vrot.slane %v729_v57, 4  ;;  %v6261_v54 = vrot.slane %v756_v34, 5 }
  0xae   : > { %v455_v22 = vpop.f32.mrf.mxu2  ;;  %v2168_v6 = vshll.u32 %v5096_v58, 16  ;;  %v744_v16 = vrot.slane %v742_v61, 5  ;;  %v6267_v57 = vld [vmem:[%s5836_s11 + $0x5c] sm:$0x1]  ;;  %v762_v58 = vrot.slane %v760_v35, 4  ;;  %v5620_v35 = vld [vmem:[%s5836_s11 + $0x54] sm:$0xff] }
  0xaf   : > { %v6193_v31 = vadd.f32 %v6158_v51, %v455_v22  ;;  %v475_v32 = vpop.f32.mrf.mxu3  ;;  %v1326_v22 = vrot.slane %v547_v45, 5  ;;  %v735_v30 = vsel %vm5976_vm4, %v730_v12, %v734_v46  ;;  %v2161_v45 = vsel %vm5976_vm4, %v2156_v26, %v6216_v50 }
  0xb0   : > { %v6198_v36 = vadd.f32 %v6158_v51, %v475_v32  ;;  %v437_v37 = vpop.f32.mrf.mxu1  ;;  %v2170_v29 = vrot.slane %v2168_v6, 5  ;;  %v747_v32 = vshrl.u32 %v548_v17, 16  ;;  %v991_v41 = vunpack.c.l.b16 %v735_v30 }
  0xb1   : > { %v6209_v42 = vadd.f32 %v6158_v51, %v437_v37  ;;  %v745_v37 = vsel %vm5976_vm4, %v740_v21, %v744_v16  ;;  %v1327_v44 = vsel %vm5980_vm5, %v1325_v25, %v1326_v22  ;;  %v2173_v50 = vshrl.u32 %v5097_v39, 16  ;;  %v5099_v22 = vld [vmem:[%s5836_s11 + $0x68] sm:$0x1] }
  0xb2   : > { %v6211_v43 = vpop.f32.mrf.mxu0  ;;  %v2171_v46 = vsel %vm5976_vm4, %v2166_v28, %v2170_v29  ;;  %v749_v52 = vrot.slane %v747_v32, 4  ;;  %v992_v1 = vunpack.c.l.b16 %v745_v37  ;;  %v1421_v2 = vunpack.c.l.b16 %v1327_v44 }
  0xb3   : > { %v2417_v5 = vunpack.c.l.b16 %v2161_v45  ;;  %v2418_v6 = vunpack.c.l.b16 %v2171_v46  ;;  %v2175_v12 = vrot.slane %v2173_v50, 4  ;;  %v1330_v32 = vrot.slane %v6234_v18, 5  ;;  %v551_v18 = vld [vmem:[%s5836_s11 + $0x60] sm:$0xf] }
  0xb4   : > { %v1017_v21 = vpack.c.b16 %v992_v1, %v991_v41  ;;  %v1446_v24 = vpack.c.b16 %v1421_v2, %v1420_v62  ;;  %v2192_v45 = vshll.u32 %v5099_v22, 16  ;;  %v5681_v62 = vld [vmem:[%s7345_s1 + $0x1d8] sm:$0xff]  ;;  %v771_v1 = vshrl.u32 %v551_v18, 16 }
  0xb5   : > { %v2443_v25 = vpack.c.b16 %v2418_v6, %v2417_v5  ;;  %v1332_v46 = vrot.slane %v1330_v32, 4  ;;  %3944 = vmatpush.bf16.msra.mxu3 %v5681_v62 }
  0xb6   : > { %v457_v0 = vpop.f32.mrf.mxu2 }
  0xb7   : > { %v6226_v7 = vadd.f32 %v6158_v51, %v457_v0  ;;  %v477_v8 = vpop.f32.mrf.mxu3  ;;  %v2186_v0 = vshrl.u32 %v5098_v47, 16  ;;  %v1333_v47 = vrot.slane %v6267_v57, 5 }
  0xb8   : > { %v6229_v14 = vadd.f32 %v6158_v51, %v477_v8  ;;  %v440_v15 = vpop.f32.mrf.mxu1  ;;  %v753_v8 = vor.u32 %v752_v53, %v749_v52  ;;  %v5100_v52 = vld [vmem:[%s5836_s11 + $0x6c] sm:$0xf] }
  0xb9   : > { %v6237_v19 = vadd.f32 %v6158_v51, %v440_v15  ;;  %v2178_v15 = vrot.slane %v2176_v59, 5  ;;  %v2188_v16 = vrot.slane %v2186_v0, 4  ;;  %v5101_v59 = vld [vmem:[%s5836_s11 + $0x70] sm:$0xf]  ;;  %v2194_v0 = vrot.slane %v2192_v45, 5 }
  0xba   : > { %7353 = vst [vmem:[#allocation2_spill] sm:$0xff] %v6229_v14  ;;  %v6239_v20 = vpop.f32.mrf.mxu0  ;;  %v754_v29 = vrot.slane %v753_v8, 4  ;;  %v2197_v8 = vshrl.u32 %v5100_v52, 16 }
  0xbb   : > { %1124 = vmatmul.bf16.gmra.mxu1 %v1016_v10  ;;  %1553 = vmatmul.bf16.gmra.mxu2 %v1445_v11  ;;  %v766_v10 = vshll.u32 %v6267_v57, 16  ;;  %v763_v11 = vor.u32 %v762_v58, %v6261_v54  ;;  %v2179_v39 = vor.u32 %v2178_v15, %v2175_v12  ;;  %v5673_v57 = vld [vmem:[%s7345_s1 + $0x198] sm:$0xff] }
  0xbc   : > { %1868 = vmatmul.bf16.gmra.mxu3 %v5619_v9  ;;  %v1219_v9 = vld [vmem:[%s5836_s11 + $0x54] sm:$0xe]  ;;  %v759_v53 = vsel %vm5976_vm4, %v754_v29, %v6261_v54  ;;  %v774_v54 = vshll.u32 %v551_v18, 16  ;;  %3262 = vmatpush.bf16.msra.mxu2 %v5673_v57 }
  0xbd   : > { %2550 = vmatmul.bf16.gmra.mxu0 %v2442_v13  ;;  %v6277_v13 = vrot.slane %v2182_v63, 5  ;;  %v768_v30 = vrot.slane %v766_v10, 5  ;;  %v764_v37 = vrot.slane %v763_v11, 4  ;;  %v4875_v38 = vrot.slane %v1219_v9, 9 }
  0xbe   : > { %v460_v40 = vpop.f32.mrf.mxu2  ;;  %v2180_v50 = vrot.slane %v2179_v39, 4  ;;  %v2200_v10 = vshll.u32 %v5100_v52, 16  ;;  %v993_v15 = vunpack.c.l.b16 %v759_v53  ;;  %v2206_v9 = vshll.u32 %v5101_v59, 16 }
  0xbf   : > { %v6259_v48 = vadd.f32 %v6158_v51, %v460_v40  ;;  %v480_v49 = vpop.f32.mrf.mxu3  ;;  %v2189_v44 = vor.u32 %v2188_v16, %v6277_v13  ;;  %v1331_v58 = vsel %vm5980_vm5, %v4875_v38, %v1330_v32  ;;  %v2210_v16 = vshrl.u32 %v5101_v59, 16 }
  0xc0   : > { %v6264_v55 = vadd.f32 %v6158_v51, %v480_v49  ;;  %v442_v56 = vpop.f32.mrf.mxu1  ;;  %v6297_v49 = vld [vmem:[%s5836_s11 + $0x64] sm:$0xf]  ;;  %v2185_v22 = vsel %vm5976_vm4, %v2180_v50, %v6277_v13  ;;  %v773_v32 = vrot.slane %v771_v1, 4  ;;  %v553_v13 = vld [vmem:[%s5836_s11 + $0x68] sm:$0x1]  ;;  %v2202_v45 = vrot.slane %v2200_v10, 5 }
  0xc1   : > { %v6270_v60 = vadd.f32 %v6158_v51, %v442_v56  ;;  %v769_v56 = vsel %vm5976_vm4, %v764_v37, %v768_v30  ;;  %v2190_v63 = vrot.slane %v2189_v44, 4  ;;  %v780_v5 = vshll.u32 %v6297_v49, 16  ;;  %v5689_v37 = vld [vmem:[%s7345_s1 + $0x218] sm:$0xff]  ;;  %v5102_v50 = vld [vmem:[%s5836_s11 + $0x74] sm:$0x1] }
  0xc2   : > { %7354 = vst [vmem:[#allocation3_spill] sm:$0xff] %v6264_v55  ;;  %v6272_v61 = vpop.f32.mrf.mxu0  ;;  %v784_v6 = vshrl.u32 %v6297_v49, 16  ;;  %v2199_v44 = vrot.slane %v2197_v8, 4  ;;  %v1422_v18 = vunpack.c.l.b16 %v1331_v58  ;;  %v2212_v52 = vrot.slane %v2210_v16, 4  ;;  %4370 = vmatpush.bf16.msra.mxu0 %v5689_v37  ;;  %v1220_v1 = vld [vmem:[%s5836_s11 + $0x60] sm:$0xe] }
  0xc3   : > { %v2195_v30 = vsel %vm5976_vm4, %v2190_v63, %v2194_v0  ;;  %v6341_v38 = vrot.slane %v780_v5, 5  ;;  %v2419_v53 = vunpack.c.l.b16 %v2185_v22  ;;  %v790_v59 = vshll.u32 %v553_v13, 16 }
  0xc4   : > { %v786_v39 = vrot.slane %v784_v6, 4  ;;  %v1337_v58 = vrot.slane %v6297_v49, 5  ;;  %v2216_v10 = vshll.u32 %v5102_v50, 16  ;;  %v1340_v37 = vrot.slane %v553_v13, 5  ;;  %v5103_v13 = vld [vmem:[%s5836_s11 + $0x78] sm:$0xf] }
  0xc5   : > { %v792_v22 = vrot.slane %v790_v59, 5 }
  0xc6   : > { %v462_v17 = vpop.f32.mrf.mxu2  ;;  %v787_v0 = vor.u32 %v786_v39, %v6341_v38 }
  0xc7   : > { %v6281_v26 = vadd.f32 %v6158_v51, %v462_v17  ;;  %v482_v28 = vpop.f32.mrf.mxu3 }
  0xc8   : > { %v6285_v33 = vadd.f32 %v6158_v51, %v482_v28  ;;  %v445_v34 = vpop.f32.mrf.mxu1 }
  0xc9   : > { %v6289_v40 = vadd.f32 %v6158_v51, %v445_v34  ;;  %v776_v34 = vrot.slane %v774_v54, 5  ;;  %v2203_v54 = vor.u32 %v2202_v45, %v2199_v44  ;;  %v2218_v45 = vrot.slane %v2216_v10, 5  ;;  %v6391_v10 = vld [vmem:[%s5836_s11 + $0x74] sm:$0x1] }
  0xca   : > { %7355 = vst [vmem:[#allocation4_spill] sm:$0xff] %v6285_v33  ;;  %v6291_v41 = vpop.f32.mrf.mxu0 }
  0xcb   : > { %1129 = vmatmul.bf16.gmra.mxu1 %v1017_v21  ;;  %1558 = vmatmul.bf16.gmra.mxu2 %v1446_v24  ;;  %v994_v24 = vunpack.c.l.b16 %v769_v56  ;;  %v2420_v56 = vunpack.c.l.b16 %v2195_v30  ;;  %v777_v57 = vor.u32 %v776_v34, %v773_v32  ;;  %v4876_v30 = vrot.slane %v1220_v1, 9  ;;  %v6364_v32 = vld [vmem:[%s5836_s11 + $0x70] sm:$0xf] }
  0xcc   : > { %1873 = vmatmul.bf16.gmra.mxu3 %v5620_v35  ;;  %v5649_v35 = vld [vmem:[%s7345_s1 + $0x158] sm:$0xff]  ;;  %v788_v34 = vrot.slane %v787_v0, 4  ;;  %v2204_v39 = vrot.slane %v2203_v54, 4 }
  0xcd   : > { %2555 = vmatmul.bf16.gmra.mxu0 %v2443_v25  ;;  %v1334_v25 = vsel %vm5980_vm5, %v1332_v46, %v1333_v47  ;;  %v6343_v47 = vrot.slane %v2206_v9, 5  ;;  %2947 = vmatpush.bf16.msra.mxu1 %v5649_v35  ;;  %v1018_v63 = vpack.c.b16 %v994_v24, %v993_v15  ;;  %v5621_v15 = vld [vmem:[%s5836_s11 + $0x60] sm:$0xff]  ;;  %v2444_v16 = vpack.c.b16 %v2420_v56, %v2419_v53  ;;  %v5104_v0 = vld [vmem:[%s5836_s11 + $0x7c] sm:$0xf] }
  0xce   : > { %v465_v2 = vpop.f32.mrf.mxu2  ;;  %v1423_v46 = vunpack.c.l.b16 %v1334_v25  ;;  %v778_v25 = vrot.slane %v777_v57, 4  ;;  %v1339_v35 = vrot.slane %v1337_v58, 4  ;;  %v808_v53 = vshrl.u32 %v6364_v32, 16 }
  0xcf   : > { %v6317_v11 = vadd.f32 %v6158_v51, %v465_v2  ;;  %v485_v12 = vpop.f32.mrf.mxu3  ;;  %v2213_v8 = vor.u32 %v2212_v52, %v6343_v47  ;;  %v804_v52 = vshll.u32 %v6364_v32, 16  ;;  %v793_v57 = vsel %vm5976_vm4, %v788_v34, %v792_v22 }
  0xd0   : > { %v6320_v17 = vadd.f32 %v6158_v51, %v485_v12  ;;  %v447_v21 = vpop.f32.mrf.mxu1  ;;  %v1447_v6 = vpack.c.b16 %v1423_v46, %v1422_v18  ;;  %v783_v56 = vsel %vm5976_vm4, %v778_v25, %v6341_v38  ;;  %v1338_v59 = vsel %vm5980_vm5, %v4876_v30, %v1337_v58 }
  0xd1   : > { %v6328_v28 = vadd.f32 %v6158_v51, %v447_v21  ;;  %v554_v21 = vld [vmem:[%s5836_s11 + $0x6c] sm:$0xf]  ;;  %v2214_v44 = vrot.slane %v2213_v8, 4  ;;  %v2224_v25 = vshll.u32 %v5103_v13, 16  ;;  %v2230_v22 = vshll.u32 %v5104_v0, 16 }
  0xd2   : > { %7356 = vst [vmem:[#allocation5_spill] sm:$0xff] %v6320_v17  ;;  %v6330_v29 = vpop.f32.mrf.mxu0  ;;  %v795_v18 = vshrl.u32 %v554_v21, 16  ;;  %v798_v46 = vshll.u32 %v554_v21, 16  ;;  %v2234_v30 = vshrl.u32 %v5104_v0, 16  ;;  %v995_v34 = vunpack.c.l.b16 %v783_v56 }
  0xd3   : > { %v2219_v54 = vsel %vm5976_vm4, %v2214_v44, %v2218_v45  ;;  %v6404_v0 = vrot.slane %v2230_v22, 5 }
  0xd4   : > { %v2422_v45 = vunpack.c.l.b16 %v2219_v54  ;;  %v2236_v56 = vrot.slane %v2234_v30, 4  ;;  %v5105_v54 = vld [vmem:[%s5836_s11 + $0x80] sm:$0x1] }
  0xd6   : > { %v467_v62 = vpop.f32.mrf.mxu2 }
  0xd7   : > { %v6350_v2 = vadd.f32 %v6158_v51, %v467_v62  ;;  %v487_v5 = vpop.f32.mrf.mxu3  ;;  %v1341_v62 = vsel %vm5980_vm5, %v1339_v35, %v1340_v37  ;;  %v996_v35 = vunpack.c.l.b16 %v793_v57  ;;  %v1424_v37 = vunpack.c.l.b16 %v1338_v59 }
  0xd8   : > { %v6354_v12 = vadd.f32 %v6158_v51, %v487_v5  ;;  %v450_v9 = vpop.f32.mrf.mxu1  ;;  %v797_v5 = vrot.slane %v795_v18, 4  ;;  %v495_v57 = vadd.f32 %v6158_v51, %v6170_v4 }
  0xd9   : > { %v6359_v24 = vadd.f32 %v6158_v51, %v450_v9  ;;  %v6393_v9 = vrot.slane %v804_v52, 5 }
  0xda   : > { %7357 = vst [vmem:[#allocation6_spill] sm:$0xff] %v6354_v12  ;;  %v6361_v49 = vpop.f32.mrf.mxu0 }
  0xdb   : > { %1134 = vmatmul.bf16.gmra.mxu1 %v1018_v63  ;;  %1563 = vmatmul.bf16.gmra.mxu2 %v1447_v6  ;;  %v2209_v63 = vsel %vm5976_vm4, %v2204_v39, %v6343_v47  ;;  %v800_v6 = vrot.slane %v798_v46, 5  ;;  %v2221_v47 = vshrl.u32 %v5103_v13, 16  ;;  %v1425_v39 = vunpack.c.l.b16 %v1341_v62 }
  0xdc   : > { %1878 = vmatmul.bf16.gmra.mxu3 %v5621_v15  ;;  %v810_v15 = vrot.slane %v808_v53, 4  ;;  %v2421_v44 = vunpack.c.l.b16 %v2209_v63  ;;  %v814_v46 = vshll.u32 %v6391_v10, 16  ;;  %v1344_v53 = vrot.slane %v6364_v32, 5 }
  0xdd   : > { %2560 = vmatmul.bf16.gmra.mxu0 %v2444_v16  ;;  %v801_v18 = vor.u32 %v800_v6, %v797_v5  ;;  %v2223_v13 = vrot.slane %v2221_v47, 4  ;;  %v1019_v62 = vpack.c.b16 %v996_v35, %v995_v34  ;;  %v1448_v63 = vpack.c.b16 %v1425_v39, %v1424_v37  ;;  %v557_v47 = vld [vmem:[%s5836_s11 + $0x78] sm:$0xf] }
  0xde   : > { %v470_v50 = vpop.f32.mrf.mxu2  ;;  %v811_v52 = vor.u32 %v810_v15, %v6393_v9  ;;  %v2445_v6 = vpack.c.b16 %v2422_v45, %v2421_v44  ;;  %v816_v15 = vrot.slane %v814_v46, 5  ;;  %v1346_v34 = vrot.slane %v1344_v53, 4 }
  0xdf   : > { %v6383_v1 = vadd.f32 %v6158_v51, %v470_v50  ;;  %v490_v38 = vpop.f32.mrf.mxu3  ;;  %v1221_v50 = vld [vmem:[%s5836_s11 + $0x6c] sm:$0xe]  ;;  %v2237_v44 = vor.u32 %v2236_v56, %v6404_v0  ;;  %v2240_v45 = vshll.u32 %v5105_v54, 16  ;;  %v819_v46 = vshrl.u32 %v557_v47, 16  ;;  %v5106_v56 = vld [vmem:[%s5836_s11 + $0x84] sm:$0xf] }
  0xe0   : > { %v6388_v8 = vadd.f32 %v6158_v51, %v490_v38  ;;  %v452_v58 = vpop.f32.mrf.mxu1  ;;  %v2226_v38 = vrot.slane %v2224_v25, 5  ;;  %v6414_v25 = vld [vmem:[%s5836_s11 + $0x7c] sm:$0xf]  ;;  %v812_v4 = vrot.slane %v811_v52, 4  ;;  %v4877_v12 = vrot.slane %v1221_v50, 9 }
  0xe1   : > { %v6396_v16 = vadd.f32 %v6158_v51, %v452_v58  ;;  %v802_v58 = vrot.slane %v801_v18, 4  ;;  %v1347_v18 = vrot.slane %v6391_v10, 5  ;;  %v832_v52 = vshrl.u32 %v6414_v25, 16 }
  0xe2   : > { %7358 = vst [vmem:[#allocation7_spill] sm:$0xff] %v6388_v8  ;;  %v6398_v21 = vpop.f32.mrf.mxu0  ;;  %v5622_v8 = vld [vmem:[%s5836_s11 + $0x6c] sm:$0xff]  ;;  %v2227_v39 = vor.u32 %v2226_v38, %v2223_v13  ;;  %v496_v50 = vadd.f32 %v6158_v51, %v6211_v43  ;;  %v1345_v10 = vsel %vm5980_vm5, %v4877_v12, %v1344_v53  ;;  %v817_v43 = vsel %vm5976_vm4, %v812_v4, %v816_v15 }
  0xe3   : > { %v807_v13 = vsel %vm5976_vm4, %v802_v58, %v6393_v9  ;;  %v5672_v38 = vld [vmem:[%s7345_s1 + $0x190] sm:$0xff]  ;;  %v5107_v9 = vld [vmem:[%s5836_s11 + $0x88] sm:$0xf]  ;;  %v1348_v12 = vsel %vm5980_vm5, %v1346_v34, %v1347_v18  ;;  %v821_v53 = vrot.slane %v819_v46, 4  ;;  %v2245_v17 = vshrl.u32 %v5106_v56, 16 }
  0xe4   : > { %3263 = vmatpush.bf16.msra.mxu2 %v5672_v38  ;;  %v2248_v15 = vshll.u32 %v5106_v56, 16  ;;  %v2258_v33 = vshrl.u32 %v5107_v9, 16  ;;  %v5648_v46 = vld [vmem:[%s7345_s1 + $0x150] sm:$0xff] }
  0xe5   : > { %v2247_v56 = vrot.slane %v2245_v17, 4  ;;  %2948 = vmatpush.bf16.msra.mxu1 %v5648_v46  ;;  %v1351_v17 = vrot.slane %v6414_v25, 5 }
  0xe6   : > { %v472_v59 = vpop.f32.mrf.mxu2 }
  0xe7   : > { %v6410_v5 = vadd.f32 %v6158_v51, %v472_v59  ;;  %v492_v32 = vpop.f32.mrf.mxu3  ;;  %v822_v59 = vshll.u32 %v557_v47, 16 }
  0xe8   : > { %v6417_v22 = vadd.f32 %v6158_v51, %v492_v32  ;;  %v1100_v30 = vpop.f32.mrf.mxu1  ;;  %v828_v32 = vshll.u32 %v6414_v25, 16  ;;  %v1353_v25 = vrot.slane %v1351_v17, 4 }
  0xe9   : > { %v1180_v35 = vadd.f32 %v1100_v30, %v495_v57  ;;  %v5680_v57 = vld [vmem:[%s7345_s1 + $0x1d0] sm:$0xff] }
  0xea   : > { %7359 = vst [vmem:[#allocation8_spill] sm:$0xff] %v6417_v22  ;;  %v6420_v37 = vpop.f32.mrf.mxu0  ;;  %v6445_v58 = vrot.slane %v828_v32, 5  ;;  %3945 = vmatpush.bf16.msra.mxu3 %v5680_v57  ;;  %v834_v22 = vrot.slane %v832_v52, 4  ;;  %v998_v32 = vunpack.c.l.b16 %v817_v43  ;;  %v1426_v52 = vunpack.c.l.b16 %v1345_v10  ;;  %v5108_v43 = vld [vmem:[%s5836_s11 + $0x8c] sm:$0x1] }
  0xeb   : > { %1139 = vmatmul.bf16.gmra.mxu1 %v1019_v62  ;;  %1568 = vmatmul.bf16.gmra.mxu2 %v1448_v63  ;;  %v2238_v62 = vrot.slane %v2237_v44, 4  ;;  %v2242_v63 = vrot.slane %v2240_v45, 5  ;;  %v6448_v44 = vld [vmem:[%s5836_s11 + $0x80] sm:$0x1]  ;;  %v2254_v45 = vshll.u32 %v5107_v9, 16  ;;  %v2250_v57 = vrot.slane %v2248_v15, 5 }
  0xec   : > { %1883 = vmatmul.bf16.gmra.mxu3 %v5622_v8  ;;  %v2228_v8 = vrot.slane %v2227_v39, 4  ;;  %v997_v39 = vunpack.c.l.b16 %v807_v13  ;;  %v835_v38 = vor.u32 %v834_v22, %v6445_v58  ;;  %v2260_v9 = vrot.slane %v2258_v33, 4  ;;  %v5623_v33 = vld [vmem:[%s5836_s11 + $0x78] sm:$0xff] }
  0xed   : > { %2565 = vmatmul.bf16.gmra.mxu0 %v2445_v6  ;;  %v824_v6 = vrot.slane %v822_v59, 5  ;;  %v5688_v59 = vld [vmem:[%s7345_s1 + $0x210] sm:$0xff]  ;;  %v497_v10 = vadd.f32 %v6158_v51, %v6239_v20  ;;  %v2264_v46 = vshll.u32 %v5108_v43, 16 }
  0xee   : > { %v1529_v54 = vpop.f32.mrf.mxu2  ;;  %v2233_v18 = vsel %vm5976_vm4, %v2228_v8, %v6404_v0  ;;  %v838_v0 = vshll.u32 %v6448_v44, 16  ;;  %4371 = vmatpush.bf16.msra.mxu0 %v5688_v59  ;;  %v836_v15 = vrot.slane %v835_v38, 4  ;;  %v6480_v38 = vld [vmem:[%s5836_s11 + $0x88] sm:$0xf]  ;;  %v5110_v43 = vld [vmem:[%s5836_s11 + $0x94] sm:$0xf] }
  0xef   : > { %v1609_v47 = vadd.f32 %v1529_v54, %v1180_v35  ;;  %v1844_v30 = vpop.f32.mrf.mxu3  ;;  %v2243_v35 = vsel %vm5976_vm4, %v2238_v62, %v2242_v63  ;;  %v825_v13 = vor.u32 %v824_v6, %v821_v53  ;;  %v2423_v8 = vunpack.c.l.b16 %v2233_v18  ;;  %v1222_v6 = vld [vmem:[%s5836_s11 + $0x78] sm:$0xe] }
  0xf0   : > { %v1102_v4 = vpop.f32.mrf.mxu1  ;;  %v2424_v62 = vunpack.c.l.b16 %v2243_v35  ;;  %v6463_v63 = vrot.slane %v2254_v45, 5  ;;  %v2251_v45 = vor.u32 %v2250_v57, %v2247_v56  ;;  %v5109_v57 = vld [vmem:[%s5836_s11 + $0x90] sm:$0xf] }
  0xf1   : > { %v1924_v55 = vadd.f32 %v1844_v30, %v1609_v47  ;;  %v1181_v14 = vadd.f32 %v1102_v4, %v496_v50  ;;  %v1427_v50 = vunpack.c.l.b16 %v1348_v12  ;;  %v1020_v12 = vpack.c.b16 %v998_v32, %v997_v39 }
  0xf2   : > { %v2528_v34 = vpop.f32.mrf.mxu0  ;;  %v826_v53 = vrot.slane %v825_v13, 4  ;;  %v840_v4 = vrot.slane %v838_v0, 5  ;;  %v2446_v35 = vpack.c.b16 %v2424_v62, %v2423_v8  ;;  %v2261_v20 = vor.u32 %v2260_v9, %v6463_v63 }
  0xf3   : > { %v1449_v22 = vpack.c.b16 %v1427_v50, %v1426_v52  ;;  %v4878_v52 = vrot.slane %v1222_v6, 9  ;;  %v560_v50 = vld [vmem:[%s5836_s11 + $0x84] sm:$0xf]  ;;  %v1354_v13 = vrot.slane %v6448_v44, 5  ;;  %v2252_v56 = vrot.slane %v2251_v45, 4 }
  0xf4   : > { %v841_v0 = vsel %vm5976_vm4, %v836_v15, %v840_v4  ;;  %v6486_v8 = vadd.f32 %v6420_v37, %v1924_v55  ;;  %v2266_v9 = vrot.slane %v2264_v46, 5  ;;  %v846_v44 = vshll.u32 %v560_v50, 16 }
  0xf5   : > { %v856_v55 = vshrl.u32 %v6480_v38, 16  ;;  %v2269_v6 = vshrl.u32 %v5109_v57, 16  ;;  %v1000_v4 = vunpack.c.l.b16 %v841_v0  ;;  %v2278_v45 = vshll.u32 %v5110_v43, 16 }
  0xf6   : > { %v1531_v54 = vpop.f32.mrf.mxu2 }
  0xf7   : > { %v1610_v47 = vadd.f32 %v1531_v54, %v1181_v14  ;;  %v1846_v30 = vpop.f32.mrf.mxu3  ;;  %v831_v14 = vsel %vm5976_vm4, %v826_v53, %v6445_v58  ;;  %v2262_v58 = vrot.slane %v2261_v20, 4  ;;  %v498_v54 = vadd.f32 %v6158_v51, %v6272_v61 }
  0xf8   : > { %v1105_v18 = vpop.f32.mrf.mxu1  ;;  %v1355_v53 = vsel %vm5980_vm5, %v1353_v25, %v1354_v13  ;;  %v2282_v61 = vshrl.u32 %v5110_v43, 16  ;;  %v848_v20 = vrot.slane %v846_v44, 5  ;;  %v1358_v25 = vrot.slane %v6480_v38, 5 }
  0xf9   : > { %v1925_v39 = vadd.f32 %v1846_v30, %v1610_v47  ;;  %v1182_v59 = vadd.f32 %v1105_v18, %v497_v10  ;;  %v843_v10 = vshrl.u32 %v560_v50, 16  ;;  %v2272_v47 = vshll.u32 %v5109_v57, 16 }
  0xfa   : > { %v6472_v32 = vpop.f32.mrf.mxu0  ;;  %v858_v50 = vrot.slane %v856_v55, 4  ;;  %v2271_v13 = vrot.slane %v2269_v6, 4  ;;  %v1429_v43 = vunpack.c.l.b16 %v1355_v53 }
  0xfb   : > { %1144 = vmatmul.bf16.gmra.mxu1 %v1020_v12  ;;  %1573 = vmatmul.bf16.gmra.mxu2 %v1449_v22  ;;  %v6488_v62 = vadd.f32 %v2528_v34, %v1925_v39  ;;  %v1352_v12 = vsel %vm5980_vm5, %v4878_v52, %v1351_v17  ;;  %v852_v22 = vshll.u32 %v6480_v38, 16  ;;  %v999_v34 = vunpack.c.l.b16 %v831_v14  ;;  %v562_v14 = vld [vmem:[%s5836_s11 + $0x8c] sm:$0x1] }
  0xfc   : > { %1888 = vmatmul.bf16.gmra.mxu3 %v5623_v33  ;;  %v2257_v17 = vsel %vm5976_vm4, %v2252_v56, %v6463_v63  ;;  %v2267_v33 = vsel %vm5976_vm4, %v2262_v58, %v2266_v9  ;;  %v2274_v0 = vrot.slane %v2272_v47, 5  ;;  %v1428_v57 = vunpack.c.l.b16 %v1352_v12  ;;  %v1223_v63 = vld [vmem:[%s5836_s11 + $0x84] sm:$0xe] }
  0xfd   : > { %7360 = vst [vmem:[#allocation9_spill] sm:$0xff] %v6488_v62  ;;  %2570 = vmatmul.bf16.gmra.mxu0 %v2446_v35  ;;  %v845_v35 = vrot.slane %v843_v10, 4  ;;  %v6509_v56 = vrot.slane %v2278_v45, 5  ;;  %v2284_v58 = vrot.slane %v2282_v61, 4  ;;  %v499_v9 = vadd.f32 %v6158_v51, %v6291_v41 }
  0xfe   : > { %v1534_v37 = vpop.f32.mrf.mxu2  ;;  %v2425_v10 = vunpack.c.l.b16 %v2257_v17  ;;  %v2426_v44 = vunpack.c.l.b16 %v2267_v33  ;;  %v862_v38 = vshll.u32 %v562_v14, 16  ;;  %v4879_v47 = vrot.slane %v1223_v63, 9  ;;  %v5624_v33 = vld [vmem:[%s5836_s11 + $0x84] sm:$0xff] }
  0xff   : > { %v1611_v30 = vadd.f32 %v1534_v37, %v1182_v59  ;;  %v1849_v15 = vpop.f32.mrf.mxu3  ;;  %v6504_v59 = vrot.slane %v852_v22, 5  ;;  %v1021_v22 = vpack.c.b16 %v1000_v4, %v999_v34  ;;  %v849_v55 = vor.u32 %v848_v20, %v845_v35 }
 0x100   : > { %v1107_v18 = vpop.f32.mrf.mxu1  ;;  %v1360_v12 = vrot.slane %v1358_v25, 4  ;;  %v1361_v53 = vrot.slane %v562_v14, 5  ;;  %v1450_v61 = vpack.c.b16 %v1429_v43, %v1428_v57  ;;  %v2285_v41 = vor.u32 %v2284_v58, %v6509_v56 }
 0x101   : > { %v1926_v46 = vadd.f32 %v1849_v15, %v1611_v30  ;;  %v1183_v39 = vadd.f32 %v1107_v18, %v498_v54  ;;  %v5111_v54 = vld [vmem:[%s5836_s11 + $0x98] sm:$0x1]  ;;  %v859_v37 = vor.u32 %v858_v50, %v6504_v59  ;;  %v2275_v30 = vor.u32 %v2274_v0, %v2271_v13  ;;  %v563_v0 = vld [vmem:[%s5836_s11 + $0x90] sm:$0xf] }
 0x102   : > { %v2533_v52 = vpop.f32.mrf.mxu0  ;;  %v2288_v18 = vshll.u32 %v5111_v54, 16  ;;  %v2447_v62 = vpack.c.b16 %v2426_v44, %v2425_v10  ;;  %v850_v20 = vrot.slane %v849_v55, 4  ;;  %v864_v50 = vrot.slane %v862_v38, 5  ;;  %v5671_v10 = vld [vmem:[%s7345_s1 + $0x188] sm:$0xff] }
 0x103   : > { %v860_v63 = vrot.slane %v859_v37, 4  ;;  %v6525_v14 = vsel %vm5980_vm5, %v1360_v12, %v1361_v53  ;;  %v2276_v13 = vrot.slane %v2275_v30, 4  ;;  %v2286_v57 = vrot.slane %v2285_v41, 4  ;;  %v5679_v44 = vld [vmem:[%s7345_s1 + $0x1c8] sm:$0xff]  ;;  %3264 = vmatpush.bf16.msra.mxu2 %v5671_v10  ;;  %v1224_v10 = vld [vmem:[%s5836_s11 + $0x90] sm:$0xe] }
 0x104   : > { %v2290_v43 = vrot.slane %v2288_v18, 5  ;;  %v6529_v58 = vadd.f32 %v6472_v32, %v1926_v46  ;;  %v500_v54 = vadd.f32 %v6158_v51, %v6330_v29  ;;  %v855_v32 = vsel %vm5976_vm4, %v850_v20, %v6504_v59  ;;  %3946 = vmatpush.bf16.msra.mxu3 %v5679_v44  ;;  %v5687_v20 = vld [vmem:[%s7345_s1 + $0x208] sm:$0xff] }
 0x105   : > { %v867_v46 = vshrl.u32 %v563_v0, 16  ;;  %v865_v37 = vsel %vm5976_vm4, %v860_v63, %v864_v50  ;;  %v2281_v51 = vsel %vm5976_vm4, %v2276_v13, %v6509_v56  ;;  %v1001_v50 = vunpack.c.l.b16 %v855_v32  ;;  %v565_v13 = vld [vmem:[%s5836_s11 + $0x98] sm:$0x1]  ;;  %4372 = vmatpush.bf16.msra.mxu0 %v5687_v20 }
 0x106   : > { %v1536_v6 = vpop.f32.mrf.mxu2  ;;  %v1002_v63 = vunpack.c.l.b16 %v865_v37 }
 0x107   : > { %v1612_v15 = vadd.f32 %v1536_v6, %v1183_v39  ;;  %v1851_v45 = vpop.f32.mrf.mxu3  ;;  %v6521_v39 = vsel %vm5980_vm5, %v4879_v47, %v1358_v25  ;;  %v6534_v25 = vld [vmem:[%s5836_s11 + $0x94] sm:$0xf]  ;;  %v1431_v6 = vunpack.c.l.b16 %v6525_v14  ;;  %v2291_v47 = vsel %vm5976_vm4, %v2286_v57, %v2290_v43 }
 0x108   : > { %v1110_v17 = vpop.f32.mrf.mxu1  ;;  %v1430_v38 = vunpack.c.l.b16 %v6521_v39  ;;  %v876_v12 = vshll.u32 %v6534_v25, 16  ;;  %v880_v53 = vshrl.u32 %v6534_v25, 16  ;;  %v2427_v39 = vunpack.c.l.b16 %v2281_v51 }
 0x109   : > { %v1927_v34 = vadd.f32 %v1851_v45, %v1612_v15  ;;  %v1184_v4 = vadd.f32 %v1110_v17, %v499_v9  ;;  %v2428_v14 = vunpack.c.l.b16 %v2291_v47  ;;  %v1365_v43 = vrot.slane %v6534_v25, 5 }
 0x10a   : > { %v6517_v35 = vpop.f32.mrf.mxu0  ;;  %v882_v57 = vrot.slane %v880_v53, 4  ;;  %v1022_v51 = vpack.c.b16 %v1002_v63, %v1001_v50  ;;  %v1451_v25 = vpack.c.b16 %v1431_v6, %v1430_v38  ;;  %v886_v53 = vshll.u32 %v565_v13, 16  ;;  %v566_v50 = vld [vmem:[%s5836_s11 + $0x9c] sm:$0xf] }
 0x10b   : > { %1149 = vmatmul.bf16.gmra.mxu1 %v1021_v22  ;;  %1578 = vmatmul.bf16.gmra.mxu2 %v1450_v61  ;;  %v6531_v9 = vadd.f32 %v2533_v52, %v1927_v34  ;;  %v870_v52 = vshll.u32 %v563_v0, 16  ;;  %v5113_v22 = vld [vmem:[%s5836_s11 + $0xa0] sm:$0xf]  ;;  %v6567_v0 = vrot.slane %v876_v12, 5 }
 0x10c   : > { %1893 = vmatmul.bf16.gmra.mxu3 %v5624_v33  ;;  %v2302_v61 = vshll.u32 %v5113_v22, 16  ;;  %v2306_v41 = vshrl.u32 %v5113_v22, 16  ;;  %v869_v33 = vrot.slane %v867_v46, 4  ;;  %v5728_v22 = vld [vmem:[%s7346_s2] ss:$0 sm:$0xff] }
 0x10d   : > { %2575 = vmatmul.bf16.gmra.mxu0 %v2447_v62  ;;  %v5112_v62 = vld [vmem:[%s5836_s11 + $0x9c] sm:$0xf]  ;;  %v872_v34 = vrot.slane %v870_v52, 5  ;;  %v883_v12 = vor.u32 %v882_v57, %v6567_v0  ;;  %v502_v20 = vadd.f32 %v5728_v22, %v6398_v21  ;;  %v5115_v57 = vld [vmem:[%s5836_s11 + $0xa8] sm:$0xf] }
 0x10e   : > { %v1539_v55 = vpop.f32.mrf.mxu2  ;;  %v2293_v15 = vshrl.u32 %v5112_v62, 16  ;;  %v2296_v45 = vshll.u32 %v5112_v62, 16  ;;  %v6571_v46 = vrot.slane %v2302_v61, 5  ;;  %v2308_v52 = vrot.slane %v2306_v41, 4  ;;  %v5114_v62 = vld [vmem:[%s5836_s11 + $0xa4] sm:$0x1] }
 0x10f   : > { %v1613_v29 = vadd.f32 %v1539_v55, %v1184_v4  ;;  %v1854_v59 = vpop.f32.mrf.mxu3  ;;  %v5647_v4 = vld [vmem:[%s7345_s1 + $0x148] sm:$0xff]  ;;  %v873_v32 = vor.u32 %v872_v34, %v869_v33  ;;  %v501_v55 = vadd.f32 %v5728_v22, %v6361_v49  ;;  %v1367_v61 = vrot.slane %v1365_v43, 4 }
 0x110   : > { %v1112_v30 = vpop.f32.mrf.mxu1  ;;  %2949 = vmatpush.bf16.msra.mxu1 %v5647_v4  ;;  %v2295_v44 = vrot.slane %v2293_v15, 4  ;;  %v2309_v33 = vor.u32 %v2308_v52, %v6571_v46  ;;  %v2312_v49 = vshll.u32 %v5114_v62, 16  ;;  %v884_v63 = vrot.slane %v883_v12, 4 }
 0x111   : > { %v1928_v18 = vadd.f32 %v1854_v59, %v1613_v29  ;;  %v1185_v17 = vadd.f32 %v1112_v30, %v500_v54  ;;  %v2298_v54 = vrot.slane %v2296_v45, 5  ;;  %v2448_v29 = vpack.c.b16 %v2428_v14, %v2427_v39  ;;  %v5625_v45 = vld [vmem:[%s5836_s11 + $0x90] sm:$0xff]  ;;  %v6586_v14 = vld [vmem:[%s5836_s11 + $0xa0] sm:$0xf] }
 0x112   : > { %v2538_v56 = vpop.f32.mrf.mxu0  ;;  %v4880_v30 = vrot.slane %v1224_v10, 9  ;;  %v874_v6 = vrot.slane %v873_v32, 4  ;;  %v888_v39 = vrot.slane %v886_v53, 5  ;;  %v2314_v52 = vrot.slane %v2312_v49, 5  ;;  %v5116_v32 = vld [vmem:[%s5836_s11 + $0xac] sm:$0xf] }
 0x113   : > { %v2299_v41 = vor.u32 %v2298_v54, %v2295_v44  ;;  %v6590_v10 = vadd.f32 %v6517_v35, %v1928_v18  ;;  %v2310_v54 = vrot.slane %v2309_v33, 4  ;;  %v891_v35 = vshrl.u32 %v566_v50, 16 }
 0x114   : > { %v879_v62 = vsel %vm5976_vm4, %v874_v6, %v6567_v0  ;;  %v894_v18 = vshll.u32 %v566_v50, 16  ;;  %v2330_v12 = vshrl.u32 %v5116_v32, 16 }
 0x115   : > { %v2300_v21 = vrot.slane %v2299_v41, 4  ;;  %v893_v49 = vrot.slane %v891_v35, 4 }
 0x116   : > { %v1541_v37 = vpop.f32.mrf.mxu2 }
 0x117   : > { %v1614_v59 = vadd.f32 %v1541_v37, %v1185_v17  ;;  %v1856_v47 = vpop.f32.mrf.mxu3  ;;  %v1368_v17 = vrot.slane %v565_v13, 5  ;;  %v1366_v13 = vsel %vm5980_vm5, %v4880_v30, %v1365_v43  ;;  %v904_v37 = vshrl.u32 %v6586_v14, 16 }
 0x118   : > { %v1115_v15 = vpop.f32.mrf.mxu1  ;;  %v2320_v43 = vshll.u32 %v5115_v57, 16  ;;  %v1432_v53 = vunpack.c.l.b16 %v1366_v13  ;;  %v1225_v13 = vld [vmem:[%s5836_s11 + $0x9c] sm:$0xe] }
 0x119   : > { %v1929_v34 = vadd.f32 %v1856_v47, %v1614_v59  ;;  %v1186_v4 = vadd.f32 %v1115_v15, %v501_v55  ;;  %v1369_v22 = vsel %vm5980_vm5, %v1367_v61, %v1368_v17  ;;  %v900_v55 = vshll.u32 %v6586_v14, 16 }
 0x11a   : > { %v6581_v38 = vpop.f32.mrf.mxu0  ;;  %v889_v59 = vsel %vm5976_vm4, %v884_v63, %v888_v39  ;;  %v2326_v47 = vshll.u32 %v5116_v32, 16  ;;  %v1433_v30 = vunpack.c.l.b16 %v1369_v22  ;;  %v2305_v15 = vsel %vm5976_vm4, %v2300_v21, %v6571_v46 }
 0x11b   : > { %1154 = vmatmul.bf16.gmra.mxu1 %v1022_v51  ;;  %1583 = vmatmul.bf16.gmra.mxu2 %v1451_v25  ;;  %v6592_v44 = vadd.f32 %v2538_v56, %v1929_v34  ;;  %v2317_v51 = vshrl.u32 %v5115_v57, 16  ;;  %v896_v34 = vrot.slane %v894_v18, 5  ;;  %v906_v6 = vrot.slane %v904_v37, 4  ;;  %v568_v57 = vld [vmem:[%s5836_s11 + $0xa4] sm:$0x1] }
 0x11c   : > { %1898 = vmatmul.bf16.gmra.mxu3 %v5625_v45  ;;  %v2315_v45 = vsel %vm5976_vm4, %v2310_v54, %v2314_v52  ;;  %v2322_v50 = vrot.slane %v2320_v43, 5  ;;  %v1003_v63 = vunpack.c.l.b16 %v879_v62  ;;  %v1004_v39 = vunpack.c.l.b16 %v889_v59  ;;  %v5117_v52 = vld [vmem:[%s5836_s11 + $0xb0] sm:$0x1] }
 0x11d   : > { %2580 = vmatmul.bf16.gmra.mxu0 %v2448_v29  ;;  %v2319_v17 = vrot.slane %v2317_v51, 4  ;;  %v6615_v32 = vrot.slane %v2326_v47, 5  ;;  %v2332_v46 = vrot.slane %v2330_v12, 4  ;;  %v2429_v21 = vunpack.c.l.b16 %v2305_v15  ;;  %v5626_v12 = vld [vmem:[%s5836_s11 + $0x9c] sm:$0xff] }
 0x11e   : > { %v1544_v56 = vpop.f32.mrf.mxu2  ;;  %v2430_v54 = vunpack.c.l.b16 %v2315_v45  ;;  %v1452_v22 = vpack.c.b16 %v1433_v30, %v1432_v53  ;;  %v897_v35 = vor.u32 %v896_v34, %v893_v49  ;;  %v4881_v37 = vrot.slane %v1225_v13, 9  ;;  %v569_v34 = vld [vmem:[%s5836_s11 + $0xa8] sm:$0xf]  ;;  %v5118_v13 = vld [vmem:[%s5836_s11 + $0xb4] sm:$0xf] }
 0x11f   : > { %v1615_v25 = vadd.f32 %v1544_v56, %v1186_v4  ;;  %v1859_v29 = vpop.f32.mrf.mxu3  ;;  %v6611_v4 = vrot.slane %v900_v55, 5  ;;  %v910_v55 = vshll.u32 %v568_v57, 16  ;;  %v2323_v62 = vor.u32 %v2322_v50, %v2319_v17 }
 0x120   : > { %v1117_v0 = vpop.f32.mrf.mxu1  ;;  %v2336_v59 = vshll.u32 %v5117_v52, 16  ;;  %v1375_v53 = vrot.slane %v568_v57, 5  ;;  %v898_v49 = vrot.slane %v897_v35, 4  ;;  %v5670_v52 = vld [vmem:[%s7345_s1 + $0x180] sm:$0xff] }
 0x121   : > { %v1930_v61 = vadd.f32 %v1859_v29, %v1615_v25  ;;  %v1187_v41 = vadd.f32 %v1117_v0, %v502_v20  ;;  %v1372_v20 = vrot.slane %v6586_v14, 5  ;;  %v907_v56 = vor.u32 %v906_v6, %v6611_v4  ;;  %v5678_v35 = vld [vmem:[%s7345_s1 + $0x1c0] sm:$0xff]  ;;  %3265 = vmatpush.bf16.msra.mxu2 %v5670_v52 }
 0x122   : > { %v2543_v33 = vpop.f32.mrf.mxu0  ;;  %v1023_v25 = vpack.c.b16 %v1004_v39, %v1003_v63  ;;  %v2333_v29 = vor.u32 %v2332_v46, %v6615_v32  ;;  %v2449_v14 = vpack.c.b16 %v2430_v54, %v2429_v21  ;;  %v912_v6 = vrot.slane %v910_v55, 5  ;;  %v6629_v63 = vld [vmem:[%s5836_s11 + $0xac] sm:$0xf]  ;;  %3947 = vmatpush.bf16.msra.mxu3 %v5678_v35  ;;  %v5120_v35 = vld [vmem:[%s5836_s11 + $0xbc] sm:$0x1] }
 0x123   : > { %v1374_v0 = vrot.slane %v1372_v20, 4  ;;  %v1373_v17 = vsel %vm5980_vm5, %v4881_v37, %v1372_v20  ;;  %v2324_v50 = vrot.slane %v2323_v62, 4  ;;  %v2338_v57 = vrot.slane %v2336_v59, 5 }
 0x124   : > { %v2334_v39 = vrot.slane %v2333_v29, 4  ;;  %v915_v54 = vshrl.u32 %v569_v34, 16  ;;  %v918_v20 = vshll.u32 %v569_v34, 16  ;;  %v1434_v55 = vunpack.c.l.b16 %v1373_v17 }
 0x125   : > { %v1376_v21 = vsel %vm5980_vm5, %v1374_v0, %v1375_v53  ;;  %v2341_v37 = vshrl.u32 %v5118_v13, 16  ;;  %v2344_v62 = vshll.u32 %v5118_v13, 16  ;;  %v1379_v17 = vrot.slane %v6629_v63, 5  ;;  %v1226_v13 = vld [vmem:[%s5836_s11 + $0xa8] sm:$0xe] }
 0x126   : > { %v1546_v18 = vpop.f32.mrf.mxu2  ;;  %v920_v0 = vrot.slane %v918_v20, 5 }
 0x127   : > { %v1616_v51 = vadd.f32 %v1546_v18, %v1187_v41  ;;  %v1861_v43 = vpop.f32.mrf.mxu3  ;;  %v908_v41 = vrot.slane %v907_v56, 4 }
 0x128   : > { %v1120_v47 = vpop.f32.mrf.mxu1 }
 0x129   : > { %v1931_v30 = vadd.f32 %v1861_v43, %v1616_v51  ;;  %v1188_v15 = vadd.f32 %v1120_v47, %v6168_v3  ;;  %v6633_v3 = vadd.f32 %v6581_v38, %v1930_v61  ;;  %v903_v38 = vsel %vm5976_vm4, %v898_v49, %v6611_v4 }
 0x12a   : > { %v6623_v45 = vpop.f32.mrf.mxu0  ;;  %v924_v61 = vshll.u32 %v6629_v63, 16  ;;  %v913_v56 = vsel %vm5976_vm4, %v908_v41, %v912_v6  ;;  %v2329_v47 = vsel %vm5976_vm4, %v2324_v50, %v6615_v32  ;;  %v5646_v6 = vld [vmem:[%s7345_s1 + $0x140] sm:$0xff]  ;;  %v2343_v50 = vrot.slane %v2341_v37, 4 }
 0x12b   : > { %1159 = vmatmul.bf16.gmra.mxu1 %v1023_v25  ;;  %1588 = vmatmul.bf16.gmra.mxu2 %v1452_v22  ;;  %v6635_v46 = vadd.f32 %v2543_v33, %v1931_v30  ;;  %v5119_v22 = vld [vmem:[%s5836_s11 + $0xb8] sm:$0xf]  ;;  %v928_v33 = vshrl.u32 %v6629_v63, 16  ;;  %v1435_v25 = vunpack.c.l.b16 %v1376_v21  ;;  %v5686_v32 = vld [vmem:[%s7345_s1 + $0x200] sm:$0xff]  ;;  %v2431_v20 = vunpack.c.l.b16 %v2329_v47 }
 0x12c   : > { %1903 = vmatmul.bf16.gmra.mxu3 %v5626_v12  ;;  %v2350_v29 = vshll.u32 %v5119_v22, 16  ;;  %v2354_v59 = vshrl.u32 %v5119_v22, 16  ;;  %v2339_v12 = vsel %vm5976_vm4, %v2334_v39, %v2338_v57  ;;  %v6660_v34 = vrot.slane %v924_v61, 5  ;;  %2950 = vmatpush.bf16.msra.mxu1 %v5646_v6 }
 0x12d   : > { %2585 = vmatmul.bf16.gmra.mxu0 %v2449_v14  ;;  %v917_v14 = vrot.slane %v915_v54, 4  ;;  %v930_v41 = vrot.slane %v928_v33, 4  ;;  %v2346_v39 = vrot.slane %v2344_v62, 5  ;;  %v1005_v57 = vunpack.c.l.b16 %v903_v38 }
 0x12e   : > { %v1549_v18 = vpop.f32.mrf.mxu2  ;;  %v6670_v21 = vrot.slane %v2350_v29, 5  ;;  %v2356_v54 = vrot.slane %v2354_v59, 4  ;;  %4373 = vmatpush.bf16.msra.mxu0 %v5686_v32  ;;  %v2432_v52 = vunpack.c.l.b16 %v2339_v12  ;;  %v1453_v61 = vpack.c.b16 %v1435_v25, %v1434_v55  ;;  %v5627_v12 = vld [vmem:[%s5836_s11 + $0xa8] sm:$0xff] }
 0x12f   : > { %v1617_v51 = vadd.f32 %v1549_v18, %v1188_v15  ;;  %v1864_v43 = vpop.f32.mrf.mxu3  ;;  %v571_v15 = vld [vmem:[%s5836_s11 + $0xb0] sm:$0x1]  ;;  %v921_v33 = vor.u32 %v920_v0, %v917_v14  ;;  %v931_v18 = vor.u32 %v930_v41, %v6660_v34  ;;  %v4882_v37 = vrot.slane %v1226_v13, 9 }
 0x130   : > { %v1122_v4 = vpop.f32.mrf.mxu1  ;;  %v934_v22 = vshll.u32 %v571_v15, 16  ;;  %v1381_v62 = vrot.slane %v1379_v17, 4  ;;  %v1382_v38 = vrot.slane %v571_v15, 5  ;;  %v2357_v59 = vor.u32 %v2356_v54, %v6670_v21  ;;  %v5729_v54 = vld [vmem:[%s5836_s11 + $0x10] sm:$0xf] }
 0x131   : > { %v1932_v53 = vadd.f32 %v1864_v43, %v1617_v51  ;;  %v1189_v30 = vadd.f32 %v1122_v4, %v6209_v42  ;;  %v1006_v42 = vunpack.c.l.b16 %v913_v56  ;;  %v2347_v56 = vor.u32 %v2346_v39, %v2343_v50 }
 0x132   : > { %v2548_v49 = vpop.f32.mrf.mxu0  ;;  %v2360_v4 = vshll.u32 %v5120_v35, 16  ;;  %v2450_v6 = vpack.c.b16 %v2432_v52, %v2431_v20  ;;  %v936_v32 = vrot.slane %v934_v22, 5  ;;  %v922_v0 = vrot.slane %v921_v33, 4  ;;  %v5730_v52 = vld [vmem:[%s5836_s11 + $0x14] sm:$0x1] }
 0x133   : > { %v1024_v29 = vpack.c.b16 %v1006_v42, %v1005_v57  ;;  %v932_v15 = vrot.slane %v931_v18, 4  ;;  %v1383_v41 = vsel %vm5980_vm5, %v1381_v62, %v1382_v38  ;;  %v2348_v50 = vrot.slane %v2347_v56, 4  ;;  %v572_v42 = vld [vmem:[%s5836_s11 + $0xb4] sm:$0xf]  ;;  %v5122_v62 = vld [vmem:[%s5836_s11 + $0xc4] sm:$0xf] }
 0x134   : > { %v2358_v39 = vrot.slane %v2357_v59, 4  ;;  %v2362_v57 = vrot.slane %v2360_v4, 5  ;;  %v2704_v20 = vrot.slane %v5729_v54, 5  ;;  %v2707_v22 = vrot.slane %v5730_v52, 5 }
 0x135   : > { %v927_v35 = vsel %vm5976_vm4, %v922_v0, %v6660_v34  ;;  %v1437_v33 = vunpack.c.l.b16 %v1383_v41  ;;  %v2353_v18 = vsel %vm5976_vm4, %v2348_v50, %v6670_v21 }
 0x136   : > { %v1551_v63 = vpop.f32.mrf.mxu2  ;;  %v1007_v59 = vunpack.c.l.b16 %v927_v35  ;;  %v2433_v0 = vunpack.c.l.b16 %v2353_v18  ;;  %v2706_v50 = vrot.slane %v2704_v20, 4 }
 0x137   : > { %v1618_v51 = vadd.f32 %v1551_v63, %v1189_v30  ;;  %v1866_v43 = vpop.f32.mrf.mxu3  ;;  %v1380_v30 = vsel %vm5980_vm5, %v4882_v37, %v1379_v17  ;;  %v6689_v17 = vld [vmem:[%s5836_s11 + $0xb8] sm:$0xf]  ;;  %v939_v63 = vshrl.u32 %v572_v42, 16  ;;  %v942_v37 = vshll.u32 %v572_v42, 16 }
 0x138   : > { %v1125_v47 = vpop.f32.mrf.mxu1  ;;  %v948_v34 = vshll.u32 %v6689_v17, 16 }
 0x139   : > { %v1933_v55 = vadd.f32 %v1866_v43, %v1618_v51  ;;  %v1190_v25 = vadd.f32 %v1125_v47, %v6237_v19  ;;  %v6683_v19 = vadd.f32 %v6623_v45, %v1932_v53  ;;  %v1436_v45 = vunpack.c.l.b16 %v1380_v30  ;;  %v5121_v53 = vld [vmem:[%s5836_s11 + $0xc0] sm:$0xf] }
 0x13a   : > { %v2551_v14 = vpop.f32.mrf.mxu0  ;;  %v2363_v51 = vsel %vm5976_vm4, %v2358_v39, %v2362_v57  ;;  %v952_v43 = vshrl.u32 %v6689_v17, 16  ;;  %v2365_v47 = vshrl.u32 %v5121_v53, 16  ;;  %v941_v30 = vrot.slane %v939_v63, 4  ;;  %v6708_v39 = vld [vmem:[%s5836_s11 + $0xbc] sm:$0x1] }
 0x13b   : > { %1164 = vmatmul.bf16.gmra.mxu1 %v1024_v29  ;;  %1593 = vmatmul.bf16.gmra.mxu2 %v1453_v61  ;;  %v6685_v13 = vadd.f32 %v2548_v49, %v1933_v55  ;;  %v937_v61 = vsel %vm5976_vm4, %v932_v15, %v936_v32  ;;  %v2374_v55 = vshll.u32 %v5122_v62, 16  ;;  %v2434_v15 = vunpack.c.l.b16 %v2363_v51 }
 0x13c   : > { %1908 = vmatmul.bf16.gmra.mxu3 %v5627_v12  ;;  %v1008_v4 = vunpack.c.l.b16 %v937_v61  ;;  %v2368_v12 = vshll.u32 %v5121_v53, 16  ;;  %v944_v41 = vrot.slane %v942_v37, 5  ;;  %v6710_v57 = vrot.slane %v948_v34, 5  ;;  %v5172_v61 = vld [vmem:[%s5836_s11 + $0xc] sm:$0xe] }
 0x13d   : > { %2590 = vmatmul.bf16.gmra.mxu0 %v2450_v6  ;;  %v954_v42 = vrot.slane %v952_v43, 4  ;;  %v1454_v52 = vpack.c.b16 %v1437_v33, %v1436_v45  ;;  %v6716_v18 = vrot.slane %v2374_v55, 5  ;;  %v5188_v37 = vrot.slane %v5172_v61, 9 }
 0x13e   : > { %v1554_v49 = vpop.f32.mrf.mxu2  ;;  %v2370_v35 = vrot.slane %v2368_v12, 5  ;;  %v1025_v53 = vpack.c.b16 %v1008_v4, %v1007_v59  ;;  %v958_v51 = vshll.u32 %v6708_v39, 16  ;;  %v1386_v34 = vrot.slane %v6689_v17, 5 }
 0x13f   : > { %v1619_v38 = vadd.f32 %v1554_v49, %v1190_v25  ;;  %v1869_v56 = vpop.f32.mrf.mxu3  ;;  %v2378_v25 = vshrl.u32 %v5122_v62, 16  ;;  %v1227_v49 = vld [vmem:[%s5836_s11 + $0xb4] sm:$0xe]  ;;  %v955_v33 = vor.u32 %v954_v42, %v6710_v57  ;;  %v2708_v59 = vsel %vm5980_vm5, %v2706_v50, %v2707_v22  ;;  %v5396_v22 = vld [vmem:[%s5836_s11 + $0x18] sm:$0xf] }
 0x140   : > { %v1127_v29 = vpop.f32.mrf.mxu1  ;;  %v4883_v12 = vrot.slane %v1227_v49, 9  ;;  %v6733_v50 = vld [vmem:[%s5836_s11 + $0x1c] sm:$0xf]  ;;  %v1388_v61 = vrot.slane %v1386_v34, 4 }
 0x141   : > { %v1934_v6 = vadd.f32 %v1869_v56, %v1619_v38  ;;  %v1191_v21 = vadd.f32 %v1127_v29, %v6270_v60  ;;  %v2367_v60 = vrot.slane %v2365_v47, 4  ;;  %v2380_v63 = vrot.slane %v2378_v25, 4  ;;  %v5628_v47 = vld [vmem:[%s5836_s11 + $0xb4] sm:$0xff] }
 0x142   : > { %v2553_v32 = vpop.f32.mrf.mxu0  ;;  %v2451_v38 = vpack.c.b16 %v2434_v15, %v2433_v0  ;;  %v945_v56 = vor.u32 %v944_v41, %v941_v30  ;;  %v2705_v29 = vsel %vm5980_vm5, %v5188_v37, %v2704_v20  ;;  %v2832_v25 = vunpack.c.l.b16 %v2708_v59 }
 0x143   : > { %v6712_v54 = vadd.f32 %v2551_v14, %v1934_v6  ;;  %v5123_v14 = vld [vmem:[%s5836_s11 + $0xc8] sm:$0x1]  ;;  %v2371_v6 = vor.u32 %v2370_v35, %v2367_v60  ;;  %v2831_v55 = vunpack.c.l.b16 %v2705_v29  ;;  %v2381_v15 = vor.u32 %v2380_v63, %v6716_v18 }
 0x144   : > { %v2384_v30 = vshll.u32 %v5123_v14, 16  ;;  %v960_v20 = vrot.slane %v958_v51, 5  ;;  %v946_v60 = vrot.slane %v945_v56, 4  ;;  %v956_v35 = vrot.slane %v955_v33, 4 }
 0x145   : > { %v6729_v41 = vpack.c.b16 %v2832_v25, %v2831_v55  ;;  %v1387_v49 = vsel %vm5980_vm5, %v4883_v12, %v1386_v34  ;;  %v2372_v63 = vrot.slane %v2371_v6, 4  ;;  %v2382_v37 = vrot.slane %v2381_v15, 4 }
 0x146   : > { %v1556_v62 = vpop.f32.mrf.mxu2  ;;  %v3431_v51 = vshll.u32 %v5396_v22, 16  ;;  %v3437_v14 = vshll.u32 %v6733_v50, 16  ;;  %v961_v34 = vsel %vm5976_vm4, %v956_v35, %v960_v20  ;;  %v1438_v33 = vunpack.c.l.b16 %v1387_v49 }
 0x147   : > { %v1620_v43 = vadd.f32 %v1556_v62, %v1191_v21  ;;  %v1871_v45 = vpop.f32.mrf.mxu3  ;;  %v3428_v62 = vshrl.u32 %v5396_v22, 16 }
 0x148   : > { %v1130_v4 = vpop.f32.mrf.mxu1  ;;  %v3433_v6 = vrot.slane %v3431_v51, 5  ;;  %v3439_v55 = vrot.slane %v3437_v14, 5  ;;  %v5492_v14 = vld [vmem:[%s5836_s11 + $0x18] sm:$0xe] }
 0x149   : > { %v1935_v17 = vadd.f32 %v1871_v45, %v1620_v43  ;;  %v1192_v21 = vadd.f32 %v1130_v4, %v6289_v40  ;;  %v1389_v40 = vrot.slane %v6708_v39, 5  ;;  %v951_v39 = vsel %vm5976_vm4, %v946_v60, %v6710_v57 }
 0x14a   : > { %v2556_v0 = vpop.f32.mrf.mxu0  ;;  %v3430_v57 = vrot.slane %v3428_v62, 4  ;;  %v5629_v62 = vld [vmem:[%s5836_s11 + $0xc0] sm:$0xff] }
 0x14b   : > { %1169 = vmatmul.bf16.gmra.mxu1 %v1025_v53  ;;  %1598 = vmatmul.bf16.gmra.mxu2 %v1454_v52  ;;  %v6735_v42 = vadd.f32 %v2553_v32, %v1935_v17  ;;  %v2386_v53 = vrot.slane %v2384_v30, 5  ;;  %v3441_v32 = vshrl.u32 %v6733_v50, 16  ;;  %v1390_v45 = vsel %vm5980_vm5, %v1388_v61, %v1389_v40  ;;  %v5398_v30 = vld [vmem:[%s5836_s11 + $0x20] sm:$0x1] }
 0x14c   : > { %1913 = vmatmul.bf16.gmra.mxu3 %v5628_v47  ;;  %v2377_v47 = vsel %vm5976_vm4, %v2372_v63, %v6716_v18  ;;  %v1009_v17 = vunpack.c.l.b16 %v951_v39  ;;  %v1439_v15 = vunpack.c.l.b16 %v1390_v45  ;;  %v3434_v35 = vor.u32 %v3433_v6, %v3430_v57 }
 0x14d   : > { %2595 = vmatmul.bf16.gmra.mxu0 %v2451_v38  ;;  %v2387_v12 = vsel %vm5976_vm4, %v2382_v37, %v2386_v53  ;;  %v3443_v25 = vrot.slane %v3441_v32, 4  ;;  %v3447_v61 = vshll.u32 %v5398_v30, 16  ;;  %v4127_v53 = vrot.slane %v6733_v50, 5  ;;  %v5399_v50 = vld [vmem:[%s5836_s11 + $0x24] sm:$0xf] }
 0x14e   : > { %v1559_v52 = vpop.f32.mrf.mxu2  ;;  %v2436_v22 = vunpack.c.l.b16 %v2387_v12  ;;  %v1455_v37 = vpack.c.b16 %v1439_v15, %v1438_v33  ;;  %v4130_v33 = vrot.slane %v5398_v30, 5  ;;  %v3455_v15 = vshll.u32 %v5399_v50, 16 }
 0x14f   : > { %v1621_v43 = vadd.f32 %v1559_v52, %v1192_v21  ;;  %v1874_v38 = vpop.f32.mrf.mxu3  ;;  %v1010_v21 = vunpack.c.l.b16 %v961_v34  ;;  %v3444_v18 = vor.u32 %v3443_v25, %v3439_v55  ;;  %v3449_v39 = vrot.slane %v3447_v61, 5 }
 0x150   : > { %v1132_v56 = vpop.f32.mrf.mxu1  ;;  %v5508_v34 = vrot.slane %v5492_v14, 9  ;;  %v4129_v45 = vrot.slane %v4127_v53, 4 }
 0x151   : > { %v1936_v29 = vadd.f32 %v1874_v38, %v1621_v43  ;;  %v1193_v59 = vadd.f32 %v1132_v56, %v6328_v28  ;;  %v2435_v28 = vunpack.c.l.b16 %v2377_v47  ;;  %v1026_v63 = vpack.c.b16 %v1010_v21, %v1009_v17 }
 0x152   : > { %v2558_v4 = vpop.f32.mrf.mxu0  ;;  %v3435_v38 = vrot.slane %v3434_v35, 4  ;;  %v3445_v56 = vrot.slane %v3444_v18, 4  ;;  %v4128_v25 = vsel %vm5980_vm5, %v5508_v34, %v4127_v53  ;;  %v3452_v21 = vshrl.u32 %v5399_v50, 16 }
 0x153   : > { %v6756_v20 = vadd.f32 %v2556_v0, %v1936_v29  ;;  %v2452_v51 = vpack.c.b16 %v2436_v22, %v2435_v28  ;;  %v4254_v61 = vunpack.c.l.b16 %v4128_v25 }
 0x154   : > { %v3450_v6 = vsel %vm5976_vm4, %v3445_v56, %v3449_v39 }
 0x155   : > { %v3829_v18 = vunpack.c.l.b16 %v3450_v6  ;;  %v5493_v6 = vld [vmem:[%s5836_s11 + $0x24] sm:$0xe] }
 0x156   : > { %v1561_v60 = vpop.f32.mrf.mxu2 }
 0x157   : > { %v1622_v40 = vadd.f32 %v1561_v60, %v1193_v59  ;;  %v1876_v49 = vpop.f32.mrf.mxu3  ;;  %v6766_v59 = vld [vmem:[%s5836_s11 + $0x28] sm:$0xf] }
 0x158   : > { %v1135_v52 = vpop.f32.mrf.mxu1  ;;  %v3461_v30 = vshll.u32 %v6766_v59, 16  ;;  %v3465_v28 = vshrl.u32 %v6766_v59, 16 }
 0x159   : > { %v1937_v0 = vadd.f32 %v1876_v49, %v1622_v40  ;;  %v1194_v32 = vadd.f32 %v1135_v52, %v6359_v24  ;;  %v3440_v24 = vsel %vm5976_vm4, %v3435_v38, %v3439_v55  ;;  %v5731_v38 = vld [vmem:[%s5836_s11 + $0x1c] sm:$0xf] }
 0x15a   : > { %v2561_v43 = vpop.f32.mrf.mxu0  ;;  %v3828_v35 = vunpack.c.l.b16 %v3440_v24  ;;  %v6781_v53 = vrot.slane %v3461_v30, 5  ;;  %v3467_v52 = vrot.slane %v3465_v28, 4  ;;  %v2711_v56 = vrot.slane %v5731_v38, 5  ;;  %v5732_v30 = vld [vmem:[%s5836_s11 + $0x20] sm:$0x1] }
 0x15b   : > { %1174 = vmatmul.bf16.gmra.mxu1 %v1026_v63  ;;  %1603 = vmatmul.bf16.gmra.mxu2 %v1455_v37  ;;  %v6762_v29 = vadd.f32 %v2558_v4, %v1937_v0  ;;  %v4131_v4 = vsel %vm5980_vm5, %v4129_v45, %v4130_v33  ;;  %v3454_v63 = vrot.slane %v3452_v21, 4  ;;  %v3457_v37 = vrot.slane %v3455_v15, 5  ;;  %v6794_v21 = vld [vmem:[%s5836_s11 + $0x34] sm:$0xf] }
 0x15c   : > { %1918 = vmatmul.bf16.gmra.mxu3 %v5629_v62  ;;  %v4255_v40 = vunpack.c.l.b16 %v4131_v4  ;;  %v5401_v62 = vld [vmem:[%s5836_s11 + $0x2c] sm:$0x1]  ;;  %v3468_v33 = vor.u32 %v3467_v52, %v6781_v53  ;;  %v2713_v4 = vrot.slane %v2711_v56, 4  ;;  %v2714_v28 = vrot.slane %v5732_v30, 5 }
 0x15d   : > { %2600 = vmatmul.bf16.gmra.mxu0 %v2452_v51  ;;  %v3458_v45 = vor.u32 %v3457_v37, %v3454_v63  ;;  %v3471_v50 = vshll.u32 %v5401_v62, 16  ;;  %v3485_v63 = vshll.u32 %v6794_v21, 16  ;;  %v3489_v37 = vshrl.u32 %v6794_v21, 16 }
 0x15e   : > { %v1564_v47 = vpop.f32.mrf.mxu2  ;;  %v4286_v34 = vpack.c.b16 %v4255_v40, %v4254_v61 }
 0x15f   : > { %v1623_v12 = vadd.f32 %v1564_v47, %v1194_v32  ;;  %v1879_v57 = vpop.f32.mrf.mxu3  ;;  %v3860_v32 = vpack.c.b16 %v3829_v18, %v3828_v35  ;;  %v5509_v35 = vrot.slane %v5493_v6, 9  ;;  %v4137_v18 = vrot.slane %v5401_v62, 5 }
 0x160   : > { %v1137_v17 = vpop.f32.mrf.mxu1 }
 0x161   : > { %v1938_v55 = vadd.f32 %v1879_v57, %v1623_v12  ;;  %v1195_v22 = vadd.f32 %v1137_v17, %v6396_v16  ;;  %v5654_v16 = vld [vmem:[%s5836_s11 + $0x18] sm:$0xff]  ;;  %v4134_v57 = vrot.slane %v6766_v59, 5  ;;  %v5402_v17 = vld [vmem:[%s5836_s11 + $0x30] sm:$0xf] }
 0x162   : > { %v2563_v60 = vpop.f32.mrf.mxu0  ;;  %v3479_v40 = vshll.u32 %v5402_v17, 16 }
 0x163   : > { %v6779_v49 = vadd.f32 %v2561_v43, %v1938_v55  ;;  %v5173_v43 = vld [vmem:[%s5836_s11 + $0x18] sm:$0xe]  ;;  %v3459_v55 = vrot.slane %v3458_v45, 4  ;;  %v4136_v59 = vrot.slane %v4134_v57, 4 }
 0x164   : > { %v5189_v25 = vrot.slane %v5173_v43, 9  ;;  %v3481_v45 = vrot.slane %v3479_v40, 5 }
 0x165   : > { %v3464_v62 = vsel %vm5976_vm4, %v3459_v55, %v6781_v53  ;;  %v3491_v53 = vrot.slane %v3489_v37, 4  ;;  %v5174_v55 = vld [vmem:[%s5836_s11 + $0x24] sm:$0xe] }
 0x166   : > { %v1566_v51 = vpop.f32.mrf.mxu2 }
 0x167   : > { %v1624_v14 = vadd.f32 %v1566_v51, %v1195_v22  ;;  %v1881_v0 = vpop.f32.mrf.mxu3  ;;  %v3473_v22 = vrot.slane %v3471_v50, 5 }
 0x168   : > { %v1140_v39 = vpop.f32.mrf.mxu1 }
 0x169   : > { %v1939_v47 = vadd.f32 %v1881_v0, %v1624_v14  ;;  %v1196_v24 = vadd.f32 %v1140_v39, %v6193_v31  ;;  %v3469_v31 = vrot.slane %v3468_v33, 4  ;;  %v2712_v14 = vsel %vm5980_vm5, %v5189_v25, %v2711_v56 }
 0x16a   : > { %v2566_v12 = vpop.f32.mrf.mxu0  ;;  %v2715_v0 = vsel %vm5980_vm5, %v2713_v4, %v2714_v28  ;;  %v4138_v56 = vsel %vm5980_vm5, %v4136_v59, %v4137_v18  ;;  %v6815_v33 = vrot.slane %v3485_v63, 5  ;;  %v2833_v50 = vunpack.c.l.b16 %v2712_v14 }
 0x16b   : > { %2951 = vmatmul.bf16.vlgmr.msra.gmra.mxu1 %v6729_v41  ;;  %3266 = vmatmul.bf16.vlgmr.msra.gmra.mxu2 %v5654_v16  ;;  %v6796_v15 = vadd.f32 %v2563_v60, %v1939_v47  ;;  %v3476_v41 = vshrl.u32 %v5402_v17, 16  ;;  %v3474_v16 = vsel %vm5976_vm4, %v3469_v31, %v3473_v22  ;;  %v2834_v47 = vunpack.c.l.b16 %v2715_v0 }
 0x16c   : > { %3948 = vmatmul.bf16.vlgmr.msra.gmra.mxu3 %v3860_v32  ;;  %v3831_v25 = vunpack.c.l.b16 %v3474_v16  ;;  %v4257_v17 = vunpack.c.l.b16 %v4138_v56  ;;  %v3492_v22 = vor.u32 %v3491_v53, %v6815_v33  ;;  %v5190_v0 = vrot.slane %v5174_v55, 9  ;;  %v5734_v16 = vld [vmem:[%s5836_s11 + $0x2c] sm:$0x1] }
 0x16d   : > { %4374 = vmatmul.bf16.vlgmr.msra.gmra.mxu0 %v4286_v34  ;;  %v4135_v34 = vsel %vm5980_vm5, %v5509_v35, %v4134_v57  ;;  %v3478_v43 = vrot.slane %v3476_v41, 4  ;;  %v5733_v57 = vld [vmem:[%s5836_s11 + $0x28] sm:$0xf] }
 0x16e   : > { %v1569_v61 = vpop.f32.mrf.mxu2  ;;  %v4256_v4 = vunpack.c.l.b16 %v4135_v34  ;;  %v2718_v30 = vrot.slane %v5733_v57, 5  ;;  %v5655_v41 = vld [vmem:[%s5836_s11 + $0x24] sm:$0xff]  ;;  %v3493_v34 = vrot.slane %v3492_v22, 4 }
 0x16f   : > { %v1625_v52 = vadd.f32 %v1569_v61, %v1196_v24  ;;  %v1884_v60 = vpop.f32.mrf.mxu3  ;;  %v5404_v24 = vld [vmem:[%s5836_s11 + $0x38] sm:$0x1]  ;;  %v3482_v31 = vor.u32 %v3481_v45, %v3478_v43  ;;  %v2864_v61 = vpack.c.b16 %v2834_v47, %v2833_v50  ;;  %v6832_v50 = vld [vmem:[%s5836_s11 + $0x40] sm:$0xf] }
 0x170   : > { %v1142_v51 = vpop.f32.mrf.mxu1  ;;  %v3495_v35 = vshll.u32 %v5404_v24, 16  ;;  %v4287_v37 = vpack.c.b16 %v4257_v17, %v4256_v4  ;;  %v4144_v45 = vrot.slane %v5404_v24, 5  ;;  %v3509_v22 = vshll.u32 %v6832_v50, 16 }
 0x171   : > { %v1940_v32 = vadd.f32 %v1884_v60, %v1625_v52  ;;  %v1197_v38 = vadd.f32 %v1142_v51, %v6226_v7  ;;  %v3830_v7 = vunpack.c.l.b16 %v3464_v62  ;;  %v5494_v52 = vld [vmem:[%s5836_s11 + $0x30] sm:$0xe]  ;;  %v2720_v62 = vrot.slane %v2718_v30, 4 }
 0x172   : > { %v2568_v39 = vpop.f32.mrf.mxu0  ;;  %v3497_v56 = vrot.slane %v3495_v35, 5  ;;  %v3513_v35 = vshrl.u32 %v6832_v50, 16 }
 0x173   : > { %v6818_v6 = vadd.f32 %v2566_v12, %v1940_v32  ;;  %v4141_v12 = vrot.slane %v6794_v21, 5  ;;  %v3861_v63 = vpack.c.b16 %v3831_v25, %v3830_v7  ;;  %v2721_v32 = vrot.slane %v5734_v16, 5  ;;  %v5407_v16 = vld [vmem:[%s5836_s11 + $0x44] sm:$0x1] }
 0x174   : > { %v5510_v21 = vrot.slane %v5494_v52, 9  ;;  %v2719_v7 = vsel %vm5980_vm5, %v5190_v0, %v2718_v30  ;;  %v6852_v0 = vrot.slane %v3509_v22, 5  ;;  %v6864_v22 = vld [vmem:[%s5836_s11 + $0x4c] sm:$0xf] }
 0x175   : > { %v4143_v43 = vrot.slane %v4141_v12, 4  ;;  %v2722_v25 = vsel %vm5980_vm5, %v2720_v62, %v2721_v32  ;;  %v3515_v62 = vrot.slane %v3513_v35, 4 }
 0x176   : > { %v1571_v28 = vpop.f32.mrf.mxu2  ;;  %v4142_v57 = vsel %vm5980_vm5, %v5510_v21, %v4141_v12 }
 0x177   : > { %v1626_v59 = vadd.f32 %v1571_v28, %v1197_v38  ;;  %v1886_v18 = vpop.f32.mrf.mxu3  ;;  %v3483_v38 = vrot.slane %v3482_v31, 4  ;;  %v4145_v28 = vsel %vm5980_vm5, %v4143_v43, %v4144_v45  ;;  %v5735_v43 = vld [vmem:[%s5836_s11 + $0x34] sm:$0xf] }
 0x178   : > { %v1145_v40 = vpop.f32.mrf.mxu1  ;;  %v2725_v45 = vrot.slane %v5735_v43, 5 }
 0x179   : > { %v1941_v60 = vadd.f32 %v1886_v18, %v1626_v59  ;;  %v1198_v51 = vadd.f32 %v1145_v40, %v6259_v48  ;;  %v5405_v48 = vld [vmem:[%s5836_s11 + $0x3c] sm:$0xf]  ;;  %v3488_v4 = vsel %vm5976_vm4, %v3483_v38, %v6815_v33 }
 0x17a   : > { %v2571_v14 = vpop.f32.mrf.mxu0  ;;  %v3500_v30 = vshrl.u32 %v5405_v48, 16  ;;  %v3503_v31 = vshll.u32 %v5405_v48, 16  ;;  %v3832_v40 = vunpack.c.l.b16 %v3488_v4  ;;  %v3519_v4 = vshll.u32 %v5407_v16, 16 }
 0x17b   : > { %2956 = vmatmul.bf16.gmra.mxu1 %v2864_v61  ;;  %3271 = vmatmul.bf16.gmra.mxu2 %v5655_v41  ;;  %v6828_v53 = vadd.f32 %v2568_v39, %v1941_v60  ;;  %v3498_v39 = vsel %vm5976_vm4, %v3493_v34, %v3497_v56  ;;  %v2835_v61 = vunpack.c.l.b16 %v2719_v7  ;;  %v2836_v41 = vunpack.c.l.b16 %v2722_v25  ;;  %v5656_v56 = vld [vmem:[%s5836_s11 + $0x30] sm:$0xff] }
 0x17c   : > { %3953 = vmatmul.bf16.gmra.mxu3 %v3861_v63  ;;  %v3833_v12 = vunpack.c.l.b16 %v3498_v39  ;;  %v4258_v63 = vunpack.c.l.b16 %v4142_v57  ;;  %v3502_v60 = vrot.slane %v3500_v30, 4  ;;  %v3516_v25 = vor.u32 %v3515_v62, %v6852_v0 }
 0x17d   : > { %4379 = vmatmul.bf16.gmra.mxu0 %v4287_v37  ;;  %v4259_v37 = vunpack.c.l.b16 %v4145_v28  ;;  %v2865_v34 = vpack.c.b16 %v2836_v41, %v2835_v61  ;;  %v4148_v57 = vrot.slane %v6832_v50, 5  ;;  %v5495_v28 = vld [vmem:[%s5836_s11 + $0x3c] sm:$0xe]  ;;  %v2727_v30 = vrot.slane %v2725_v45, 4 }
 0x17e   : > { %v1574_v47 = vpop.f32.mrf.mxu2  ;;  %v3862_v21 = vpack.c.b16 %v3833_v12, %v3832_v40  ;;  %v3517_v41 = vrot.slane %v3516_v25, 4  ;;  %v5511_v40 = vrot.slane %v5495_v28, 9  ;;  %v4151_v50 = vrot.slane %v5407_v16, 5 }
 0x17f   : > { %v1627_v17 = vadd.f32 %v1574_v47, %v1198_v51  ;;  %v1889_v24 = vpop.f32.mrf.mxu3  ;;  %v3505_v51 = vrot.slane %v3503_v31, 5  ;;  %v5175_v47 = vld [vmem:[%s5836_s11 + $0x30] sm:$0xe]  ;;  %v5408_v31 = vld [vmem:[%s5836_s11 + $0x48] sm:$0xf]  ;;  %v4150_v12 = vrot.slane %v4148_v57, 4 }
 0x180   : > { %v1147_v55 = vpop.f32.mrf.mxu1  ;;  %v3537_v62 = vshrl.u32 %v6864_v22, 16 }
 0x181   : > { %v1942_v33 = vadd.f32 %v1889_v24, %v1627_v17  ;;  %v1199_v59 = vadd.f32 %v1147_v55, %v6281_v26  ;;  %v3506_v7 = vor.u32 %v3505_v51, %v3502_v60  ;;  %v5191_v55 = vrot.slane %v5175_v47, 9 }
 0x182   : > { %v2573_v18 = vpop.f32.mrf.mxu0  ;;  %v3527_v60 = vshll.u32 %v5408_v31, 16  ;;  %v3533_v51 = vshll.u32 %v6864_v22, 16 }
 0x183   : > { %v6850_v52 = vadd.f32 %v2571_v14, %v1942_v33  ;;  %v4288_v14 = vpack.c.b16 %v4259_v37, %v4258_v63  ;;  %v5736_v33 = vld [vmem:[%s5836_s11 + $0x38] sm:$0x1]  ;;  %v3507_v61 = vrot.slane %v3506_v7, 4  ;;  %v3524_v37 = vshrl.u32 %v5408_v31, 16 }
 0x184   : > { %v3529_v7 = vrot.slane %v3527_v60, 5  ;;  %v6885_v25 = vrot.slane %v3533_v51, 5 }
 0x185   : > { %v3512_v16 = vsel %vm5976_vm4, %v3507_v61, %v6852_v0  ;;  %v3526_v47 = vrot.slane %v3524_v37, 4  ;;  %v3539_v0 = vrot.slane %v3537_v62, 4  ;;  %v5176_v61 = vld [vmem:[%s5836_s11 + $0x3c] sm:$0xe] }
 0x186   : > { %v1576_v32 = vpop.f32.mrf.mxu2  ;;  %v5657_v37 = vld [vmem:[%s5836_s11 + $0x3c] sm:$0xff] }
 0x187   : > { %v1628_v26 = vadd.f32 %v1576_v32, %v1199_v59  ;;  %v1891_v38 = vpop.f32.mrf.mxu3  ;;  %v2728_v59 = vrot.slane %v5736_v33, 5 }
 0x188   : > { %v1150_v48 = vpop.f32.mrf.mxu1 }
 0x189   : > { %v1943_v17 = vadd.f32 %v1891_v38, %v1628_v26  ;;  %v1200_v24 = vadd.f32 %v1150_v48, %v6317_v11  ;;  %v3521_v11 = vrot.slane %v3519_v4, 5  ;;  %v2726_v38 = vsel %vm5980_vm5, %v5191_v55, %v2725_v45 }
 0x18a   : > { %v2576_v39 = vpop.f32.mrf.mxu0  ;;  %v4152_v45 = vsel %vm5980_vm5, %v4150_v12, %v4151_v50  ;;  %v2837_v4 = vunpack.c.l.b16 %v2726_v38 }
 0x18b   : > { %2961 = vmatmul.bf16.gmra.mxu1 %v2865_v34  ;;  %3276 = vmatmul.bf16.gmra.mxu2 %v5656_v56  ;;  %v6866_v35 = vadd.f32 %v2573_v18, %v1943_v17  ;;  %v2729_v34 = vsel %vm5980_vm5, %v2727_v30, %v2728_v59  ;;  %v3522_v56 = vsel %vm5976_vm4, %v3517_v41, %v3521_v11  ;;  %v4261_v31 = vunpack.c.l.b16 %v4152_v45 }
 0x18c   : > { %3958 = vmatmul.bf16.gmra.mxu3 %v3862_v21  ;;  %v2838_v17 = vunpack.c.l.b16 %v2729_v34  ;;  %v3835_v55 = vunpack.c.l.b16 %v3522_v56  ;;  %v3530_v41 = vor.u32 %v3529_v7, %v3526_v47  ;;  %v3540_v11 = vor.u32 %v3539_v0, %v6885_v25  ;;  %v5738_v56 = vld [vmem:[%s5836_s11 + $0x44] sm:$0x1] }
 0x18d   : > { %4384 = vmatmul.bf16.gmra.mxu0 %v4288_v14  ;;  %v4149_v14 = vsel %vm5980_vm5, %v5511_v40, %v4148_v57  ;;  %v5737_v57 = vld [vmem:[%s5836_s11 + $0x40] sm:$0xf]  ;;  %v5192_v34 = vrot.slane %v5176_v61, 9 }
 0x18e   : > { %v1579_v63 = vpop.f32.mrf.mxu2  ;;  %v4260_v30 = vunpack.c.l.b16 %v4149_v14  ;;  %v2732_v33 = vrot.slane %v5737_v57, 5  ;;  %v3541_v14 = vrot.slane %v3540_v11, 4 }
 0x18f   : > { %v1629_v32 = vadd.f32 %v1579_v63, %v1200_v24  ;;  %v1894_v18 = vpop.f32.mrf.mxu3  ;;  %v5410_v24 = vld [vmem:[%s5836_s11 + $0x50] sm:$0x1]  ;;  %v2866_v63 = vpack.c.b16 %v2838_v17, %v2837_v4  ;;  %v6902_v4 = vld [vmem:[%s5836_s11 + $0x58] sm:$0xf] }
 0x190   : > { %v1152_v26 = vpop.f32.mrf.mxu1  ;;  %v3543_v40 = vshll.u32 %v5410_v24, 16  ;;  %v4289_v62 = vpack.c.b16 %v4261_v31, %v4260_v30  ;;  %v4158_v7 = vrot.slane %v5410_v24, 5  ;;  %v3557_v11 = vshll.u32 %v6902_v4, 16 }
 0x191   : > { %v1944_v21 = vadd.f32 %v1894_v18, %v1629_v32  ;;  %v1201_v43 = vadd.f32 %v1152_v26, %v6350_v2  ;;  %v3834_v2 = vunpack.c.l.b16 %v3512_v16  ;;  %v5496_v32 = vld [vmem:[%s5836_s11 + $0x48] sm:$0xe]  ;;  %v2734_v16 = vrot.slane %v2732_v33, 4 }
 0x192   : > { %v2578_v48 = vpop.f32.mrf.mxu0  ;;  %v3545_v45 = vrot.slane %v3543_v40, 5  ;;  %v3561_v40 = vshrl.u32 %v6902_v4, 16 }
 0x193   : > { %v6888_v28 = vadd.f32 %v2576_v39, %v1944_v21  ;;  %v4155_v39 = vrot.slane %v6864_v22, 5  ;;  %v3863_v51 = vpack.c.b16 %v3835_v55, %v3834_v2  ;;  %v2735_v21 = vrot.slane %v5738_v56, 5  ;;  %v5413_v56 = vld [vmem:[%s5836_s11 + $0x5c] sm:$0x1] }
 0x194   : > { %v5512_v22 = vrot.slane %v5496_v32, 9  ;;  %v2733_v2 = vsel %vm5980_vm5, %v5192_v34, %v2732_v33  ;;  %v6922_v34 = vrot.slane %v3557_v11, 5  ;;  %v6934_v11 = vld [vmem:[%s5836_s11 + $0x64] sm:$0xf] }
 0x195   : > { %v4157_v47 = vrot.slane %v4155_v39, 4  ;;  %v2736_v55 = vsel %vm5980_vm5, %v2734_v16, %v2735_v21  ;;  %v3563_v16 = vrot.slane %v3561_v40, 4 }
 0x196   : > { %v1581_v59 = vpop.f32.mrf.mxu2  ;;  %v4156_v57 = vsel %vm5980_vm5, %v5512_v22, %v4155_v39 }
 0x197   : > { %v1630_v12 = vadd.f32 %v1581_v59, %v1201_v43  ;;  %v1896_v50 = vpop.f32.mrf.mxu3  ;;  %v3531_v43 = vrot.slane %v3530_v41, 4  ;;  %v4159_v59 = vsel %vm5980_vm5, %v4157_v47, %v4158_v7  ;;  %v5739_v47 = vld [vmem:[%s5836_s11 + $0x4c] sm:$0xf] }
 0x198   : > { %v1155_v60 = vpop.f32.mrf.mxu1  ;;  %v2739_v7 = vrot.slane %v5739_v47, 5  ;;  %v7361_v47 = vld [vmem:[#allocation2_spill] sm:$0xff] }
 0x199   : > { %v1945_v18 = vadd.f32 %v1896_v50, %v1630_v12  ;;  %v1202_v26 = vadd.f32 %v1155_v60, %v6383_v1  ;;  %v5411_v1 = vld [vmem:[%s5836_s11 + $0x54] sm:$0xf]  ;;  %v3536_v30 = vsel %vm5976_vm4, %v3531_v43, %v6885_v25 }
 0x19a   : > { %v2581_v38 = vpop.f32.mrf.mxu0  ;;  %v3548_v33 = vshrl.u32 %v5411_v1, 16  ;;  %v3551_v41 = vshll.u32 %v5411_v1, 16  ;;  %v3836_v60 = vunpack.c.l.b16 %v3536_v30  ;;  %v3567_v30 = vshll.u32 %v5413_v56, 16 }
 0x19b   : > { %2966 = vmatmul.bf16.gmra.mxu1 %v2866_v63  ;;  %3281 = vmatmul.bf16.gmra.mxu2 %v5657_v37  ;;  %v6898_v0 = vadd.f32 %v2578_v48, %v1945_v18  ;;  %v3546_v48 = vsel %vm5976_vm4, %v3541_v14, %v3545_v45  ;;  %v2839_v63 = vunpack.c.l.b16 %v2733_v2  ;;  %v2840_v37 = vunpack.c.l.b16 %v2736_v55  ;;  %v5658_v45 = vld [vmem:[%s5836_s11 + $0x48] sm:$0xff] }
 0x19c   : > { %3963 = vmatmul.bf16.gmra.mxu3 %v3863_v51  ;;  %v3837_v39 = vunpack.c.l.b16 %v3546_v48  ;;  %v4262_v51 = vunpack.c.l.b16 %v4156_v57  ;;  %v3550_v18 = vrot.slane %v3548_v33, 4  ;;  %v3564_v55 = vor.u32 %v3563_v16, %v6922_v34 }
 0x19d   : > { %4389 = vmatmul.bf16.gmra.mxu0 %v4289_v62  ;;  %v4263_v62 = vunpack.c.l.b16 %v4159_v59  ;;  %v2867_v14 = vpack.c.b16 %v2840_v37, %v2839_v63  ;;  %v4162_v57 = vrot.slane %v6902_v4, 5  ;;  %v5497_v59 = vld [vmem:[%s5836_s11 + $0x54] sm:$0xe]  ;;  %v2741_v33 = vrot.slane %v2739_v7, 4 }
 0x19e   : > { %v1584_v17 = vpop.f32.mrf.mxu2  ;;  %v3864_v22 = vpack.c.b16 %v3837_v39, %v3836_v60  ;;  %v3565_v37 = vrot.slane %v3564_v55, 4  ;;  %v5513_v60 = vrot.slane %v5497_v59, 9  ;;  %v4165_v4 = vrot.slane %v5413_v56, 5  ;;  %v5416_v59 = vld [vmem:[%s5836_s11 + $0x68] sm:$0x1] }
 0x19f   : > { %v1631_v31 = vadd.f32 %v1584_v17, %v1202_v26  ;;  %v1899_v24 = vpop.f32.mrf.mxu3  ;;  %v3553_v26 = vrot.slane %v3551_v41, 5  ;;  %v5177_v17 = vld [vmem:[%s5836_s11 + $0x48] sm:$0xe]  ;;  %v5414_v41 = vld [vmem:[%s5836_s11 + $0x60] sm:$0xf]  ;;  %v4164_v39 = vrot.slane %v4162_v57, 4 }
 0x1a0   : > { %v1157_v61 = vpop.f32.mrf.mxu1  ;;  %v3585_v16 = vshrl.u32 %v6934_v11, 16 }
 0x1a1   : > { %v1946_v25 = vadd.f32 %v1899_v24, %v1631_v31  ;;  %v1203_v12 = vadd.f32 %v1157_v61, %v6410_v5  ;;  %v3554_v2 = vor.u32 %v3553_v26, %v3550_v18  ;;  %v5193_v61 = vrot.slane %v5177_v17, 9 }
 0x1a2   : > { %v2583_v50 = vpop.f32.mrf.mxu0  ;;  %v3575_v18 = vshll.u32 %v5414_v41, 16  ;;  %v3581_v26 = vshll.u32 %v6934_v11, 16  ;;  %v4163_v17 = vsel %vm5980_vm5, %v5513_v60, %v4162_v57  ;;  %v5741_v57 = vld [vmem:[%s5836_s11 + $0x58] sm:$0xf] }
 0x1a3   : > { %v6920_v32 = vadd.f32 %v2581_v38, %v1946_v25  ;;  %v4290_v38 = vpack.c.b16 %v4263_v62, %v4262_v51  ;;  %v5740_v25 = vld [vmem:[%s5836_s11 + $0x50] sm:$0x1]  ;;  %v3555_v63 = vrot.slane %v3554_v2, 4  ;;  %v3572_v62 = vshrl.u32 %v5414_v41, 16 }
 0x1a4   : > { %v3577_v55 = vrot.slane %v3575_v18, 5 }
 0x1a5   : > { %v3560_v56 = vsel %vm5976_vm4, %v3555_v63, %v6922_v34  ;;  %v3574_v2 = vrot.slane %v3572_v62, 4  ;;  %v3587_v34 = vrot.slane %v3585_v16, 4  ;;  %v2746_v63 = vrot.slane %v5741_v57, 5 }
 0x1a6   : > { %v1586_v21 = vpop.f32.mrf.mxu2 }
 0x1a7   : > { %v1632_v5 = vadd.f32 %v1586_v21, %v1203_v12  ;;  %v1901_v43 = vpop.f32.mrf.mxu3  ;;  %v2742_v12 = vrot.slane %v5740_v25, 5  ;;  %v4264_v25 = vunpack.c.l.b16 %v4163_v17  ;;  %v3578_v60 = vor.u32 %v3577_v55, %v3574_v2  ;;  %v5742_v17 = vld [vmem:[%s5836_s11 + $0x5c] sm:$0x1] }
 0x1a8   : > { %v1160_v1 = vpop.f32.mrf.mxu1 }
 0x1a9   : > { %v1947_v31 = vadd.f32 %v1901_v43, %v1632_v5  ;;  %v1204_v24 = vadd.f32 %v1160_v1, %v6198_v36  ;;  %v3569_v36 = vrot.slane %v3567_v30, 5  ;;  %v2740_v43 = vsel %vm5980_vm5, %v5193_v61, %v2739_v7 }
 0x1aa   : > { %v2586_v48 = vpop.f32.mrf.mxu0  ;;  %v4166_v7 = vsel %vm5980_vm5, %v4164_v39, %v4165_v4  ;;  %v6955_v30 = vrot.slane %v3581_v26, 5  ;;  %v3591_v4 = vshll.u32 %v5416_v59, 16  ;;  %v5659_v26 = vld [vmem:[%s5836_s11 + $0x54] sm:$0xff] }
 0x1ab   : > { %2971 = vmatmul.bf16.gmra.mxu1 %v2867_v14  ;;  %3286 = vmatmul.bf16.gmra.mxu2 %v5658_v45  ;;  %v6936_v40 = vadd.f32 %v2583_v50, %v1947_v31  ;;  %v2743_v14 = vsel %vm5980_vm5, %v2741_v33, %v2742_v12  ;;  %v3570_v45 = vsel %vm5976_vm4, %v3565_v37, %v3569_v36  ;;  %v2841_v31 = vunpack.c.l.b16 %v2740_v43  ;;  %v5178_v36 = vld [vmem:[%s5836_s11 + $0x54] sm:$0xe] }
 0x1ac   : > { %3968 = vmatmul.bf16.gmra.mxu3 %v3864_v22  ;;  %v3838_v33 = vunpack.c.l.b16 %v3560_v56  ;;  %v3839_v41 = vunpack.c.l.b16 %v3570_v45  ;;  %v4265_v12 = vunpack.c.l.b16 %v4166_v7  ;;  %v3588_v39 = vor.u32 %v3587_v34, %v6955_v30 }
 0x1ad   : > { %4394 = vmatmul.bf16.gmra.mxu0 %v4290_v38  ;;  %v2749_v7 = vrot.slane %v5742_v17, 5  ;;  %v3593_v55 = vrot.slane %v3591_v4, 5 }
 0x1ae   : > { %v1589_v51 = vpop.f32.mrf.mxu2  ;;  %v3589_v2 = vrot.slane %v3588_v39, 4 }
 0x1af   : > { %v1633_v21 = vadd.f32 %v1589_v51, %v1204_v24  ;;  %v1904_v50 = vpop.f32.mrf.mxu3  ;;  %v2842_v24 = vunpack.c.l.b16 %v2743_v14  ;;  %v7362_v14 = vld [vmem:[#allocation3_spill] sm:$0xff] }
 0x1b0   : > { %v1162_v5 = vpop.f32.mrf.mxu1 }
 0x1b1   : > { %v1948_v22 = vadd.f32 %v1904_v50, %v1633_v21  ;;  %v1205_v1 = vadd.f32 %v1162_v5, %v7361_v47  ;;  %v2868_v18 = vpack.c.b16 %v2842_v24, %v2841_v31  ;;  %v3865_v21 = vpack.c.b16 %v3839_v41, %v3838_v33  ;;  %v5498_v5 = vld [vmem:[%s5836_s11 + $0x60] sm:$0xe]  ;;  %v5417_v33 = vld [vmem:[%s5836_s11 + $0x6c] sm:$0xf]  ;;  %v6972_v41 = vld [vmem:[%s5836_s11 + $0x70] sm:$0xf] }
 0x1b2   : > { %v2588_v38 = vpop.f32.mrf.mxu0  ;;  %v4291_v50 = vpack.c.b16 %v4265_v12, %v4264_v25  ;;  %v2748_v47 = vrot.slane %v2746_v63, 4  ;;  %v4172_v31 = vrot.slane %v5416_v59, 5 }
 0x1b3   : > { %v6958_v61 = vadd.f32 %v2586_v48, %v1948_v22  ;;  %v4169_v48 = vrot.slane %v6934_v11, 5  ;;  %v5194_v22 = vrot.slane %v5178_v36, 9  ;;  %v5514_v11 = vrot.slane %v5498_v5, 9 }
 0x1b4   : > { %v2750_v57 = vsel %vm5980_vm5, %v2748_v47, %v2749_v7 }
 0x1b5   : > { %v4171_v34 = vrot.slane %v4169_v48, 4  ;;  %v2747_v12 = vsel %vm5980_vm5, %v5194_v22, %v2746_v63  ;;  %v3596_v63 = vshrl.u32 %v5417_v33, 16  ;;  %v2844_v5 = vunpack.c.l.b16 %v2750_v57 }
 0x1b6   : > { %v1591_v37 = vpop.f32.mrf.mxu2 }
 0x1b7   : > { %v1634_v51 = vadd.f32 %v1591_v37, %v1205_v1  ;;  %v1906_v62 = vpop.f32.mrf.mxu3  ;;  %v3579_v1 = vrot.slane %v3578_v60, 4  ;;  %v4170_v60 = vsel %vm5980_vm5, %v5514_v11, %v4169_v48  ;;  %v4173_v39 = vsel %vm5980_vm5, %v4171_v34, %v4172_v31 }
 0x1b8   : > { %v1165_v16 = vpop.f32.mrf.mxu1  ;;  %v3598_v47 = vrot.slane %v3596_v63, 4 }
 0x1b9   : > { %v1949_v43 = vadd.f32 %v1906_v62, %v1634_v51  ;;  %v1206_v56 = vadd.f32 %v1165_v16, %v7362_v14  ;;  %v3584_v37 = vsel %vm5976_vm4, %v3579_v1, %v6955_v30  ;;  %v3599_v51 = vshll.u32 %v5417_v33, 16  ;;  %v5660_v33 = vld [vmem:[%s5836_s11 + $0x60] sm:$0xff] }
 0x1ba   : > { %v2591_v45 = vpop.f32.mrf.mxu0  ;;  %v3605_v62 = vshll.u32 %v6972_v41, 16  ;;  %v4266_v14 = vunpack.c.l.b16 %v4170_v60 }
 0x1bb   : > { %2976 = vmatmul.bf16.gmra.mxu1 %v2868_v18  ;;  %3291 = vmatmul.bf16.gmra.mxu2 %v5659_v26  ;;  %v6968_v24 = vadd.f32 %v2588_v38, %v1949_v43  ;;  %v3594_v38 = vsel %vm5976_vm4, %v3589_v2, %v3593_v55  ;;  %v3609_v18 = vshrl.u32 %v6972_v41, 16  ;;  %v7363_v26 = vld [vmem:[#allocation4_spill] sm:$0xff]  ;;  %v3840_v43 = vunpack.c.l.b16 %v3584_v37 }
 0x1bc   : > { %3973 = vmatmul.bf16.gmra.mxu3 %v3865_v21  ;;  %v3841_v48 = vunpack.c.l.b16 %v3594_v38  ;;  %v3601_v17 = vrot.slane %v3599_v51, 5  ;;  %v6992_v7 = vrot.slane %v3605_v62, 5  ;;  %v5419_v2 = vld [vmem:[%s5836_s11 + $0x74] sm:$0x1]  ;;  %v4176_v62 = vrot.slane %v6972_v41, 5 }
 0x1bd   : > { %4399 = vmatmul.bf16.gmra.mxu0 %v4291_v50  ;;  %v2843_v50 = vunpack.c.l.b16 %v2747_v12  ;;  %v3611_v1 = vrot.slane %v3609_v18, 4  ;;  %v5743_v12 = vld [vmem:[%s5836_s11 + $0x64] sm:$0xf]  ;;  %v3615_v60 = vshll.u32 %v5419_v2, 16  ;;  %v5499_v18 = vld [vmem:[%s5836_s11 + $0x6c] sm:$0xe] }
 0x1be   : > { %v1594_v25 = vpop.f32.mrf.mxu2  ;;  %v2753_v57 = vrot.slane %v5743_v12, 5  ;;  %v4179_v41 = vrot.slane %v5419_v2, 5 }
 0x1bf   : > { %v1635_v36 = vadd.f32 %v1594_v25, %v1206_v56  ;;  %v1909_v59 = vpop.f32.mrf.mxu3  ;;  %v4267_v56 = vunpack.c.l.b16 %v4173_v39  ;;  %v2869_v31 = vpack.c.b16 %v2844_v5, %v2843_v50  ;;  %v3866_v25 = vpack.c.b16 %v3841_v48, %v3840_v43  ;;  %v7004_v50 = vld [vmem:[%s5836_s11 + $0x7c] sm:$0xf]  ;;  %v5744_v43 = vld [vmem:[%s5836_s11 + $0x68] sm:$0x1] }
 0x1c0   : > { %v1167_v4 = vpop.f32.mrf.mxu1  ;;  %v3612_v38 = vor.u32 %v3611_v1, %v6992_v7  ;;  %v2756_v48 = vrot.slane %v5744_v43, 5  ;;  %v4178_v1 = vrot.slane %v4176_v62, 4  ;;  %v5422_v43 = vld [vmem:[%s5836_s11 + $0x80] sm:$0x1] }
 0x1c1   : > { %v1950_v30 = vadd.f32 %v1909_v59, %v1635_v36  ;;  %v1207_v16 = vadd.f32 %v1167_v4, %v7363_v26  ;;  %v5179_v36 = vld [vmem:[%s5836_s11 + $0x60] sm:$0xe]  ;;  %v3602_v59 = vor.u32 %v3601_v17, %v3598_v47  ;;  %v7364_v4 = vld [vmem:[#allocation5_spill] sm:$0xff]  ;;  %v2755_v26 = vrot.slane %v2753_v57, 4 }
 0x1c2   : > { %v2593_v21 = vpop.f32.mrf.mxu0  ;;  %v3617_v47 = vrot.slane %v3615_v60, 5  ;;  %v5515_v17 = vrot.slane %v5499_v18, 9 }
 0x1c3   : > { %v6990_v22 = vadd.f32 %v2591_v45, %v1950_v30  ;;  %v4292_v45 = vpack.c.b16 %v4267_v56, %v4266_v14  ;;  %v5195_v30 = vrot.slane %v5179_v36, 9  ;;  %v3603_v14 = vrot.slane %v3602_v59, 4 }
 0x1c4   : > { %v3613_v56 = vrot.slane %v3612_v38, 4  ;;  %v7365_v38 = vld [vmem:[#allocation6_spill] sm:$0xff] }
 0x1c5   : > { %v3608_v2 = vsel %vm5976_vm4, %v3603_v14, %v6992_v7 }
 0x1c6   : > { %v1596_v55 = vpop.f32.mrf.mxu2  ;;  %v3618_v36 = vsel %vm5976_vm4, %v3613_v56, %v3617_v47  ;;  %v3842_v14 = vunpack.c.l.b16 %v3608_v2 }
 0x1c7   : > { %v1636_v11 = vadd.f32 %v1596_v55, %v1207_v16  ;;  %v1911_v34 = vpop.f32.mrf.mxu3  ;;  %v5420_v16 = vld [vmem:[%s5836_s11 + $0x78] sm:$0xf]  ;;  %v3843_v56 = vunpack.c.l.b16 %v3618_v36 }
 0x1c8   : > { %v1170_v37 = vpop.f32.mrf.mxu1  ;;  %v5500_v36 = vld [vmem:[%s5836_s11 + $0x78] sm:$0xe] }
 0x1c9   : > { %v1951_v39 = vadd.f32 %v1911_v34, %v1636_v11  ;;  %v1208_v63 = vadd.f32 %v1170_v37, %v7364_v4  ;;  %v3620_v11 = vshrl.u32 %v5420_v16, 16  ;;  %v3623_v34 = vshll.u32 %v5420_v16, 16 }
 0x1ca   : > { %v2596_v51 = vpop.f32.mrf.mxu0  ;;  %v4177_v4 = vsel %vm5980_vm5, %v5515_v17, %v4176_v62  ;;  %v5180_v17 = vld [vmem:[%s5836_s11 + $0x6c] sm:$0xe] }
 0x1cb   : > { %2981 = vmatmul.bf16.gmra.mxu1 %v2869_v31  ;;  %3296 = vmatmul.bf16.gmra.mxu2 %v5660_v33  ;;  %v7006_v5 = vadd.f32 %v2593_v21, %v1951_v39  ;;  %v3629_v31 = vshll.u32 %v7004_v50, 16  ;;  %v3633_v33 = vshrl.u32 %v7004_v50, 16  ;;  %v3625_v18 = vrot.slane %v3623_v34, 5 }
 0x1cc   : > { %3978 = vmatmul.bf16.gmra.mxu3 %v3866_v25  ;;  %v2754_v25 = vsel %vm5980_vm5, %v5195_v30, %v2753_v57  ;;  %v4180_v57 = vsel %vm5980_vm5, %v4178_v1, %v4179_v41  ;;  %v4268_v47 = vunpack.c.l.b16 %v4177_v4  ;;  %v3639_v34 = vshll.u32 %v5422_v43, 16 }
 0x1cd   : > { %4404 = vmatmul.bf16.gmra.mxu0 %v4292_v45  ;;  %v2757_v45 = vsel %vm5980_vm5, %v2755_v26, %v2756_v48  ;;  %v7025_v30 = vrot.slane %v3629_v31, 5  ;;  %v3635_v7 = vrot.slane %v3633_v33, 4  ;;  %v2845_v26 = vunpack.c.l.b16 %v2754_v25 }
 0x1ce   : > { %v1599_v55 = vpop.f32.mrf.mxu2  ;;  %v2846_v16 = vunpack.c.l.b16 %v2757_v45  ;;  %v3867_v45 = vpack.c.b16 %v3843_v56, %v3842_v14  ;;  %v4186_v14 = vrot.slane %v5422_v43, 5 }
 0x1cf   : > { %v1637_v12 = vadd.f32 %v1599_v55, %v1208_v63  ;;  %v1914_v21 = vpop.f32.mrf.mxu3  ;;  %v3622_v63 = vrot.slane %v3620_v11, 4  ;;  %v4269_v55 = vunpack.c.l.b16 %v4180_v57  ;;  %v3636_v11 = vor.u32 %v3635_v7, %v7025_v30 }
 0x1d0   : > { %v1172_v37 = vpop.f32.mrf.mxu1 }
 0x1d1   : > { %v1952_v59 = vadd.f32 %v1914_v21, %v1637_v12  ;;  %v1209_v60 = vadd.f32 %v1172_v37, %v7365_v38  ;;  %v5745_v12 = vld [vmem:[%s5836_s11 + $0x70] sm:$0xf]  ;;  %v3626_v41 = vor.u32 %v3625_v18, %v3622_v63  ;;  %v2870_v21 = vpack.c.b16 %v2846_v16, %v2845_v26  ;;  %v7366_v38 = vld [vmem:[#allocation7_spill] sm:$0xff]  ;;  %v5746_v18 = vld [vmem:[%s5836_s11 + $0x74] sm:$0x1] }
 0x1d2   : > { %v2598_v39 = vpop.f32.mrf.mxu0  ;;  %v2760_v1 = vrot.slane %v5745_v12, 5  ;;  %v5661_v37 = vld [vmem:[%s5836_s11 + $0x6c] sm:$0xff]  ;;  %v4293_v2 = vpack.c.b16 %v4269_v55, %v4268_v47  ;;  %v5196_v63 = vrot.slane %v5180_v17, 9  ;;  %v2763_v7 = vrot.slane %v5746_v18, 5  ;;  %v5423_v47 = vld [vmem:[%s5836_s11 + $0x84] sm:$0xf] }
 0x1d3   : > { %v7028_v48 = vadd.f32 %v2596_v51, %v1952_v59  ;;  %v4183_v51 = vrot.slane %v7004_v50, 5  ;;  %v3641_v26 = vrot.slane %v3639_v34, 5  ;;  %v5516_v50 = vrot.slane %v5500_v36, 9  ;;  %v7042_v55 = vld [vmem:[%s5836_s11 + $0x88] sm:$0xf]  ;;  %v7367_v36 = vld [vmem:[#allocation8_spill] sm:$0xff] }
 0x1d4   : > { %v2762_v12 = vrot.slane %v2760_v1, 4 }
 0x1d5   : > { %v4185_v16 = vrot.slane %v4183_v51, 4 }
 0x1d6   : > { %v1601_v62 = vpop.f32.mrf.mxu2 }
 0x1d7   : > { %v1638_v31 = vadd.f32 %v1601_v62, %v1209_v60  ;;  %v1916_v33 = vpop.f32.mrf.mxu3  ;;  %v3627_v60 = vrot.slane %v3626_v41, 4  ;;  %v3637_v62 = vrot.slane %v3636_v11, 4  ;;  %v2764_v41 = vsel %vm5980_vm5, %v2762_v12, %v2763_v7 }
 0x1d8   : > { %v1175_v25 = vpop.f32.mrf.mxu1 }
 0x1d9   : > { %v1953_v59 = vadd.f32 %v1916_v33, %v1638_v31  ;;  %v1210_v4 = vadd.f32 %v1175_v25, %v7366_v38  ;;  %v2761_v31 = vsel %vm5980_vm5, %v5196_v63, %v2760_v1  ;;  %v3632_v11 = vsel %vm5976_vm4, %v3627_v60, %v7025_v30 }
 0x1da   : > { %v2601_v57 = vpop.f32.mrf.mxu0  ;;  %v4184_v33 = vsel %vm5980_vm5, %v5516_v50, %v4183_v51  ;;  %v3647_v25 = vshll.u32 %v5423_v47, 16  ;;  %v2848_v63 = vunpack.c.l.b16 %v2764_v41  ;;  %v3844_v51 = vunpack.c.l.b16 %v3632_v11  ;;  %v5662_v11 = vld [vmem:[%s5836_s11 + $0x78] sm:$0xff] }
 0x1db   : > { %2986 = vmatmul.bf16.gmra.mxu1 %v2870_v21  ;;  %3301 = vmatmul.bf16.gmra.mxu2 %v5661_v37  ;;  %v7038_v56 = vadd.f32 %v2598_v39, %v1953_v59  ;;  %v3642_v39 = vsel %vm5976_vm4, %v3637_v62, %v3641_v26  ;;  %v4187_v21 = vsel %vm5980_vm5, %v4185_v16, %v4186_v14  ;;  %v3644_v37 = vshrl.u32 %v5423_v47, 16  ;;  %v5425_v14 = vld [vmem:[%s5836_s11 + $0x8c] sm:$0x1] }
 0x1dc   : > { %3983 = vmatmul.bf16.gmra.mxu3 %v3867_v45  ;;  %v3653_v45 = vshll.u32 %v7042_v55, 16  ;;  %v3845_v18 = vunpack.c.l.b16 %v3642_v39  ;;  %v4270_v7 = vunpack.c.l.b16 %v4184_v33  ;;  %v4271_v12 = vunpack.c.l.b16 %v4187_v21  ;;  %v5181_v21 = vld [vmem:[%s5836_s11 + $0x78] sm:$0xe] }
 0x1dd   : > { %4409 = vmatmul.bf16.gmra.mxu0 %v4293_v2  ;;  %v3657_v2 = vshrl.u32 %v7042_v55, 16  ;;  %v3646_v62 = vrot.slane %v3644_v37, 4  ;;  %v3649_v26 = vrot.slane %v3647_v25, 5  ;;  %v3663_v25 = vshll.u32 %v5425_v14, 16 }
 0x1de   : > { %v1604_v17 = vpop.f32.mrf.mxu2  ;;  %v7063_v50 = vrot.slane %v3653_v45, 5  ;;  %v4294_v33 = vpack.c.b16 %v4271_v12, %v4270_v7 }
 0x1df   : > { %v1639_v34 = vadd.f32 %v1604_v17, %v1210_v4  ;;  %v1919_v43 = vpop.f32.mrf.mxu3  ;;  %v2847_v4 = vunpack.c.l.b16 %v2761_v31  ;;  %v3659_v16 = vrot.slane %v3657_v2, 4 }
 0x1e0   : > { %v1177_v1 = vpop.f32.mrf.mxu1 }
 0x1e1   : > { %v1954_v30 = vadd.f32 %v1919_v43, %v1639_v34  ;;  %v1211_v59 = vadd.f32 %v1177_v1, %v7367_v36  ;;  %v2871_v41 = vpack.c.b16 %v2848_v63, %v2847_v4  ;;  %v3868_v34 = vpack.c.b16 %v3845_v18, %v3844_v51  ;;  %v5501_v36 = vld [vmem:[%s5836_s11 + $0x84] sm:$0xe]  ;;  %v5426_v63 = vld [vmem:[%s5836_s11 + $0x90] sm:$0xf]  ;;  %v5748_v18 = vld [vmem:[%s5836_s11 + $0x80] sm:$0x1] }
 0x1e2   : > { %v2603_v38 = vpop.f32.mrf.mxu0  ;;  %v3650_v1 = vor.u32 %v3649_v26, %v3646_v62  ;;  %v3660_v37 = vor.u32 %v3659_v16, %v7063_v50  ;;  %v2770_v7 = vrot.slane %v5748_v18, 5  ;;  %v7085_v26 = vld [vmem:[%s5836_s11 + $0x94] sm:$0xf] }
 0x1e3   : > { %v7060_v60 = vadd.f32 %v2601_v57, %v1954_v30  ;;  %v5747_v57 = vld [vmem:[%s5836_s11 + $0x7c] sm:$0xf]  ;;  %v4190_v30 = vrot.slane %v7042_v55, 5  ;;  %v3665_v55 = vrot.slane %v3663_v25, 5 }
 0x1e4   : > { %v2767_v43 = vrot.slane %v5747_v57, 5  ;;  %v3651_v12 = vrot.slane %v3650_v1, 4  ;;  %v3661_v62 = vrot.slane %v3660_v37, 4  ;;  %v3671_v57 = vshll.u32 %v5426_v63, 16 }
 0x1e5   : > { %v3681_v1 = vshrl.u32 %v7085_v26, 16 }
 0x1e6   : > { %v1606_v47 = vpop.f32.mrf.mxu2  ;;  %v2769_v4 = vrot.slane %v2767_v43, 4 }
 0x1e7   : > { %v1640_v17 = vadd.f32 %v1606_v47, %v1211_v59  ;;  %v1921_v31 = vpop.f32.mrf.mxu3  ;;  %v5197_v59 = vrot.slane %v5181_v21, 9  ;;  %v5517_v47 = vrot.slane %v5501_v36, 9  ;;  %v3677_v21 = vshll.u32 %v7085_v26, 16 }
 0x1e8   : > { %v2952_v39 = vpop.f32.mrf.mxu1 }
 0x1e9   : > { %v1955_v45 = vadd.f32 %v1921_v31, %v1640_v17  ;;  %v3032_v16 = vadd.f32 %v2952_v39, %v6486_v8  ;;  %v4192_v17 = vrot.slane %v4190_v30, 4  ;;  %v4193_v31 = vrot.slane %v5425_v14, 5 }
 0x1ea   : > { %v4375_v2 = vpop.f32.mrf.mxu0  ;;  %v2771_v8 = vsel %vm5980_vm5, %v2769_v4, %v2770_v7  ;;  %v3656_v14 = vsel %vm5976_vm4, %v3651_v12, %v7063_v50  ;;  %v3673_v4 = vrot.slane %v3671_v57, 5  ;;  %v7109_v7 = vrot.slane %v3677_v21, 5  ;;  %v5663_v21 = vld [vmem:[%s5836_s11 + $0x84] sm:$0xff] }
 0x1eb   : > { %2991 = vmatmul.bf16.gmra.mxu1 %v2871_v41  ;;  %3306 = vmatmul.bf16.gmra.mxu2 %v5662_v11  ;;  %v7081_v51 = vadd.f32 %v2603_v38, %v1955_v45  ;;  %v3668_v11 = vshrl.u32 %v5426_v63, 16  ;;  %v3666_v45 = vsel %vm5976_vm4, %v3661_v62, %v3665_v55  ;;  %v4194_v36 = vsel %vm5980_vm5, %v4192_v17, %v4193_v31  ;;  %v5428_v31 = vld [vmem:[%s5836_s11 + $0x98] sm:$0x1] }
 0x1ec   : > { %3988 = vmatmul.bf16.gmra.mxu3 %v3868_v34  ;;  %v2850_v18 = vunpack.c.l.b16 %v2771_v8  ;;  %v3846_v12 = vunpack.c.l.b16 %v3656_v14  ;;  %v3847_v62 = vunpack.c.l.b16 %v3666_v45 }
 0x1ed   : > { %7369 = vst [vmem:[#allocation2_spill] sm:$0xff] %v7081_v51  ;;  %4414 = vmatmul.bf16.gmra.mxu0 %v4294_v33  ;;  %v2768_v33 = vsel %vm5980_vm5, %v5197_v59, %v2767_v43  ;;  %v4191_v43 = vsel %vm5980_vm5, %v5517_v47, %v4190_v30  ;;  %v3670_v59 = vrot.slane %v3668_v11, 4  ;;  %v3683_v30 = vrot.slane %v3681_v1, 4  ;;  %v7370_v47 = vld [vmem:[#allocation9_spill] sm:$0xff]  ;;  %v5182_v1 = vld [vmem:[%s5836_s11 + $0x84] sm:$0xe] }
 0x1ee   : > { %v3267_v41 = vpop.f32.mrf.mxu2  ;;  %v2849_v50 = vunpack.c.l.b16 %v2768_v33  ;;  %v4272_v55 = vunpack.c.l.b16 %v4191_v43  ;;  %v3687_v43 = vshll.u32 %v5428_v31, 16  ;;  %v5502_v51 = vld [vmem:[%s5836_s11 + $0x90] sm:$0xe] }
 0x1ef   : > { %v3347_v38 = vadd.f32 %v3267_v41, %v3032_v16  ;;  %v3949_v34 = vpop.f32.mrf.mxu3  ;;  %v4273_v16 = vunpack.c.l.b16 %v4194_v36  ;;  %v3674_v57 = vor.u32 %v3673_v4, %v3670_v59  ;;  %v3684_v8 = vor.u32 %v3683_v30, %v7109_v7  ;;  %v5750_v4 = vld [vmem:[%s5836_s11 + $0x8c] sm:$0x1] }
 0x1f0   : > { %v2954_v37 = vpop.f32.mrf.mxu1  ;;  %v2872_v33 = vpack.c.b16 %v2850_v18, %v2849_v50 }
 0x1f1   : > { %v4029_v39 = vadd.f32 %v3949_v34, %v3347_v38  ;;  %v3033_v17 = vadd.f32 %v2954_v37, %v7370_v47  ;;  %v5749_v38 = vld [vmem:[%s5836_s11 + $0x88] sm:$0xf]  ;;  %v4295_v45 = vpack.c.b16 %v4273_v16, %v4272_v55  ;;  %v4197_v37 = vrot.slane %v7085_v26, 5  ;;  %v5429_v16 = vld [vmem:[%s5836_s11 + $0x9c] sm:$0xf] }
 0x1f2   : > { %v4377_v25 = vpop.f32.mrf.mxu0  ;;  %v2774_v11 = vrot.slane %v5749_v38, 5  ;;  %v5198_v38 = vrot.slane %v5182_v1, 9  ;;  %v3675_v50 = vrot.slane %v3674_v57, 4  ;;  %v3685_v30 = vrot.slane %v3684_v8, 4 }
 0x1f3   : > { %v4455_v63 = vadd.f32 %v4375_v2, %v4029_v39  ;;  %v3869_v39 = vpack.c.b16 %v3847_v62, %v3846_v12  ;;  %v3689_v12 = vrot.slane %v3687_v43, 5  ;;  %v5518_v62 = vrot.slane %v5502_v51, 9 }
 0x1f4   : > { %v2776_v59 = vrot.slane %v2774_v11, 4  ;;  %v4199_v26 = vrot.slane %v4197_v37, 4  ;;  %v4200_v55 = vrot.slane %v5428_v31, 5  ;;  %v2775_v57 = vsel %vm5980_vm5, %v5198_v38, %v2774_v11 }
 0x1f5   : > { %4487 = vst [vmem:[%s7107_s18] sm:$0xff] %v4455_v63  ;;  %v3680_v51 = vsel %vm5976_vm4, %v3675_v50, %v7109_v7  ;;  %v4198_v38 = vsel %vm5980_vm5, %v5518_v62, %v4197_v37 }
 0x1f6   : > { %v3269_v41 = vpop.f32.mrf.mxu2  ;;  %v4201_v7 = vsel %vm5980_vm5, %v4199_v26, %v4200_v55  ;;  %v3848_v50 = vunpack.c.l.b16 %v3680_v51  ;;  %v5431_v55 = vld [vmem:[%s5836_s11 + $0xa4] sm:$0x1] }
 0x1f7   : > { %v3348_v2 = vadd.f32 %v3269_v41, %v3033_v17  ;;  %v3951_v34 = vpop.f32.mrf.mxu3  ;;  %v2777_v17 = vrot.slane %v5750_v4, 5  ;;  %v4556_v41 = vmul.f32 %v4455_v63, %v4455_v63  ;;  %v7125_v4 = vld [vmem:[%s5836_s11 + $0xa0] sm:$0xf] }
 0x1f8   : > { %v2957_v14 = vpop.f32.mrf.mxu1  ;;  %v3705_v11 = vshrl.u32 %v7125_v4, 16 }
 0x1f9   : > { %v4030_v36 = vadd.f32 %v3951_v34, %v3348_v2  ;;  %v3034_v1 = vadd.f32 %v2957_v14, %v6529_v58  ;;  %v3690_v58 = vsel %vm5976_vm4, %v3685_v30, %v3689_v12  ;;  %v3701_v14 = vshll.u32 %v7125_v4, 16 }
 0x1fa   : > { %v4380_v47 = vpop.f32.mrf.mxu0 }
 0x1fb   : > { %v4456_v18 = vadd.f32 %v4377_v25, %v4030_v36  ;;  %2996 = vmatmul.bf16.gmra.mxu1 %v2872_v33  ;;  %3311 = vmatmul.bf16.gmra.mxu2 %v5663_v21  ;;  %v2778_v33 = vsel %vm5980_vm5, %v2776_v59, %v2777_v17  ;;  %v2851_v59 = vunpack.c.l.b16 %v2775_v57 }
 0x1fc   : > { %3993 = vmatmul.bf16.gmra.mxu3 %v3869_v39  ;;  %v3695_v39 = vshll.u32 %v5429_v16, 16  ;;  %v2852_v17 = vunpack.c.l.b16 %v2778_v33 }
 0x1fd   : > { %4419 = vmatmul.bf16.gmra.mxu0 %v4295_v45  ;;  %4488 = vst [vmem:[%s7107_s18 + $0x8] sm:$0xff] %v4456_v18  ;;  %v4519_v2 = vadd.f32 %v4456_v18, %v4455_v63  ;;  %v4557_v34 = vmul.f32 %v4456_v18, %v4456_v18  ;;  %v3692_v63 = vshrl.u32 %v5429_v16, 16  ;;  %v3849_v16 = vunpack.c.l.b16 %v3690_v58 }
 0x1fe   : > { %v3272_v25 = vpop.f32.mrf.mxu2  ;;  %v3697_v12 = vrot.slane %v3695_v39, 5  ;;  %v2873_v33 = vpack.c.b16 %v2852_v17, %v2851_v59  ;;  %v5751_v39 = vld [vmem:[%s5836_s11 + $0x94] sm:$0xf]  ;;  %v5503_v59 = vld [vmem:[%s5836_s11 + $0x9c] sm:$0xe] }
 0x1ff   : > { %v4588_v31 = vadd.f32 %v4557_v34, %v4556_v41  ;;  %v3349_v21 = vadd.f32 %v3272_v25, %v3034_v1  ;;  %v3954_v8 = vpop.f32.mrf.mxu3  ;;  %v3694_v30 = vrot.slane %v3692_v63, 4  ;;  %v4274_v41 = vunpack.c.l.b16 %v4198_v38  ;;  %v5183_v63 = vld [vmem:[%s5836_s11 + $0x90] sm:$0xe] }
 0x200   : > { %v2959_v45 = vpop.f32.mrf.mxu1  ;;  %v4275_v34 = vunpack.c.l.b16 %v4201_v7  ;;  %v7142_v1 = vrot.slane %v3701_v14, 5  ;;  %v3707_v25 = vrot.slane %v3705_v11, 4  ;;  %v2781_v58 = vrot.slane %v5751_v39, 5 }
 0x201   : > { %v4031_v43 = vadd.f32 %v3954_v8, %v3349_v21  ;;  %v3035_v26 = vadd.f32 %v2959_v45, %v6531_v9  ;;  %v5664_v8 = vld [vmem:[%s5836_s11 + $0x90] sm:$0xff]  ;;  %v3698_v14 = vor.u32 %v3697_v12, %v3694_v30  ;;  %v3870_v11 = vpack.c.b16 %v3849_v16, %v3848_v50  ;;  %v5752_v30 = vld [vmem:[%s5836_s11 + $0x98] sm:$0x1]  ;;  %v5432_v16 = vld [vmem:[%s5836_s11 + $0xa8] sm:$0xf] }
 0x202   : > { %v4382_v36 = vpop.f32.mrf.mxu0  ;;  %v3708_v38 = vor.u32 %v3707_v25, %v7142_v1  ;;  %v3711_v9 = vshll.u32 %v5431_v55, 16  ;;  %v5199_v17 = vrot.slane %v5183_v63, 9  ;;  %v2784_v12 = vrot.slane %v5752_v30, 5 }
 0x203   : > { %v4457_v18 = vadd.f32 %v4380_v47, %v4031_v43  ;;  %v3699_v50 = vrot.slane %v3698_v14, 4  ;;  %v5519_v25 = vrot.slane %v5503_v59, 9  ;;  %v3719_v63 = vshll.u32 %v5432_v16, 16 }
 0x205   : > { %4489 = vst [vmem:[%s7107_s18 + $0x10] sm:$0xff] %v4457_v18  ;;  %v4520_v37 = vadd.f32 %v4519_v2, %v4457_v18  ;;  %v4558_v62 = vmul.f32 %v4457_v18, %v4457_v18  ;;  %v4296_v2 = vpack.c.b16 %v4275_v34, %v4274_v41  ;;  %v3709_v41 = vrot.slane %v3708_v38, 4 }
 0x206   : > { %v3274_v57 = vpop.f32.mrf.mxu2  ;;  %v3713_v34 = vrot.slane %v3711_v9, 5 }
 0x207   : > { %v4589_v47 = vadd.f32 %v4588_v31, %v4558_v62  ;;  %v3350_v51 = vadd.f32 %v3274_v57, %v3035_v26  ;;  %v3956_v21 = vpop.f32.mrf.mxu3  ;;  %v4204_v31 = vrot.slane %v7125_v4, 5  ;;  %v2783_v62 = vrot.slane %v2781_v58, 4 }
 0x208   : > { %v2962_v43 = vpop.f32.mrf.mxu1  ;;  %v4207_v26 = vrot.slane %v5431_v55, 5 }
 0x209   : > { %v4032_v45 = vadd.f32 %v3956_v21, %v3350_v51  ;;  %v3036_v51 = vadd.f32 %v2962_v43, %v6590_v10  ;;  %v2785_v55 = vsel %vm5980_vm5, %v2783_v62, %v2784_v12  ;;  %v3704_v10 = vsel %vm5976_vm4, %v3699_v50, %v7142_v1 }
 0x20a   : > { %v4385_v7 = vpop.f32.mrf.mxu0  ;;  %v3721_v1 = vrot.slane %v3719_v63, 5  ;;  %v2854_v30 = vunpack.c.l.b16 %v2785_v55  ;;  %v3850_v12 = vunpack.c.l.b16 %v3704_v10  ;;  %v5665_v55 = vld [vmem:[%s5836_s11 + $0x9c] sm:$0xff] }
 0x20b   : > { %v4458_v18 = vadd.f32 %v4382_v36, %v4032_v45  ;;  %3001 = vmatmul.bf16.gmra.mxu1 %v2873_v33  ;;  %3316 = vmatmul.bf16.gmra.mxu2 %v5664_v8  ;;  %v4206_v36 = vrot.slane %v4204_v31, 4  ;;  %v7158_v33 = vld [vmem:[%s5836_s11 + $0xac] sm:$0xf]  ;;  %v3716_v8 = vshrl.u32 %v5432_v16, 16  ;;  %v5184_v10 = vld [vmem:[%s5836_s11 + $0x9c] sm:$0xe] }
 0x20c   : > { %3998 = vmatmul.bf16.gmra.mxu3 %v3870_v11  ;;  %v2782_v11 = vsel %vm5980_vm5, %v5199_v17, %v2781_v58  ;;  %v3725_v43 = vshll.u32 %v7158_v33, 16  ;;  %v4205_v58 = vsel %vm5980_vm5, %v5519_v25, %v4204_v31 }
 0x20d   : > { %4424 = vmatmul.bf16.gmra.mxu0 %v4296_v2  ;;  %4490 = vst [vmem:[%s7107_s18 + $0x18] sm:$0xff] %v4458_v18  ;;  %v4521_v57 = vadd.f32 %v4520_v37, %v4458_v18  ;;  %v4559_v4 = vmul.f32 %v4458_v18, %v4458_v18  ;;  %v3714_v37 = vsel %vm5976_vm4, %v3709_v41, %v3713_v34  ;;  %v2853_v17 = vunpack.c.l.b16 %v2782_v11 }
 0x20e   : > { %v3277_v21 = vpop.f32.mrf.mxu2  ;;  %v4208_v59 = vsel %vm5980_vm5, %v4206_v36, %v4207_v26  ;;  %v3718_v18 = vrot.slane %v3716_v8, 4  ;;  %v3851_v50 = vunpack.c.l.b16 %v3714_v37  ;;  %v4276_v16 = vunpack.c.l.b16 %v4205_v58  ;;  %v5504_v58 = vld [vmem:[%s5836_s11 + $0xa8] sm:$0xe] }
 0x20f   : > { %v4590_v39 = vadd.f32 %v4589_v47, %v4559_v4  ;;  %v3351_v14 = vadd.f32 %v3277_v21, %v3036_v51  ;;  %v3959_v45 = vpop.f32.mrf.mxu3  ;;  %v3729_v47 = vshrl.u32 %v7158_v33, 16  ;;  %v4277_v41 = vunpack.c.l.b16 %v4208_v59  ;;  %v5434_v51 = vld [vmem:[%s5836_s11 + $0xb0] sm:$0x1]  ;;  %v5753_v21 = vld [vmem:[%s5836_s11 + $0xa0] sm:$0xf] }
 0x210   : > { %v2964_v2 = vpop.f32.mrf.mxu1  ;;  %v7175_v34 = vrot.slane %v3725_v43, 5  ;;  %v3722_v8 = vor.u32 %v3721_v1, %v3718_v18  ;;  %v2874_v11 = vpack.c.b16 %v2854_v30, %v2853_v17  ;;  %v3871_v43 = vpack.c.b16 %v3851_v50, %v3850_v12  ;;  %v5754_v1 = vld [vmem:[%s5836_s11 + $0xa4] sm:$0x1] }
 0x211   : > { %v4033_v38 = vadd.f32 %v3959_v45, %v3351_v14  ;;  %v3731_v4 = vrot.slane %v3729_v47, 4  ;;  %v3037_v26 = vadd.f32 %v2964_v2, %v6592_v44  ;;  %v4297_v47 = vpack.c.b16 %v4277_v41, %v4276_v16 }
 0x212   : > { %v4387_v9 = vpop.f32.mrf.mxu0  ;;  %v4211_v59 = vrot.slane %v7158_v33, 5  ;;  %v3723_v17 = vrot.slane %v3722_v8, 4  ;;  %v5520_v16 = vrot.slane %v5504_v58, 9  ;;  %v4214_v41 = vrot.slane %v5434_v51, 5 }
 0x213   : > { %v4459_v62 = vadd.f32 %v4385_v7, %v4033_v38  ;;  %v2788_v7 = vrot.slane %v5753_v21, 5  ;;  %v3735_v38 = vshll.u32 %v5434_v51, 16  ;;  %v7191_v21 = vld [vmem:[%s5836_s11 + $0xb8] sm:$0xf] }
 0x214   : > { %v3728_v51 = vsel %vm5976_vm4, %v3723_v17, %v7175_v34 }
 0x215   : > { %4491 = vst [vmem:[%s7107_s18 + $0x20] sm:$0xff] %v4459_v62  ;;  %v4522_v31 = vadd.f32 %v4521_v57, %v4459_v62  ;;  %v4560_v25 = vmul.f32 %v4459_v62, %v4459_v62  ;;  %v3732_v57 = vor.u32 %v3731_v4, %v7175_v34  ;;  %v2790_v18 = vrot.slane %v2788_v7, 4  ;;  %v5435_v4 = vld [vmem:[%s5836_s11 + $0xb4] sm:$0xf] }
 0x216   : > { %v3279_v36 = vpop.f32.mrf.mxu2  ;;  %v2791_v62 = vrot.slane %v5754_v1, 5  ;;  %v3737_v50 = vrot.slane %v3735_v38, 5  ;;  %v4212_v38 = vsel %vm5980_vm5, %v5520_v16, %v4211_v59  ;;  %v3852_v58 = vunpack.c.l.b16 %v3728_v51  ;;  %v5755_v51 = vld [vmem:[%s5836_s11 + $0xac] sm:$0xf] }
 0x217   : > { %v4591_v63 = vadd.f32 %v4590_v39, %v4560_v25  ;;  %v3352_v14 = vadd.f32 %v3279_v36, %v3037_v26  ;;  %v3961_v45 = vpop.f32.mrf.mxu3  ;;  %v5200_v39 = vrot.slane %v5184_v10, 9  ;;  %v3733_v12 = vrot.slane %v3732_v57, 4 }
 0x218   : > { %v2967_v37 = vpop.f32.mrf.mxu1  ;;  %v4213_v36 = vrot.slane %v4211_v59, 4  ;;  %v3743_v10 = vshll.u32 %v5435_v4, 16  ;;  %v4278_v17 = vunpack.c.l.b16 %v4212_v38 }
 0x219   : > { %v4034_v44 = vadd.f32 %v3961_v45, %v3352_v14  ;;  %v3038_v26 = vadd.f32 %v2967_v37, %v6633_v3  ;;  %v2792_v14 = vsel %vm5980_vm5, %v2790_v18, %v2791_v62  ;;  %v3738_v37 = vsel %vm5976_vm4, %v3733_v12, %v3737_v50 }
 0x21a   : > { %v4390_v2 = vpop.f32.mrf.mxu0  ;;  %v4215_v34 = vsel %vm5980_vm5, %v4213_v36, %v4214_v41  ;;  %v3853_v18 = vunpack.c.l.b16 %v3738_v37  ;;  %v3745_v62 = vrot.slane %v3743_v10, 5 }
 0x21b   : > { %v4460_v30 = vadd.f32 %v4387_v9, %v4034_v44  ;;  %3006 = vmatmul.bf16.gmra.mxu1 %v2874_v11  ;;  %3321 = vmatmul.bf16.gmra.mxu2 %v5665_v55  ;;  %v2789_v9 = vsel %vm5980_vm5, %v5200_v39, %v2788_v7  ;;  %v3740_v55 = vshrl.u32 %v5435_v4, 16  ;;  %v3753_v7 = vshrl.u32 %v7191_v21, 16  ;;  %v5437_v4 = vld [vmem:[%s5836_s11 + $0xbc] sm:$0x1] }
 0x21c   : > { %4003 = vmatmul.bf16.gmra.mxu3 %v3871_v43  ;;  %v3749_v43 = vshll.u32 %v7191_v21, 16  ;;  %v2856_v44 = vunpack.c.l.b16 %v2792_v14  ;;  %v5185_v14 = vld [vmem:[%s5836_s11 + $0xa8] sm:$0xe]  ;;  %v3872_v10 = vpack.c.b16 %v3853_v18, %v3852_v58 }
 0x21d   : > { %4429 = vmatmul.bf16.gmra.mxu0 %v4297_v47  ;;  %4492 = vst [vmem:[%s7107_s18 + $0x28] sm:$0xff] %v4460_v30  ;;  %v4523_v25 = vadd.f32 %v4522_v31, %v4460_v30  ;;  %v4561_v33 = vmul.f32 %v4460_v30, %v4460_v30  ;;  %v3742_v1 = vrot.slane %v3740_v55, 4  ;;  %v4279_v30 = vunpack.c.l.b16 %v4215_v34 }
 0x21e   : > { %v3282_v8 = vpop.f32.mrf.mxu2  ;;  %v7208_v12 = vrot.slane %v3749_v43, 5  ;;  %v3755_v50 = vrot.slane %v3753_v7, 4  ;;  %v5505_v7 = vld [vmem:[%s5836_s11 + $0xb4] sm:$0xe] }
 0x21f   : > { %v4592_v45 = vadd.f32 %v4591_v63, %v4561_v33  ;;  %v3353_v11 = vadd.f32 %v3282_v8, %v3038_v26  ;;  %v3964_v31 = vpop.f32.mrf.mxu3  ;;  %v2855_v63 = vunpack.c.l.b16 %v2789_v9  ;;  %v5666_v9 = vld [vmem:[%s5836_s11 + $0xa8] sm:$0xff] }
 0x220   : > { %v2969_v3 = vpop.f32.mrf.mxu1  ;;  %v3756_v37 = vor.u32 %v3755_v50, %v7208_v12 }
 0x221   : > { %v4035_v47 = vadd.f32 %v3964_v31, %v3353_v11  ;;  %v3039_v41 = vadd.f32 %v2969_v3, %v6635_v46  ;;  %v2875_v26 = vpack.c.b16 %v2856_v44, %v2855_v63  ;;  %v2795_v11 = vrot.slane %v5755_v51, 5  ;;  %v5756_v63 = vld [vmem:[%s5836_s11 + $0xb0] sm:$0x1] }
 0x222   : > { %v4392_v57 = vpop.f32.mrf.mxu0  ;;  %v3746_v31 = vor.u32 %v3745_v62, %v3742_v1  ;;  %v3759_v46 = vshll.u32 %v5437_v4, 16  ;;  %v2798_v44 = vrot.slane %v5756_v63, 5  ;;  %v3757_v18 = vrot.slane %v3756_v37, 4 }
 0x223   : > { %v4461_v39 = vadd.f32 %v4390_v2, %v4035_v47  ;;  %v5201_v47 = vrot.slane %v5185_v14, 9  ;;  %v2797_v34 = vrot.slane %v2795_v11, 4  ;;  %v5521_v62 = vrot.slane %v5505_v7, 9 }
 0x224   : > { %v3747_v58 = vrot.slane %v3746_v31, 4  ;;  %v3761_v1 = vrot.slane %v3759_v46, 5 }
 0x225   : > { %4493 = vst [vmem:[%s7107_s18 + $0x30] sm:$0xff] %v4461_v39  ;;  %v4524_v59 = vadd.f32 %v4523_v25, %v4461_v39  ;;  %v4562_v16 = vmul.f32 %v4461_v39, %v4461_v39  ;;  %v4298_v25 = vpack.c.b16 %v4279_v30, %v4278_v17  ;;  %v5438_v39 = vld [vmem:[%s5836_s11 + $0xc0] sm:$0xf]  ;;  %v4221_v17 = vrot.slane %v5437_v4, 5 }
 0x226   : > { %v3284_v33 = vpop.f32.mrf.mxu2  ;;  %v2796_v14 = vsel %vm5980_vm5, %v5201_v47, %v2795_v11  ;;  %v2799_v4 = vsel %vm5980_vm5, %v2797_v34, %v2798_v44 }
 0x227   : > { %v4593_v2 = vadd.f32 %v4592_v45, %v4562_v16  ;;  %v3354_v36 = vadd.f32 %v3284_v33, %v3039_v41  ;;  %v3966_v8 = vpop.f32.mrf.mxu3  ;;  %v4218_v45 = vrot.slane %v7191_v21, 5  ;;  %v7224_v16 = vld [vmem:[%s5836_s11 + $0xc4] sm:$0xf]  ;;  %v3764_v33 = vshrl.u32 %v5438_v39, 16 }
 0x228   : > { %v2972_v55 = vpop.f32.mrf.mxu1  ;;  %v3773_v31 = vshll.u32 %v7224_v16, 16  ;;  %v2857_v37 = vunpack.c.l.b16 %v2796_v14  ;;  %v2858_v7 = vunpack.c.l.b16 %v2799_v4 }
 0x229   : > { %v4036_v3 = vadd.f32 %v3966_v8, %v3354_v36  ;;  %v3040_v50 = vadd.f32 %v2972_v55, %v6683_v19  ;;  %v3752_v19 = vsel %vm5976_vm4, %v3747_v58, %v7208_v12  ;;  %v4219_v11 = vsel %vm5980_vm5, %v5521_v62, %v4218_v45 }
 0x22a   : > { %v4395_v43 = vpop.f32.mrf.mxu0  ;;  %v3766_v46 = vrot.slane %v3764_v33, 4  ;;  %v3854_v47 = vunpack.c.l.b16 %v3752_v19  ;;  %v4280_v34 = vunpack.c.l.b16 %v4219_v11  ;;  %v7241_v44 = vrot.slane %v3773_v31, 5 }
 0x22b   : > { %v4462_v38 = vadd.f32 %v4392_v57, %v4036_v3  ;;  %3011 = vmatmul.bf16.gmra.mxu1 %v2875_v26  ;;  %3326 = vmatmul.bf16.gmra.mxu2 %v5666_v9  ;;  %v4220_v57 = vrot.slane %v4218_v45, 4  ;;  %v3767_v26 = vshll.u32 %v5438_v39, 16  ;;  %v2876_v33 = vpack.c.b16 %v2858_v7, %v2857_v37 }
 0x22c   : > { %4008 = vmatmul.bf16.gmra.mxu3 %v3872_v10  ;;  %v4225_v31 = vrot.slane %v7224_v16, 5 }
 0x22d   : > { %4434 = vmatmul.bf16.gmra.mxu0 %v4298_v25  ;;  %4494 = vst [vmem:[%s7107_s18 + $0x38] sm:$0xff] %v4462_v38  ;;  %v4525_v30 = vadd.f32 %v4524_v59, %v4462_v38  ;;  %v4563_v21 = vmul.f32 %v4462_v38, %v4462_v38  ;;  %v3762_v59 = vsel %vm5976_vm4, %v3757_v18, %v3761_v1  ;;  %v3769_v12 = vrot.slane %v3767_v26, 5  ;;  %v5440_v1 = vld [vmem:[%s5836_s11 + $0xc8] sm:$0x1]  ;;  %v5667_v26 = vld [vmem:[%s5836_s11 + $0xb4] sm:$0xff] }
 0x22e   : > { %v3287_v41 = vpop.f32.mrf.mxu2  ;;  %v4222_v25 = vsel %vm5980_vm5, %v4220_v57, %v4221_v17  ;;  %v3855_v38 = vunpack.c.l.b16 %v3762_v59  ;;  %v5757_v17 = vld [vmem:[%s5836_s11 + $0xb8] sm:$0xf]  ;;  %v3783_v19 = vshll.u32 %v5440_v1, 16  ;;  %v5506_v59 = vld [vmem:[%s5836_s11 + $0xc0] sm:$0xe]  ;;  %v4228_v7 = vrot.slane %v5440_v1, 5 }
 0x22f   : > { %v4594_v36 = vadd.f32 %v4593_v2, %v4563_v21  ;;  %v3355_v8 = vadd.f32 %v3287_v41, %v3040_v50  ;;  %v3969_v9 = vpop.f32.mrf.mxu3  ;;  %v3777_v2 = vshrl.u32 %v7224_v16, 16  ;;  %v4281_v63 = vunpack.c.l.b16 %v4222_v25 }
 0x230   : > { %v2974_v51 = vpop.f32.mrf.mxu1  ;;  %v3770_v21 = vor.u32 %v3769_v12, %v3766_v46  ;;  %v3873_v14 = vpack.c.b16 %v3855_v38, %v3854_v47  ;;  %v3785_v12 = vrot.slane %v3783_v19, 5  ;;  %v5441_v47 = vld [vmem:[%s5836_s11 + $0xcc] sm:$0xf] }
 0x231   : > { %v4037_v55 = vadd.f32 %v3969_v9, %v3355_v8  ;;  %v3779_v58 = vrot.slane %v3777_v2, 4  ;;  %v3041_v18 = vadd.f32 %v2974_v51, %v6685_v13  ;;  %v5186_v8 = vld [vmem:[%s5836_s11 + $0xb4] sm:$0xe]  ;;  %v4299_v4 = vpack.c.b16 %v4281_v63, %v4280_v34 }
 0x232   : > { %v4397_v10 = vpop.f32.mrf.mxu0  ;;  %v3771_v25 = vrot.slane %v3770_v21, 4  ;;  %v4227_v63 = vrot.slane %v4225_v31, 4  ;;  %v3788_v21 = vshrl.u32 %v5441_v47, 16 }
 0x233   : > { %v4463_v3 = vadd.f32 %v4395_v43, %v4037_v55  ;;  %v2802_v43 = vrot.slane %v5757_v17, 5  ;;  %v5758_v55 = vld [vmem:[%s5836_s11 + $0xbc] sm:$0x1] }
 0x234   : > { %v2805_v11 = vrot.slane %v5758_v55, 5  ;;  %v3776_v1 = vsel %vm5976_vm4, %v3771_v25, %v7241_v44 }
 0x235   : > { %4495 = vst [vmem:[%s7107_s18 + $0x40] sm:$0xff] %v4463_v3  ;;  %v4526_v45 = vadd.f32 %v4525_v30, %v4463_v3  ;;  %v4564_v39 = vmul.f32 %v4463_v3, %v4463_v3  ;;  %v3780_v30 = vor.u32 %v3779_v58, %v7241_v44  ;;  %v2804_v2 = vrot.slane %v2802_v43, 4  ;;  %v7257_v58 = vld [vmem:[%s5836_s11 + $0xd0] sm:$0xf] }
 0x236   : > { %v3289_v62 = vpop.f32.mrf.mxu2  ;;  %v5522_v3 = vrot.slane %v5506_v59, 9  ;;  %v4229_v44 = vsel %vm5980_vm5, %v4227_v63, %v4228_v7  ;;  %v5759_v63 = vld [vmem:[%s5836_s11 + $0xc4] sm:$0xf] }
 0x237   : > { %v4595_v50 = vadd.f32 %v4594_v36, %v4564_v39  ;;  %v3356_v57 = vadd.f32 %v3289_v62, %v3041_v18  ;;  %v3971_v41 = vpop.f32.mrf.mxu3  ;;  %v5202_v36 = vrot.slane %v5186_v8, 9  ;;  %v3781_v46 = vrot.slane %v3780_v30, 4 }
 0x238   : > { %v2977_v9 = vpop.f32.mrf.mxu1  ;;  %v2806_v18 = vsel %vm5980_vm5, %v2804_v2, %v2805_v11  ;;  %v4283_v2 = vunpack.c.l.b16 %v4229_v44 }
 0x239   : > { %v4038_v13 = vadd.f32 %v3971_v41, %v3356_v57  ;;  %v3042_v34 = vadd.f32 %v2977_v9, %v6712_v54  ;;  %v3791_v57 = vshll.u32 %v5441_v47, 16  ;;  %v3786_v41 = vsel %vm5976_vm4, %v3781_v46, %v3785_v12  ;;  %v5443_v46 = vld [vmem:[%s5836_s11 + $0xd4] sm:$0x1] }
 0x23a   : > { %v4400_v51 = vpop.f32.mrf.mxu0  ;;  %v4226_v9 = vsel %vm5980_vm5, %v5522_v3, %v4225_v31  ;;  %v3857_v19 = vunpack.c.l.b16 %v3786_v41 }
 0x23b   : > { %v4464_v37 = vadd.f32 %v4397_v10, %v4038_v13  ;;  %3016 = vmatmul.bf16.gmra.mxu1 %v2876_v33  ;;  %3331 = vmatmul.bf16.gmra.mxu2 %v5667_v26  ;;  %v2803_v10 = vsel %vm5980_vm5, %v5202_v36, %v2802_v43  ;;  %v3797_v33 = vshll.u32 %v7257_v58, 16  ;;  %v3801_v43 = vshrl.u32 %v7257_v58, 16 }
 0x23c   : > { %4013 = vmatmul.bf16.gmra.mxu3 %v3873_v14  ;;  %v2860_v14 = vunpack.c.l.b16 %v2806_v18  ;;  %v3790_v13 = vrot.slane %v3788_v21, 4  ;;  %v3793_v59 = vrot.slane %v3791_v57, 5  ;;  %v4282_v36 = vunpack.c.l.b16 %v4226_v9  ;;  %v5507_v57 = vld [vmem:[%s5836_s11 + $0xcc] sm:$0xe] }
 0x23d   : > { %4439 = vmatmul.bf16.gmra.mxu0 %v4299_v4  ;;  %4496 = vst [vmem:[%s7107_s18 + $0x48] sm:$0xff] %v4464_v37  ;;  %v4527_v38 = vadd.f32 %v4526_v45, %v4464_v37  ;;  %v4565_v16 = vmul.f32 %v4464_v37, %v4464_v37  ;;  %v3856_v4 = vunpack.c.l.b16 %v3776_v1  ;;  %v3799_v55 = vrot.slane %v3797_v33, 5 }
 0x23e   : > { %v3292_v39 = vpop.f32.mrf.mxu2  ;;  %v3803_v11 = vrot.slane %v3801_v43, 4  ;;  %v5760_v43 = vld [vmem:[%s5836_s11 + $0xc8] sm:$0x1] }
 0x23f   : > { %v4596_v62 = vadd.f32 %v4595_v50, %v4565_v16  ;;  %v3357_v17 = vadd.f32 %v3292_v39, %v3042_v34  ;;  %v3974_v45 = vpop.f32.mrf.mxu3  ;;  %v2859_v50 = vunpack.c.l.b16 %v2803_v10  ;;  %v5668_v16 = vld [vmem:[%s5836_s11 + $0xc0] sm:$0xff]  ;;  %v2809_v39 = vrot.slane %v5759_v63, 5 }
 0x240   : > { %v2979_v54 = vpop.f32.mrf.mxu1  ;;  %v5187_v34 = vld [vmem:[%s5836_s11 + $0xc0] sm:$0xe]  ;;  %v3794_v10 = vor.u32 %v3793_v59, %v3790_v13  ;;  %v3874_v1 = vpack.c.b16 %v3857_v19, %v3856_v4  ;;  %v4235_v4 = vrot.slane %v5443_v46, 5 }
 0x241   : > { %v4039_v26 = vadd.f32 %v3974_v45, %v3357_v17  ;;  %v3043_v37 = vadd.f32 %v2979_v54, %v6735_v42  ;;  %v2877_v3 = vpack.c.b16 %v2860_v14, %v2859_v50  ;;  %v4300_v17 = vpack.c.b16 %v4283_v2, %v4282_v36 }
 0x242   : > { %v4402_v8 = vpop.f32.mrf.mxu0  ;;  %v3807_v45 = vshll.u32 %v5443_v46, 16  ;;  %v4232_v54 = vrot.slane %v7257_v58, 5  ;;  %v2811_v33 = vrot.slane %v2809_v39, 4  ;;  %v3795_v9 = vrot.slane %v3794_v10, 4 }
 0x243   : > { %v4465_v30 = vadd.f32 %v4400_v51, %v4039_v26  ;;  %v2812_v26 = vrot.slane %v5760_v43, 5  ;;  %v5523_v14 = vrot.slane %v5507_v57, 9 }
 0x244   : > { %v3809_v50 = vrot.slane %v3807_v45, 5  ;;  %v4234_v58 = vrot.slane %v4232_v54, 4  ;;  %v3800_v46 = vsel %vm5976_vm4, %v3795_v9, %v3799_v55 }
 0x245   : > { %4497 = vst [vmem:[%s7107_s18 + $0x50] sm:$0xff] %v4465_v30  ;;  %v4528_v31 = vadd.f32 %v4527_v38, %v4465_v30  ;;  %v4566_v25 = vmul.f32 %v4465_v30, %v4465_v30  ;;  %v3804_v38 = vor.u32 %v3803_v11, %v3799_v55 }
 0x246   : > { %v3294_v12 = vpop.f32.mrf.mxu2 }
 0x247   : > { %v4597_v51 = vadd.f32 %v4596_v62, %v4566_v25  ;;  %v3358_v7 = vadd.f32 %v3294_v12, %v3043_v37  ;;  %v3976_v47 = vpop.f32.mrf.mxu3  ;;  %v5203_v62 = vrot.slane %v5187_v34, 9  ;;  %v3805_v44 = vrot.slane %v3804_v38, 4 }
 0x248   : > { %v2982_v18 = vpop.f32.mrf.mxu1  ;;  %v2813_v37 = vsel %vm5980_vm5, %v2811_v33, %v2812_v26  ;;  %v3858_v34 = vunpack.c.l.b16 %v3800_v46 }
 0x249   : > { %v4040_v21 = vadd.f32 %v3976_v47, %v3358_v7  ;;  %v3044_v13 = vadd.f32 %v2982_v18, %v6756_v20  ;;  %v2810_v25 = vsel %vm5980_vm5, %v5203_v62, %v2809_v39  ;;  %v3810_v20 = vsel %vm5976_vm4, %v3805_v44, %v3809_v50 }
 0x24a   : > { %v4405_v42 = vpop.f32.mrf.mxu0  ;;  %v2861_v47 = vunpack.c.l.b16 %v2810_v25  ;;  %v3859_v63 = vunpack.c.l.b16 %v3810_v20 }
 0x24b   : > { %v4466_v41 = vadd.f32 %v4402_v8, %v4040_v21  ;;  %3021 = vmatmul.bf16.gmra.mxu1 %v2877_v3  ;;  %3336 = vmatmul.bf16.gmra.mxu2 %v5668_v16  ;;  %v4233_v3 = vsel %vm5980_vm5, %v5523_v14, %v4232_v54  ;;  %v2862_v16 = vunpack.c.l.b16 %v2813_v37  ;;  %v5669_v21 = vld [vmem:[%s5836_s11 + $0xcc] sm:$0xff]  ;;  %s4723_s11 = sshll.u32 %s5824_s29, 1 }
 0x24c   : > { %4018 = vmatmul.bf16.gmra.mxu3 %v3874_v1  ;;  %v4284_v39 = vunpack.c.l.b16 %v4233_v3  ;;  %v3875_v57 = vpack.c.b16 %v3859_v63, %v3858_v34  ;;  %s209_s21 = scalar_lea.vmem %s7348_s4, %s4723_s11 }
 0x24d   : > { %4444 = vmatmul.bf16.gmra.mxu0 %v4300_v17  ;;  %4498 = vst [vmem:[%s7107_s18 + $0x58] sm:$0xff] %v4466_v41  ;;  %v4529_v30 = vadd.f32 %v4528_v31, %v4466_v41  ;;  %v4567_v19 = vmul.f32 %v4466_v41, %v4466_v41  ;;  %v2878_v27 = vpack.c.b16 %v2862_v16, %v2861_v47 }
 0x24e   : > { %v3297_v59 = vpop.f32.mrf.mxu2 }
 0x24f   : > { %v4598_v8 = vadd.f32 %v4597_v51, %v4567_v19  ;;  %v3359_v36 = vadd.f32 %v3297_v59, %v3044_v13  ;;  %v3979_v2 = vpop.f32.mrf.mxu3  ;;  %v4236_v51 = vsel %vm5980_vm5, %v4234_v58, %v4235_v4 }
 0x250   : > { %v2984_v11 = vpop.f32.mrf.mxu1  ;;  %v4285_v10 = vunpack.c.l.b16 %v4236_v51 }
 0x251   : > { %v4041_v31 = vadd.f32 %v3979_v2, %v3359_v36  ;;  %v3045_v23 = vadd.f32 %v2984_v11, %v6762_v29 }
 0x252   : > { %v4407_v12 = vpop.f32.mrf.mxu0  ;;  %v4301_v54 = vpack.c.b16 %v4285_v10, %v4284_v39 }
 0x253   : > { %v4467_v7 = vadd.f32 %v4405_v42, %v4041_v31 }
 0x255   : > { %4499 = vst [vmem:[%s7107_s18 + $0x60] sm:$0xff] %v4467_v7  ;;  %v4530_v55 = vadd.f32 %v4529_v30, %v4467_v7  ;;  %v4568_v18 = vmul.f32 %v4467_v7, %v4467_v7 }
 0x256   : > { %v3299_v1 = vpop.f32.mrf.mxu2 }
 0x257   : > { %v4599_v17 = vadd.f32 %v4598_v8, %v4568_v18  ;;  %v3360_v38 = vadd.f32 %v3299_v1, %v3045_v23  ;;  %v3981_v45 = vpop.f32.mrf.mxu3 }
 0x258   : > { %v2987_v42 = vpop.f32.mrf.mxu1 }
 0x259   : > { %v4042_v62 = vadd.f32 %v3981_v45, %v3360_v38  ;;  %v3046_v26 = vadd.f32 %v2987_v42, %v6779_v49 }
 0x25a   : > { %v4410_v41 = vpop.f32.mrf.mxu0 }
 0x25b   : > { %v4468_v33 = vadd.f32 %v4407_v12, %v4042_v62  ;;  %3026 = vmatmul.bf16.gmra.mxu1 %v2878_v27  ;;  %3341 = vmatmul.bf16.gmra.mxu2 %v5669_v21 }
 0x25c   : > { %4023 = vmatmul.bf16.gmra.mxu3 %v3875_v57 }
 0x25d   : > { %4449 = vmatmul.bf16.gmra.mxu0 %v4301_v54  ;;  %4500 = vst [vmem:[%s7107_s18 + $0x68] sm:$0xff] %v4468_v33  ;;  %v4531_v29 = vadd.f32 %v4530_v55, %v4468_v33  ;;  %v4569_v43 = vmul.f32 %v4468_v33, %v4468_v33 }
 0x25e   : > { %v3302_v9 = vpop.f32.mrf.mxu2 }
 0x25f   : > { %v4600_v44 = vadd.f32 %v4599_v17, %v4569_v43  ;;  %v3361_v50 = vadd.f32 %v3302_v9, %v3046_v26  ;;  %v3984_v14 = vpop.f32.mrf.mxu3 }
 0x260   : > { %v2989_v4 = vpop.f32.mrf.mxu1 }
 0x261   : > { %v4043_v30 = vadd.f32 %v3984_v14, %v3361_v50  ;;  %v3047_v8 = vadd.f32 %v2989_v4, %v6796_v15 }
 0x262   : > { %v4412_v19 = vpop.f32.mrf.mxu0 }
 0x263   : > { %v4469_v13 = vadd.f32 %v4410_v41, %v4043_v30 }
 0x265   : > { %4501 = vst [vmem:[%s7107_s18 + $0x70] sm:$0xff] %v4469_v13  ;;  %v4532_v58 = vadd.f32 %v4531_v29, %v4469_v13  ;;  %v4570_v59 = vmul.f32 %v4469_v13, %v4469_v13 }
 0x266   : > { %v3304_v36 = vpop.f32.mrf.mxu2 }
 0x267   : > { %v4601_v2 = vadd.f32 %v4600_v44, %v4570_v59  ;;  %v3362_v11 = vadd.f32 %v3304_v36, %v3047_v8  ;;  %v3986_v25 = vpop.f32.mrf.mxu3 }
 0x268   : > { %v2992_v37 = vpop.f32.mrf.mxu1 }
 0x269   : > { %v4044_v49 = vadd.f32 %v3986_v25, %v3362_v11  ;;  %v3048_v3 = vadd.f32 %v2992_v37, %v6818_v6 }
 0x26a   : > { %v4415_v46 = vpop.f32.mrf.mxu0 }
 0x26b   : > { %v4470_v31 = vadd.f32 %v4412_v19, %v4044_v49 }
 0x26d   : > { %4502 = vst [vmem:[%s7107_s18 + $0x78] sm:$0xff] %v4470_v31  ;;  %v4533_v12 = vadd.f32 %v4532_v58, %v4470_v31  ;;  %v4571_v20 = vmul.f32 %v4470_v31, %v4470_v31 }
 0x26e   : > { %v3307_v51 = vpop.f32.mrf.mxu2 }
 0x26f   : > { %v4602_v7 = vadd.f32 %v4601_v2, %v4571_v20  ;;  %v3363_v47 = vadd.f32 %v3307_v51, %v3048_v3  ;;  %v3989_v16 = vpop.f32.mrf.mxu3 }
 0x270   : > { %v2994_v34 = vpop.f32.mrf.mxu1 }
 0x271   : > { %v4045_v15 = vadd.f32 %v3989_v16, %v3363_v47  ;;  %v3049_v18 = vadd.f32 %v2994_v34, %v6828_v53 }
 0x272   : > { %v4417_v63 = vpop.f32.mrf.mxu0 }
 0x273   : > { %v4471_v39 = vadd.f32 %v4415_v46, %v4045_v15 }
 0x275   : > { %4503 = vst [vmem:[%s7107_s18 + $0x80] sm:$0xff] %v4471_v39  ;;  %v4534_v10 = vadd.f32 %v4533_v12, %v4471_v39  ;;  %v4572_v55 = vmul.f32 %v4471_v39, %v4471_v39 }
 0x276   : > { %v3309_v23 = vpop.f32.mrf.mxu2 }
 0x277   : > { %v4603_v1 = vadd.f32 %v4602_v7, %v4572_v55  ;;  %v3364_v17 = vadd.f32 %v3309_v23, %v3049_v18  ;;  %v3991_v38 = vpop.f32.mrf.mxu3 }
 0x278   : > { %v2997_v45 = vpop.f32.mrf.mxu1 }
 0x279   : > { %v4046_v6 = vadd.f32 %v3991_v38, %v3364_v17  ;;  %v3050_v54 = vadd.f32 %v2997_v45, %v6850_v52 }
 0x27a   : > { %v4420_v27 = vpop.f32.mrf.mxu0 }
 0x27b   : > { %v4472_v21 = vadd.f32 %v4417_v63, %v4046_v6 }
 0x27d   : > { %4504 = vst [vmem:[%s7107_s18 + $0x88] sm:$0xff] %v4472_v21  ;;  %v4535_v42 = vadd.f32 %v4534_v10, %v4472_v21  ;;  %v4573_v57 = vmul.f32 %v4472_v21, %v4472_v21 }
 0x27e   : > { %v3312_v62 = vpop.f32.mrf.mxu2 }
 0x27f   : > { %v4604_v41 = vadd.f32 %v4603_v1, %v4573_v57  ;;  %v3365_v33 = vadd.f32 %v3312_v62, %v3050_v54  ;;  %v3994_v29 = vpop.f32.mrf.mxu3 }
 0x280   : > { %v2999_v43 = vpop.f32.mrf.mxu1 }
 0x281   : > { %v4047_v53 = vadd.f32 %v3994_v29, %v3365_v33  ;;  %v3051_v14 = vadd.f32 %v2999_v43, %v6866_v35 }
 0x282   : > { %v4422_v26 = vpop.f32.mrf.mxu0 }
 0x283   : > { %v4473_v9 = vadd.f32 %v4420_v27, %v4047_v53 }
 0x285   : > { %4505 = vst [vmem:[%s7107_s18 + $0x90] sm:$0xff] %v4473_v9  ;;  %v4536_v44 = vadd.f32 %v4535_v42, %v4473_v9  ;;  %v4574_v50 = vmul.f32 %v4473_v9, %v4473_v9 }
 0x286   : > { %v3314_v4 = vpop.f32.mrf.mxu2 }
 0x287   : > { %v4605_v30 = vadd.f32 %v4604_v41, %v4574_v50  ;;  %v3366_v19 = vadd.f32 %v3314_v4, %v3051_v14  ;;  %v3996_v13 = vpop.f32.mrf.mxu3 }
 0x288   : > { %v3002_v58 = vpop.f32.mrf.mxu1 }
 0x289   : > { %v4048_v52 = vadd.f32 %v3996_v13, %v3366_v19  ;;  %v3052_v11 = vadd.f32 %v3002_v58, %v6888_v28 }
 0x28a   : > { %v4425_v59 = vpop.f32.mrf.mxu0 }
 0x28b   : > { %v4474_v8 = vadd.f32 %v4422_v26, %v4048_v52 }
 0x28d   : > { %4506 = vst [vmem:[%s7107_s18 + $0x98] sm:$0xff] %v4474_v8  ;;  %v4537_v36 = vadd.f32 %v4536_v44, %v4474_v8  ;;  %v4575_v2 = vmul.f32 %v4474_v8, %v4474_v8 }
 0x28e   : > { %v3317_v25 = vpop.f32.mrf.mxu2 }
 0x28f   : > { %v4606_v37 = vadd.f32 %v4605_v30, %v4575_v2  ;;  %v3367_v49 = vadd.f32 %v3317_v25, %v3052_v11  ;;  %v3999_v46 = vpop.f32.mrf.mxu3 }
 0x290   : > { %v3004_v31 = vpop.f32.mrf.mxu1 }
 0x291   : > { %v4049_v35 = vadd.f32 %v3999_v46, %v3367_v49  ;;  %v3053_v7 = vadd.f32 %v3004_v31, %v6898_v0 }
 0x292   : > { %v4427_v12 = vpop.f32.mrf.mxu0 }
 0x293   : > { %v4475_v20 = vadd.f32 %v4425_v59, %v4049_v35 }
 0x295   : > { %4507 = vst [vmem:[%s7107_s18 + $0xa0] sm:$0xff] %v4475_v20  ;;  %v4538_v3 = vadd.f32 %v4537_v36, %v4475_v20  ;;  %v4576_v51 = vmul.f32 %v4475_v20, %v4475_v20 }
 0x296   : > { %v3319_v47 = vpop.f32.mrf.mxu2 }
 0x297   : > { %v4607_v16 = vadd.f32 %v4606_v37, %v4576_v51  ;;  %v3368_v34 = vadd.f32 %v3319_v47, %v3053_v7  ;;  %v4001_v15 = vpop.f32.mrf.mxu3 }
 0x298   : > { %v3007_v63 = vpop.f32.mrf.mxu1 }
 0x299   : > { %v4050_v28 = vadd.f32 %v4001_v15, %v3368_v34  ;;  %v3054_v23 = vadd.f32 %v3007_v63, %v6920_v32 }
 0x29a   : > { %v4430_v39 = vpop.f32.mrf.mxu0 }
 0x29b   : > { %v4476_v10 = vadd.f32 %v4427_v12, %v4050_v28 }
 0x29d   : > { %4508 = vst [vmem:[%s7107_s18 + $0xa8] sm:$0xff] %v4476_v10  ;;  %v4539_v55 = vadd.f32 %v4538_v3, %v4476_v10  ;;  %v4577_v18 = vmul.f32 %v4476_v10, %v4476_v10 }
 0x29e   : > { %v3322_v1 = vpop.f32.mrf.mxu2 }
 0x29f   : > { %v4608_v17 = vadd.f32 %v4607_v16, %v4577_v18  ;;  %v3369_v38 = vadd.f32 %v3322_v1, %v3054_v23  ;;  %v4004_v45 = vpop.f32.mrf.mxu3 }
 0x2a0   : > { %v3009_v6 = vpop.f32.mrf.mxu1 }
 0x2a1   : > { %v4051_v0 = vadd.f32 %v4004_v45, %v3369_v38  ;;  %v3055_v54 = vadd.f32 %v3009_v6, %v6936_v40 }
 0x2a2   : > { %v4432_v27 = vpop.f32.mrf.mxu0 }
 0x2a3   : > { %v4477_v21 = vadd.f32 %v4430_v39, %v4051_v0 }
 0x2a5   : > { %4509 = vst [vmem:[%s7107_s18 + $0xb0] sm:$0xff] %v4477_v21  ;;  %v4540_v42 = vadd.f32 %v4539_v55, %v4477_v21  ;;  %v4578_v57 = vmul.f32 %v4477_v21, %v4477_v21 }
 0x2a6   : > { %v3324_v62 = vpop.f32.mrf.mxu2 }
 0x2a7   : > { %v4609_v41 = vadd.f32 %v4608_v17, %v4578_v57  ;;  %v3370_v33 = vadd.f32 %v3324_v62, %v3055_v54  ;;  %v4006_v29 = vpop.f32.mrf.mxu3 }
 0x2a8   : > { %v3012_v43 = vpop.f32.mrf.mxu1 }
 0x2a9   : > { %v4052_v32 = vadd.f32 %v4006_v29, %v3370_v33  ;;  %v3056_v50 = vadd.f32 %v3012_v43, %v6958_v61 }
 0x2aa   : > { %v4435_v53 = vpop.f32.mrf.mxu0 }
 0x2ab   : > { %v4478_v26 = vadd.f32 %v4432_v27, %v4052_v32 }
 0x2ad   : > { %4510 = vst [vmem:[%s7107_s18 + $0xb8] sm:$0xff] %v4478_v26  ;;  %v4541_v9 = vadd.f32 %v4540_v42, %v4478_v26  ;;  %v4579_v44 = vmul.f32 %v4478_v26, %v4478_v26 }
 0x2ae   : > { %v3327_v14 = vpop.f32.mrf.mxu2 }
 0x2af   : > { %v4610_v4 = vadd.f32 %v4609_v41, %v4579_v44  ;;  %v3371_v30 = vadd.f32 %v3327_v14, %v3056_v50  ;;  %v4009_v19 = vpop.f32.mrf.mxu3 }
 0x2b0   : > { %v3014_v13 = vpop.f32.mrf.mxu1 }
 0x2b1   : > { %v4053_v40 = vadd.f32 %v4009_v19, %v3371_v30  ;;  %v3057_v36 = vadd.f32 %v3014_v13, %v6968_v24 }
 0x2b2   : > { %v4437_v58 = vpop.f32.mrf.mxu0 }
 0x2b3   : > { %v4479_v52 = vadd.f32 %v4435_v53, %v4053_v40 }
 0x2b5   : > { %4511 = vst [vmem:[%s7107_s18 + $0xc0] sm:$0xff] %v4479_v52  ;;  %v4542_v59 = vadd.f32 %v4541_v9, %v4479_v52  ;;  %v4580_v8 = vmul.f32 %v4479_v52, %v4479_v52 }
 0x2b6   : > { %v3329_v2 = vpop.f32.mrf.mxu2 }
 0x2b7   : > { %v4611_v11 = vadd.f32 %v4610_v4, %v4580_v8  ;;  %v3372_v25 = vadd.f32 %v3329_v2, %v3057_v36  ;;  %v4011_v37 = vpop.f32.mrf.mxu3 }
 0x2b8   : > { %v3017_v49 = vpop.f32.mrf.mxu1 }
 0x2b9   : > { %v4054_v61 = vadd.f32 %v4011_v37, %v3372_v25  ;;  %v3058_v20 = vadd.f32 %v3017_v49, %v6990_v22 }
 0x2ba   : > { %v4440_v46 = vpop.f32.mrf.mxu0 }
 0x2bb   : > { %v4480_v31 = vadd.f32 %v4437_v58, %v4054_v61 }
 0x2bd   : > { %4512 = vst [vmem:[%s7107_s18 + $0xc8] sm:$0xff] %v4480_v31  ;;  %v4543_v35 = vadd.f32 %v4542_v59, %v4480_v31  ;;  %v4581_v12 = vmul.f32 %v4480_v31, %v4480_v31 }
 0x2be   : > { %v3332_v3 = vpop.f32.mrf.mxu2 }
 0x2bf   : > { %v4612_v51 = vadd.f32 %v4611_v11, %v4581_v12  ;;  %v3373_v7 = vadd.f32 %v3332_v3, %v3058_v20  ;;  %v4014_v47 = vpop.f32.mrf.mxu3  ;;  %v7371_v11 = vld [vmem:[#allocation2_spill] sm:$0xff] }
 0x2c0   : > { %v3019_v16 = vpop.f32.mrf.mxu1 }
 0x2c1   : > { %v4055_v24 = vadd.f32 %v4014_v47, %v3373_v7  ;;  %v3059_v39 = vadd.f32 %v3019_v16, %v7006_v5 }
 0x2c2   : > { %v4442_v34 = vpop.f32.mrf.mxu0 }
 0x2c3   : > { %v4481_v15 = vadd.f32 %v4440_v46, %v4055_v24 }
 0x2c5   : > { %4513 = vst [vmem:[%s7107_s18 + $0xd0] sm:$0xff] %v4481_v15  ;;  %v4544_v63 = vadd.f32 %v4543_v35, %v4481_v15  ;;  %v4582_v28 = vmul.f32 %v4481_v15, %v4481_v15 }
 0x2c6   : > { %v3334_v10 = vpop.f32.mrf.mxu2 }
 0x2c7   : > { %v4613_v55 = vadd.f32 %v4612_v51, %v4582_v28  ;;  %v3374_v18 = vadd.f32 %v3334_v10, %v3059_v39  ;;  %v4016_v23 = vpop.f32.mrf.mxu3 }
 0x2c8   : > { %v3022_v22 = vpop.f32.mrf.mxu1 }
 0x2c9   : > { %v4056_v1 = vadd.f32 %v4016_v23, %v3374_v18  ;;  %v3060_v0 = vadd.f32 %v3022_v22, %v7028_v48 }
 0x2ca   : > { %v4445_v38 = vpop.f32.mrf.mxu0 }
 0x2cb   : > { %v4482_v17 = vadd.f32 %v4442_v34, %v4056_v1 }
 0x2cd   : > { %4514 = vst [vmem:[%s7107_s18 + $0xd8] sm:$0xff] %v4482_v17  ;;  %v4545_v45 = vadd.f32 %v4544_v63, %v4482_v17  ;;  %v4583_v6 = vmul.f32 %v4482_v17, %v4482_v17 }
 0x2ce   : > { %v3337_v27 = vpop.f32.mrf.mxu2 }
 0x2cf   : > { %v4614_v21 = vadd.f32 %v4613_v55, %v4583_v6  ;;  %v3375_v42 = vadd.f32 %v3337_v27, %v3060_v0  ;;  %v4019_v57 = vpop.f32.mrf.mxu3 }
 0x2d0   : > { %v3024_v5 = vpop.f32.mrf.mxu1 }
 0x2d1   : > { %v4057_v54 = vadd.f32 %v4019_v57, %v3375_v42  ;;  %v3061_v29 = vadd.f32 %v3024_v5, %v7038_v56 }
 0x2d2   : > { %v4447_v43 = vpop.f32.mrf.mxu0 }
 0x2d3   : > { %v4483_v62 = vadd.f32 %v4445_v38, %v4057_v54 }
 0x2d5   : > { %4515 = vst [vmem:[%s7107_s18 + $0xe0] sm:$0xff] %v4483_v62  ;;  %v4546_v41 = vadd.f32 %v4545_v45, %v4483_v62  ;;  %v4584_v33 = vmul.f32 %v4483_v62, %v4483_v62 }
 0x2d6   : > { %v3339_v32 = vpop.f32.mrf.mxu2 }
 0x2d7   : > { %v4615_v53 = vadd.f32 %v4614_v21, %v4584_v33  ;;  %v3376_v26 = vadd.f32 %v3339_v32, %v3061_v29  ;;  %v4021_v9 = vpop.f32.mrf.mxu3 }
 0x2d8   : > { %v3027_v48 = vpop.f32.mrf.mxu1 }
 0x2d9   : > { %v4058_v44 = vadd.f32 %v4021_v9, %v3376_v26  ;;  %v3062_v30 = vadd.f32 %v3027_v48, %v7060_v60 }
 0x2da   : > { %v4450_v56 = vpop.f32.mrf.mxu0 }
 0x2db   : > { %v4484_v50 = vadd.f32 %v4447_v43, %v4058_v44 }
 0x2dd   : > { %4516 = vst [vmem:[%s7107_s18 + $0xe8] sm:$0xff] %v4484_v50  ;;  %v4547_v14 = vadd.f32 %v4546_v41, %v4484_v50  ;;  %v4585_v4 = vmul.f32 %v4484_v50, %v4484_v50 }
 0x2de   : > { %v3342_v19 = vpop.f32.mrf.mxu2 }
 0x2df   : > { %v4616_v13 = vadd.f32 %v4615_v53, %v4585_v4  ;;  %v3377_v40 = vadd.f32 %v3342_v19, %v3062_v30  ;;  %v4024_v58 = vpop.f32.mrf.mxu3 }
 0x2e0   : > { %v3029_v59 = vpop.f32.mrf.mxu1 }
 0x2e1   : > { %v4059_v52 = vadd.f32 %v4024_v58, %v3377_v40  ;;  %v3063_v25 = vadd.f32 %v3029_v59, %v7371_v11 }
 0x2e2   : > { %v4452_v60 = vpop.f32.mrf.mxu0 }
 0x2e3   : > { %v4485_v8 = vadd.f32 %v4450_v56, %v4059_v52 }
 0x2e5   : > { %4517 = vst [vmem:[%s7107_s18 + $0xf0] sm:$0xff] %v4485_v8  ;;  %v4548_v36 = vadd.f32 %v4547_v14, %v4485_v8  ;;  %v4586_v2 = vmul.f32 %v4485_v8, %v4485_v8 }
 0x2e6   : > { %v3344_v37 = vpop.f32.mrf.mxu2 }
 0x2e7   : > { %v4617_v49 = vadd.f32 %v4616_v13, %v4586_v2  ;;  %v3378_v61 = vadd.f32 %v3344_v37, %v3063_v25  ;;  %v4026_v46 = vpop.f32.mrf.mxu3 }
 0x2e9   : > { %v4060_v31 = vadd.f32 %v4026_v46, %v3378_v61 }
 0x2eb   : > { %v4486_v35 = vadd.f32 %v4452_v60, %v4060_v31 }
 0x2ed   : > { %4518 = vst [vmem:[%s7107_s18 + $0xf8] sm:$0xff] %v4486_v35  ;;  %v4549_v12 = vadd.f32 %v4548_v36, %v4486_v35  ;;  %v4587_v20 = vmul.f32 %v4486_v35, %v4486_v35 }
 0x2ef   : > { %v4550_v3 = vrot.slane %v4549_v12, 4  ;;  %v4618_v51 = vadd.f32 %v4617_v49, %v4587_v20 }
 0x2f1   : > { %v4551_v7 = vadd.f32 %v4550_v3, %v4549_v12  ;;  %v4619_v47 = vrot.slane %v4618_v51, 4 }
 0x2f3   : > { %v4552_v16 = vrot.slane %v4551_v7, 2  ;;  %v4620_v24 = vadd.f32 %v4619_v47, %v4618_v51 }
 0x2f5   : > { %v4553_v34 = vadd.f32 %v4552_v16, %v4551_v7  ;;  %v4621_v15 = vrot.slane %v4620_v24, 2 }
 0x2f7   : > { %v4554_v63 = vrot.slane %v4553_v34, 1  ;;  %v4622_v28 = vadd.f32 %v4621_v15, %v4620_v24 }
 0x2f9   : > { %v4623_v39 = vrot.slane %v4622_v28, 1  ;;  %v4555_v10 = vadd.f32 %v4554_v63, %v4553_v34 }
 0x2fb   : > { %v4624_v55 = vadd.f32 %v4623_v39, %v4622_v28 }
 0x2fd   : > { %v4626_v18 = vsel %vm4625_vm6, %v4555_v10, %v4624_v55 }
 0x2fe   : > { %4627 = vst [vmem:[%s209_s21] sm:$0x3] %v4626_v18 }
 0x2ff PF: > { %s15_s15 = sadd.s32 1, %s5767_s15  }
 0x300   : > { %p12_p5 = scmp.ge.s32.totalorder %s15_s15, 4  }
 0x302   :  { %14 = sbr.rel (!%p12_p5) target bundleno = 1 (0x1), region = 84 }

</bundles_post_ra>
